<compile_context>
chip_gen: v7x
topology: tpu7x:2x2x1
jax: 0.10.0
libtpu: 0.0.40
codegen_flags: <defaults>
</compile_context>

<pallas_src>
import functools

import jax
import jax.numpy as jnp
from jax import lax
from jax.experimental import pallas as pl
from jax.experimental.pallas import tpu as pltpu

BN_EPS = 1e-5
EXPANSION = 4


def _pick_tile(dim, candidates):
    for c in candidates:
        if c <= dim and dim % c == 0:
            return c
    return dim  # full-extent block (always legal)


def _fold_bn(bn):
    gamma, beta, mean, var = bn
    scale = gamma * lax.rsqrt(var + BN_EPS)
    shift = beta - mean * scale
    return scale.astype(jnp.float32), shift.astype(jnp.float32)


# ---------------------------------------------------------------------------
# Kernel 1: tiled fused matmul (1x1 conv) + BN scale/shift [+ residual] [+ ReLU]
# ---------------------------------------------------------------------------
def _mm_bn_act_kernel(*refs, relu, has_res):
    if has_res:
        a_ref, w_ref, s_ref, b_ref, r_ref, o_ref, acc_ref = refs
    else:
        a_ref, w_ref, s_ref, b_ref, o_ref, acc_ref = refs

    k = pl.program_id(2)

    @pl.when(k == 0)
    def _init():
        acc_ref[...] = jnp.zeros_like(acc_ref)

    acc_ref[...] += jnp.dot(a_ref[...], w_ref[...],
                            preferred_element_type=jnp.float32)

    @pl.when(k == pl.num_programs(2) - 1)
    def _epilogue():
        out = acc_ref[...] * s_ref[...] + b_ref[...]
        if has_res:
            out = out + r_ref[...].astype(jnp.float32)
        if relu:
            out = jnp.maximum(out, 0.0)
        o_ref[...] = out.astype(o_ref.dtype)


def matmul_bn_act(a, w, scale, shift, residual=None, relu=False,
                  out_dtype=jnp.bfloat16):
    """(M,K) @ (K,N) * scale + shift [+ residual] [ReLU] -> (M,N)."""
    M, K = a.shape
    N = w.shape[1]
    tm = _pick_tile(M, (256, 128, 64, 32, 16, 8))
    tn = _pick_tile(N, (256, 128))          # lane-dense stores when N >= 128
    tk = _pick_tile(K, (512, 256, 128))

    args = [a.astype(jnp.bfloat16), w.astype(jnp.bfloat16),
            scale.reshape(1, N).astype(jnp.float32),
            shift.reshape(1, N).astype(jnp.float32)]
    in_specs = [
        pl.BlockSpec((tm, tk), lambda i, j, k: (i, k)),
        pl.BlockSpec((tk, tn), lambda i, j, k: (k, j)),
        pl.BlockSpec((1, tn), lambda i, j, k: (0, j)),
        pl.BlockSpec((1, tn), lambda i, j, k: (0, j)),
    ]
    has_res = residual is not None
    if has_res:
        args.append(residual.astype(jnp.bfloat16))
        in_specs.append(pl.BlockSpec((tm, tn), lambda i, j, k: (i, j)))

    kernel = functools.partial(_mm_bn_act_kernel, relu=relu, has_res=has_res)
    return pl.pallas_call(
        kernel,
        out_shape=jax.ShapeDtypeStruct((M, N), out_dtype),
        grid=(M // tm, N // tn, K // tk),
        in_specs=in_specs,
        out_specs=pl.BlockSpec((tm, tn), lambda i, j, k: (i, j)),
        scratch_shapes=[pltpu.VMEM((tm, tn), jnp.float32)],
        compiler_params=pltpu.CompilerParams(
            dimension_semantics=("parallel", "parallel", "arbitrary")),
    )(*args)


# ---------------------------------------------------------------------------
# Kernel 2: 3x3 conv (stride 1, pad 1) as implicit GEMM over the 9 taps + BN + ReLU
# ---------------------------------------------------------------------------
def _conv3x3_bn_relu_kernel(x_ref, w_ref, s_ref, b_ref, o_ref, *, H, W):
    C = x_ref.shape[-1]
    tn = o_ref.shape[-1]
    # Padded input slab for one image is VMEM-resident; build each tap patch in-kernel.
    x = x_ref[...].astype(jnp.float32)              # (H+2, W+2, C)
    acc = jnp.zeros((H * W, tn), jnp.float32)
    for dy in range(3):
        for dx in range(3):
            patch = x[dy:dy + H, dx:dx + W, :].reshape(H * W, C)
            acc = acc + jnp.dot(patch.astype(jnp.bfloat16),
                                w_ref[dy * 3 + dx],
                                preferred_element_type=jnp.float32)
    out = jnp.maximum(acc * s_ref[...] + b_ref[...], 0.0)
    o_ref[...] = out.astype(o_ref.dtype)


def conv3x3_bn_relu(x_nhwc, w_hwio, bn, out_dtype=jnp.bfloat16):
    N, H, W, C = x_nhwc.shape
    Cout = w_hwio.shape[-1]
    xp = jnp.pad(x_nhwc.astype(jnp.bfloat16), ((0, 0), (1, 1), (1, 1), (0, 0)))
    w_taps = w_hwio.reshape(9, C, Cout).astype(jnp.bfloat16)
    scale, shift = _fold_bn(bn)
    tn = _pick_tile(Cout, (256, 128))

    kernel = functools.partial(_conv3x3_bn_relu_kernel, H=H, W=W)
    out = pl.pallas_call(
        kernel,
        out_shape=jax.ShapeDtypeStruct((N, H * W, Cout), out_dtype),
        grid=(N, Cout // tn),
        in_specs=[
            pl.BlockSpec((None, H + 2, W + 2, C), lambda n, j: (n, 0, 0, 0)),
            pl.BlockSpec((9, C, tn), lambda n, j: (0, 0, j)),
            pl.BlockSpec((1, tn), lambda n, j: (0, j)),
            pl.BlockSpec((1, tn), lambda n, j: (0, j)),
        ],
        out_specs=pl.BlockSpec((None, H * W, tn), lambda n, j: (n, 0, j)),
        compiler_params=pltpu.CompilerParams(
            dimension_semantics=("parallel", "parallel")),
    )(xp, w_taps, scale.reshape(1, Cout), shift.reshape(1, Cout))
    return out.reshape(N, H, W, Cout)


# ---------------------------------------------------------------------------
# Bottleneck forward (Pallas) and pure-JAX reference
# ---------------------------------------------------------------------------
def bottleneck_forward(params, x_nchw, stride=1):
    x = jnp.transpose(x_nchw, (0, 2, 3, 1)).astype(jnp.bfloat16)   # NCHW -> NHWC
    N, H, W, Cin = x.shape
    planes = params["w1"].shape[1]

    xs = x[:, ::stride, ::stride, :] if stride != 1 else x
    Ho, Wo = xs.shape[1], xs.shape[2]
    a1 = xs.reshape(N * Ho * Wo, Cin)

    # conv1 (1x1, stride) + bn1 + relu  -- fused tiled matmul
    s1, b1 = _fold_bn(params["bn1"])
    out = matmul_bn_act(a1, params["w1"], s1, b1, relu=True,
                        out_dtype=jnp.bfloat16)
    out = out.reshape(N, Ho, Wo, planes)

    # conv2 (3x3, stride 1, pad 1) + bn2 + relu  -- implicit-GEMM kernel
    out = conv3x3_bn_relu(out, params["w2"], params["bn2"],
                          out_dtype=jnp.bfloat16)

    # residual path
    if "wd" in params:
        sd, bd = _fold_bn(params["bnd"])
        residual = matmul_bn_act(a1, params["wd"], sd, bd, relu=False,
                                 out_dtype=jnp.bfloat16)
    else:
        residual = xs.reshape(N * Ho * Wo, Cin)

    # conv3 (1x1) + bn3 + residual add + relu  -- fused into one tiled matmul kernel
    a3 = out.reshape(N * Ho * Wo, planes)
    s3, b3 = _fold_bn(params["bn3"])
    y = matmul_bn_act(a3, params["w3"], s3, b3, residual=residual, relu=True,
                      out_dtype=jnp.float32)
    y = y.reshape(N, Ho, Wo, planes * EXPANSION)
    return jnp.transpose(y, (0, 3, 1, 2))                           # NHWC -> NCHW


def bottleneck_reference(params, x_nchw, stride=1):
    """Pure-JAX reference mirroring the kernel's bf16/f32 mixed precision."""
    x = jnp.transpose(x_nchw, (0, 2, 3, 1)).astype(jnp.bfloat16)

    def conv(v, w_hwio, s):
        pad = "VALID" if w_hwio.shape[0] == 1 else [(1, 1), (1, 1)]
        return lax.conv_general_dilated(
            v.astype(jnp.bfloat16), w_hwio.astype(jnp.bfloat16),
            window_strides=(s, s), padding=pad,
            dimension_numbers=("NHWC", "HWIO", "NHWC"),
            preferred_element_type=jnp.float32)

    w1, w2, w3 = params["w1"], params["w2"], params["w3"]
    s1, b1 = _fold_bn(params["bn1"])
    s2, b2 = _fold_bn(params["bn2"])
    s3, b3 = _fold_bn(params["bn3"])

    out = jnp.maximum(conv(x, w1.reshape(1, 1, *w1.shape), stride) * s1 + b1,
                      0.0).astype(jnp.bfloat16)
    out = jnp.maximum(conv(out, w2, 1) * s2 + b2, 0.0).astype(jnp.bfloat16)
    out = conv(out, w3.reshape(1, 1, *w3.shape), 1) * s3 + b3

    if "wd" in params:
        wd = params["wd"]
        sd, bd = _fold_bn(params["bnd"])
        res = (conv(x, wd.reshape(1, 1, *wd.shape), stride) * sd + bd
               ).astype(jnp.bfloat16)
    else:
        res = x[:, ::stride, ::stride, :]

    out = jnp.maximum(out + res.astype(jnp.float32), 0.0)
    return jnp.transpose(out, (0, 3, 1, 2))


# ---------------------------------------------------------------------------
# Deterministic parameter initialization
# ---------------------------------------------------------------------------
def init_params(key, inplanes, planes, stride):
    ks = jax.random.split(key, 8)

    def conv_w(k, shape, fan_in):
        return jax.random.normal(k, shape, jnp.float32) * (2.0 / fan_in) ** 0.5

    def bn(k, c):
        k1, k2, k3, k4 = jax.random.split(k, 4)
        gamma = jax.random.uniform(k1, (c,), jnp.float32, 0.5, 1.5)
        beta = jax.random.normal(k2, (c,), jnp.float32) * 0.1
        mean = jax.random.normal(k3, (c,), jnp.float32) * 0.1
        var = jax.random.uniform(k4, (c,), jnp.float32, 0.5, 1.5)
        return (gamma, beta, mean, var)

    p = {
        "w1": conv_w(ks[0], (inplanes, planes), inplanes),             # 1x1
        "bn1": bn(ks[1], planes),
        "w2": conv_w(ks[2], (3, 3, planes, planes), 9 * planes),       # 3x3 HWIO
        "bn2": bn(ks[3], planes),
        "w3": conv_w(ks[4], (planes, planes * EXPANSION), planes),     # 1x1
        "bn3": bn(ks[5], planes * EXPANSION),
    }
    if stride != 1 or inplanes != planes * EXPANSION:
        p["wd"] = conv_w(ks[6], (inplanes, planes * EXPANSION), inplanes)
        p["bnd"] = bn(ks[7], planes * EXPANSION)
    return p


# ---------------------------------------------------------------------------
if __name__ == "__main__":
    key = jax.random.PRNGKey(0)
    k_par, k_x = jax.random.split(key)

    batch, inplanes, planes, spatial, stride = 2, 64, 32, 16, 1
    params = init_params(k_par, inplanes, planes, stride)
    x = jax.random.normal(k_x, (batch, inplanes, spatial, spatial), jnp.float32)

    fwd = jax.jit(functools.partial(bottleneck_forward, stride=stride))
    out = jax.block_until_ready(fwd(params, x))

    ho = wo = spatial // stride
    assert out.shape == (batch, planes * EXPANSION, ho, wo), out.shape
    assert bool(jnp.all(jnp.isfinite(out)))

    ref = jax.block_until_ready(bottleneck_reference(params, x, stride=stride))
    assert bool(jnp.allclose(out, ref, rtol=5e-2, atol=5e-2)), float(
        jnp.max(jnp.abs(out - ref)))

    print("KERNEL_OK")
</pallas_src>

<mosaic_0001>
module attributes {stable_mosaic.version = 11 : i64} {
  func.func @_mm_bn_act_kernel(%arg0: i32, %arg1: i32, %arg2: i32, %arg3: memref<256x64xbf16, #tpu.memory_space<vmem>>, %arg4: memref<64x32xbf16, #tpu.memory_space<vmem>>, %arg5: memref<1x32xf32, #tpu.memory_space<vmem>>, %arg6: memref<1x32xf32, #tpu.memory_space<vmem>>, %arg7: memref<256x32xbf16, #tpu.memory_space<vmem>>, %arg8: memref<256x32xf32, #tpu.memory_space<vmem>>) attributes {dimension_semantics = [#tpu.dimension_semantics<parallel>, #tpu.dimension_semantics<parallel>, #tpu.dimension_semantics<arbitrary>], iteration_bounds = array<i64: 2, 1, 1>, scalar_prefetch = 0 : i64, scratch_operands = 1 : i64, tpu.core_type = #tpu.core_type<tc>, window_params = [{transform_indices = @transform_0, window_bounds = array<i64: 256, 64>}, {transform_indices = @transform_1, window_bounds = array<i64: 64, 32>}, {transform_indices = @transform_2, window_bounds = array<i64: 1, 32>}, {transform_indices = @transform_3, window_bounds = array<i64: 1, 32>}, {transform_indices = @transform_4, window_bounds = array<i64: 256, 32>}]} {
    %c0_i32 = arith.constant 0 : i32
    %0 = arith.cmpi eq, %arg2, %c0_i32 : i32
    %1 = arith.extui %0 : i1 to i32
    %c0_i32_0 = arith.constant 0 : i32
    %2 = arith.cmpi ne, %1, %c0_i32_0 : i32
    scf.if %2 {
      %cst_10 = arith.constant 0.000000e+00 : f32
      %12 = vector.broadcast %cst_10 : f32 to vector<256x32xf32>
      %c0_11 = arith.constant 0 : index
      %c0_12 = arith.constant 0 : index
      %13 = vector.load %arg8[%c0_11, %c0_12] : memref<256x32xf32, #tpu.memory_space<vmem>>, vector<256x32xf32>
      tpu.vector_store %arg8[%c0_11, %c0_12], %12 {strides = array<i32>} : memref<256x32xf32, #tpu.memory_space<vmem>>, vector<256x32xf32>,
    } else {
    }
    %c0 = arith.constant 0 : index
    %c0_1 = arith.constant 0 : index
    %3 = vector.load %arg8[%c0, %c0_1] : memref<256x32xf32, #tpu.memory_space<vmem>>, vector<256x32xf32>
    %c0_2 = arith.constant 0 : index
    %c0_3 = arith.constant 0 : index
    %4 = vector.load %arg3[%c0_2, %c0_3] : memref<256x64xbf16, #tpu.memory_space<vmem>>, vector<256x64xbf16>
    %c0_4 = arith.constant 0 : index
    %c0_5 = arith.constant 0 : index
    %5 = vector.load %arg4[%c0_4, %c0_5] : memref<64x32xbf16, #tpu.memory_space<vmem>>, vector<64x32xbf16>
    %cst = arith.constant dense<0.000000e+00> : vector<256x32xf32>
    %6 = tpu.matmul %4, %5, %cst {dimension_numbers = #tpu.dot_dimension_numbers<[1], [0], [0], [1], [0, 0, 1, 1], [], []>} : vector<256x64xbf16>, vector<64x32xbf16>, vector<256x32xf32> -> vector<256x32xf32>
    %7 = arith.addf %3, %6 : vector<256x32xf32>
    %c0_6 = arith.constant 0 : index
    %c0_7 = arith.constant 0 : index
    %8 = vector.load %arg8[%c0_6, %c0_7] : memref<256x32xf32, #tpu.memory_space<vmem>>, vector<256x32xf32>
    tpu.vector_store %arg8[%c0_6, %c0_7], %7 {strides = array<i32>} : memref<256x32xf32, #tpu.memory_space<vmem>>, vector<256x32xf32>,
    %c0_i32_8 = arith.constant 0 : i32
    %9 = arith.cmpi eq, %arg2, %c0_i32_8 : i32
    %10 = arith.extui %9 : i1 to i32
    %c0_i32_9 = arith.constant 0 : i32
    %11 = arith.cmpi ne, %10, %c0_i32_9 : i32
    scf.if %11 {
      %c0_10 = arith.constant 0 : index
      %c0_11 = arith.constant 0 : index
      %12 = vector.load %arg8[%c0_10, %c0_11] : memref<256x32xf32, #tpu.memory_space<vmem>>, vector<256x32xf32>
      %c0_12 = arith.constant 0 : index
      %c0_13 = arith.constant 0 : index
      %13 = vector.load %arg5[%c0_12, %c0_13] : memref<1x32xf32, #tpu.memory_space<vmem>>, vector<1x32xf32>
      %14 = vector.broadcast %13 : vector<1x32xf32> to vector<256x32xf32>
      %15 = arith.mulf %12, %14 : vector<256x32xf32>
      %c0_14 = arith.constant 0 : index
      %c0_15 = arith.constant 0 : index
      %16 = vector.load %arg6[%c0_14, %c0_15] : memref<1x32xf32, #tpu.memory_space<vmem>>, vector<1x32xf32>
      %17 = vector.broadcast %16 : vector<1x32xf32> to vector<256x32xf32>
      %18 = arith.addf %15, %17 : vector<256x32xf32>
      %cst_16 = arith.constant 0.000000e+00 : f32
      %19 = vector.broadcast %cst_16 : f32 to vector<256x32xf32>
      %20 = arith.maximumf %18, %19 : vector<256x32xf32>
      %21 = arith.truncf %20 : vector<256x32xf32> to vector<256x32xbf16>
      %c0_17 = arith.constant 0 : index
      %c0_18 = arith.constant 0 : index
      %22 = vector.load %arg7[%c0_17, %c0_18] : memref<256x32xbf16, #tpu.memory_space<vmem>>, vector<256x32xbf16>
      tpu.vector_store %arg7[%c0_17, %c0_18], %21 {strides = array<i32>} : memref<256x32xbf16, #tpu.memory_space<vmem>>, vector<256x32xbf16>,
    } else {
    }
    return
  }
  func.func @transform_0(%arg0: i32, %arg1: i32, %arg2: i32) -> (i32, i32) {
    %c0_i32 = arith.constant 0 : i32
    return %arg0, %arg2 : i32, i32
  }
  func.func @transform_1(%arg0: i32, %arg1: i32, %arg2: i32) -> (i32, i32) {
    %c0_i32 = arith.constant 0 : i32
    return %arg2, %arg1 : i32, i32
  }
  func.func @transform_2(%arg0: i32, %arg1: i32, %arg2: i32) -> (i32, i32) {
    %c0_i32 = arith.constant 0 : i32
    %c0_i32_0 = arith.constant 0 : i32
    return %c0_i32, %arg1 : i32, i32
  }
  func.func @transform_3(%arg0: i32, %arg1: i32, %arg2: i32) -> (i32, i32) {
    %c0_i32 = arith.constant 0 : i32
    %c0_i32_0 = arith.constant 0 : i32
    return %c0_i32, %arg1 : i32, i32
  }
  func.func @transform_4(%arg0: i32, %arg1: i32, %arg2: i32) -> (i32, i32) {
    %c0_i32 = arith.constant 0 : i32
    return %arg0, %arg1 : i32, i32
  }
}

module attributes {stable_mosaic.version = 11 : i64} {
  func.func @_conv3x3_bn_relu_kernel(%arg0: i32, %arg1: i32, %arg2: memref<1x18x18x32xbf16, #tpu.memory_space<vmem>>, %arg3: memref<9x32x32xbf16, #tpu.memory_space<vmem>>, %arg4: memref<1x32xf32, #tpu.memory_space<vmem>>, %arg5: memref<1x32xf32, #tpu.memory_space<vmem>>, %arg6: memref<1x256x32xbf16, #tpu.memory_space<vmem>>) attributes {dimension_semantics = [#tpu.dimension_semantics<parallel>, #tpu.dimension_semantics<parallel>], iteration_bounds = array<i64: 2, 1>, scalar_prefetch = 0 : i64, scratch_operands = 0 : i64, tpu.core_type = #tpu.core_type<tc>, window_params = [{transform_indices = @transform_0, window_bounds = array<i64: 1, 18, 18, 32>}, {transform_indices = @transform_1, window_bounds = array<i64: 9, 32, 32>}, {transform_indices = @transform_2, window_bounds = array<i64: 1, 32>}, {transform_indices = @transform_3, window_bounds = array<i64: 1, 32>}, {transform_indices = @transform_4, window_bounds = array<i64: 1, 256, 32>}]} {
    %c0 = arith.constant 0 : index
    %c0_0 = arith.constant 0 : index
    %c0_1 = arith.constant 0 : index
    %c0_2 = arith.constant 0 : index
    %0 = vector.load %arg2[%c0, %c0_0, %c0_1, %c0_2] : memref<1x18x18x32xbf16, #tpu.memory_space<vmem>>, vector<1x18x18x32xbf16>
    %1 = vector.shape_cast %0 : vector<1x18x18x32xbf16> to vector<18x18x32xbf16>
    %2 = arith.extf %1 : vector<18x18x32xbf16> to vector<18x18x32xf32>
    %cst = arith.constant 0.000000e+00 : f32
    %3 = vector.broadcast %cst : f32 to vector<256x32xf32>
    %4 = vector.extract_strided_slice %2 {offsets = [0, 0, 0], sizes = [16, 16, 32], strides = [1, 1, 1]} : vector<18x18x32xf32> to vector<16x16x32xf32>
    %5 = vector.shape_cast %4 : vector<16x16x32xf32> to vector<256x32xf32>
    %6 = arith.truncf %5 : vector<256x32xf32> to vector<256x32xbf16>
    %c0_3 = arith.constant 0 : index
    %c0_4 = arith.constant 0 : index
    %c0_5 = arith.constant 0 : index
    %7 = vector.load %arg3[%c0_3, %c0_4, %c0_5] : memref<9x32x32xbf16, #tpu.memory_space<vmem>>, vector<1x32x32xbf16>
    %8 = vector.shape_cast %7 : vector<1x32x32xbf16> to vector<32x32xbf16>
    %cst_6 = arith.constant dense<0.000000e+00> : vector<256x32xf32>
    %9 = tpu.matmul %6, %8, %cst_6 {dimension_numbers = #tpu.dot_dimension_numbers<[1], [0], [0], [1], [0, 0, 1, 1], [], []>} : vector<256x32xbf16>, vector<32x32xbf16>, vector<256x32xf32> -> vector<256x32xf32>
    %10 = arith.addf %3, %9 : vector<256x32xf32>
    %11 = vector.extract_strided_slice %2 {offsets = [0, 1, 0], sizes = [16, 16, 32], strides = [1, 1, 1]} : vector<18x18x32xf32> to vector<16x16x32xf32>
    %12 = vector.shape_cast %11 : vector<16x16x32xf32> to vector<256x32xf32>
    %13 = arith.truncf %12 : vector<256x32xf32> to vector<256x32xbf16>
    %c1 = arith.constant 1 : index
    %c0_7 = arith.constant 0 : index
    %c0_8 = arith.constant 0 : index
    %14 = vector.load %arg3[%c1, %c0_7, %c0_8] : memref<9x32x32xbf16, #tpu.memory_space<vmem>>, vector<1x32x32xbf16>
    %15 = vector.shape_cast %14 : vector<1x32x32xbf16> to vector<32x32xbf16>
    %cst_9 = arith.constant dense<0.000000e+00> : vector<256x32xf32>
    %16 = tpu.matmul %13, %15, %cst_9 {dimension_numbers = #tpu.dot_dimension_numbers<[1], [0], [0], [1], [0, 0, 1, 1], [], []>} : vector<256x32xbf16>, vector<32x32xbf16>, vector<256x32xf32> -> vector<256x32xf32>
    %17 = arith.addf %10, %16 : vector<256x32xf32>
    %18 = vector.extract_strided_slice %2 {offsets = [0, 2, 0], sizes = [16, 16, 32], strides = [1, 1, 1]} : vector<18x18x32xf32> to vector<16x16x32xf32>
    %19 = vector.shape_cast %18 : vector<16x16x32xf32> to vector<256x32xf32>
    %20 = arith.truncf %19 : vector<256x32xf32> to vector<256x32xbf16>
    %c2 = arith.constant 2 : index
    %c0_10 = arith.constant 0 : index
    %c0_11 = arith.constant 0 : index
    %21 = vector.load %arg3[%c2, %c0_10, %c0_11] : memref<9x32x32xbf16, #tpu.memory_space<vmem>>, vector<1x32x32xbf16>
    %22 = vector.shape_cast %21 : vector<1x32x32xbf16> to vector<32x32xbf16>
    %cst_12 = arith.constant dense<0.000000e+00> : vector<256x32xf32>
    %23 = tpu.matmul %20, %22, %cst_12 {dimension_numbers = #tpu.dot_dimension_numbers<[1], [0], [0], [1], [0, 0, 1, 1], [], []>} : vector<256x32xbf16>, vector<32x32xbf16>, vector<256x32xf32> -> vector<256x32xf32>
    %24 = arith.addf %17, %23 : vector<256x32xf32>
    %25 = vector.extract_strided_slice %2 {offsets = [1, 0, 0], sizes = [16, 16, 32], strides = [1, 1, 1]} : vector<18x18x32xf32> to vector<16x16x32xf32>
    %26 = vector.shape_cast %25 : vector<16x16x32xf32> to vector<256x32xf32>
    %27 = arith.truncf %26 : vector<256x32xf32> to vector<256x32xbf16>
    %c3 = arith.constant 3 : index
    %c0_13 = arith.constant 0 : index
    %c0_14 = arith.constant 0 : index
    %28 = vector.load %arg3[%c3, %c0_13, %c0_14] : memref<9x32x32xbf16, #tpu.memory_space<vmem>>, vector<1x32x32xbf16>
    %29 = vector.shape_cast %28 : vector<1x32x32xbf16> to vector<32x32xbf16>
    %cst_15 = arith.constant dense<0.000000e+00> : vector<256x32xf32>
    %30 = tpu.matmul %27, %29, %cst_15 {dimension_numbers = #tpu.dot_dimension_numbers<[1], [0], [0], [1], [0, 0, 1, 1], [], []>} : vector<256x32xbf16>, vector<32x32xbf16>, vector<256x32xf32> -> vector<256x32xf32>
    %31 = arith.addf %24, %30 : vector<256x32xf32>
    %32 = vector.extract_strided_slice %2 {offsets = [1, 1, 0], sizes = [16, 16, 32], strides = [1, 1, 1]} : vector<18x18x32xf32> to vector<16x16x32xf32>
    %33 = vector.shape_cast %32 : vector<16x16x32xf32> to vector<256x32xf32>
    %34 = arith.truncf %33 : vector<256x32xf32> to vector<256x32xbf16>
    %c4 = arith.constant 4 : index
    %c0_16 = arith.constant 0 : index
    %c0_17 = arith.constant 0 : index
    %35 = vector.load %arg3[%c4, %c0_16, %c0_17] : memref<9x32x32xbf16, #tpu.memory_space<vmem>>, vector<1x32x32xbf16>
    %36 = vector.shape_cast %35 : vector<1x32x32xbf16> to vector<32x32xbf16>
    %cst_18 = arith.constant dense<0.000000e+00> : vector<256x32xf32>
    %37 = tpu.matmul %34, %36, %cst_18 {dimension_numbers = #tpu.dot_dimension_numbers<[1], [0], [0], [1], [0, 0, 1, 1], [], []>} : vector<256x32xbf16>, vector<32x32xbf16>, vector<256x32xf32> -> vector<256x32xf32>
    %38 = arith.addf %31, %37 : vector<256x32xf32>
    %39 = vector.extract_strided_slice %2 {offsets = [1, 2, 0], sizes = [16, 16, 32], strides = [1, 1, 1]} : vector<18x18x32xf32> to vector<16x16x32xf32>
    %40 = vector.shape_cast %39 : vector<16x16x32xf32> to vector<256x32xf32>
    %41 = arith.truncf %40 : vector<256x32xf32> to vector<256x32xbf16>
    %c5 = arith.constant 5 : index
    %c0_19 = arith.constant 0 : index
    %c0_20 = arith.constant 0 : index
    %42 = vector.load %arg3[%c5, %c0_19, %c0_20] : memref<9x32x32xbf16, #tpu.memory_space<vmem>>, vector<1x32x32xbf16>
    %43 = vector.shape_cast %42 : vector<1x32x32xbf16> to vector<32x32xbf16>
    %cst_21 = arith.constant dense<0.000000e+00> : vector<256x32xf32>
    %44 = tpu.matmul %41, %43, %cst_21 {dimension_numbers = #tpu.dot_dimension_numbers<[1], [0], [0], [1], [0, 0, 1, 1], [], []>} : vector<256x32xbf16>, vector<32x32xbf16>, vector<256x32xf32> -> vector<256x32xf32>
    %45 = arith.addf %38, %44 : vector<256x32xf32>
    %46 = vector.extract_strided_slice %2 {offsets = [2, 0, 0], sizes = [16, 16, 32], strides = [1, 1, 1]} : vector<18x18x32xf32> to vector<16x16x32xf32>
    %47 = vector.shape_cast %46 : vector<16x16x32xf32> to vector<256x32xf32>
    %48 = arith.truncf %47 : vector<256x32xf32> to vector<256x32xbf16>
    %c6 = arith.constant 6 : index
    %c0_22 = arith.constant 0 : index
    %c0_23 = arith.constant 0 : index
    %49 = vector.load %arg3[%c6, %c0_22, %c0_23] : memref<9x32x32xbf16, #tpu.memory_space<vmem>>, vector<1x32x32xbf16>
    %50 = vector.shape_cast %49 : vector<1x32x32xbf16> to vector<32x32xbf16>
    %cst_24 = arith.constant dense<0.000000e+00> : vector<256x32xf32>
    %51 = tpu.matmul %48, %50, %cst_24 {dimension_numbers = #tpu.dot_dimension_numbers<[1], [0], [0], [1], [0, 0, 1, 1], [], []>} : vector<256x32xbf16>, vector<32x32xbf16>, vector<256x32xf32> -> vector<256x32xf32>
    %52 = arith.addf %45, %51 : vector<256x32xf32>
    %53 = vector.extract_strided_slice %2 {offsets = [2, 1, 0], sizes = [16, 16, 32], strides = [1, 1, 1]} : vector<18x18x32xf32> to vector<16x16x32xf32>
    %54 = vector.shape_cast %53 : vector<16x16x32xf32> to vector<256x32xf32>
    %55 = arith.truncf %54 : vector<256x32xf32> to vector<256x32xbf16>
    %c7 = arith.constant 7 : index
    %c0_25 = arith.constant 0 : index
    %c0_26 = arith.constant 0 : index
    %56 = vector.load %arg3[%c7, %c0_25, %c0_26] : memref<9x32x32xbf16, #tpu.memory_space<vmem>>, vector<1x32x32xbf16>
    %57 = vector.shape_cast %56 : vector<1x32x32xbf16> to vector<32x32xbf16>
    %cst_27 = arith.constant dense<0.000000e+00> : vector<256x32xf32>
    %58 = tpu.matmul %55, %57, %cst_27 {dimension_numbers = #tpu.dot_dimension_numbers<[1], [0], [0], [1], [0, 0, 1, 1], [], []>} : vector<256x32xbf16>, vector<32x32xbf16>, vector<256x32xf32> -> vector<256x32xf32>
    %59 = arith.addf %52, %58 : vector<256x32xf32>
    %60 = vector.extract_strided_slice %2 {offsets = [2, 2, 0], sizes = [16, 16, 32], strides = [1, 1, 1]} : vector<18x18x32xf32> to vector<16x16x32xf32>
    %61 = vector.shape_cast %60 : vector<16x16x32xf32> to vector<256x32xf32>
    %62 = arith.truncf %61 : vector<256x32xf32> to vector<256x32xbf16>
    %c8 = arith.constant 8 : index
    %c0_28 = arith.constant 0 : index
    %c0_29 = arith.constant 0 : index
    %63 = vector.load %arg3[%c8, %c0_28, %c0_29] : memref<9x32x32xbf16, #tpu.memory_space<vmem>>, vector<1x32x32xbf16>
    %64 = vector.shape_cast %63 : vector<1x32x32xbf16> to vector<32x32xbf16>
    %cst_30 = arith.constant dense<0.000000e+00> : vector<256x32xf32>
    %65 = tpu.matmul %62, %64, %cst_30 {dimension_numbers = #tpu.dot_dimension_numbers<[1], [0], [0], [1], [0, 0, 1, 1], [], []>} : vector<256x32xbf16>, vector<32x32xbf16>, vector<256x32xf32> -> vector<256x32xf32>
    %66 = arith.addf %59, %65 : vector<256x32xf32>
    %c0_31 = arith.constant 0 : index
    %c0_32 = arith.constant 0 : index
    %67 = vector.load %arg4[%c0_31, %c0_32] : memref<1x32xf32, #tpu.memory_space<vmem>>, vector<1x32xf32>
    %68 = vector.broadcast %67 : vector<1x32xf32> to vector<256x32xf32>
    %69 = arith.mulf %66, %68 : vector<256x32xf32>
    %c0_33 = arith.constant 0 : index
    %c0_34 = arith.constant 0 : index
    %70 = vector.load %arg5[%c0_33, %c0_34] : memref<1x32xf32, #tpu.memory_space<vmem>>, vector<1x32xf32>
    %71 = vector.broadcast %70 : vector<1x32xf32> to vector<256x32xf32>
    %72 = arith.addf %69, %71 : vector<256x32xf32>
    %cst_35 = arith.constant 0.000000e+00 : f32
    %73 = vector.broadcast %cst_35 : f32 to vector<256x32xf32>
    %74 = arith.maximumf %72, %73 : vector<256x32xf32>
    %75 = arith.truncf %74 : vector<256x32xf32> to vector<256x32xbf16>
    %c0_36 = arith.constant 0 : index
    %c0_37 = arith.constant 0 : index
    %c0_38 = arith.constant 0 : index
    %76 = vector.load %arg6[%c0_36, %c0_37, %c0_38] : memref<1x256x32xbf16, #tpu.memory_space<vmem>>, vector<1x256x32xbf16>
    %77 = vector.shape_cast %76 : vector<1x256x32xbf16> to vector<256x32xbf16>
    %78 = vector.shape_cast %75 : vector<256x32xbf16> to vector<1x256x32xbf16>
    tpu.vector_store %arg6[%c0_36, %c0_37, %c0_38], %78 {strides = array<i32>} : memref<1x256x32xbf16, #tpu.memory_space<vmem>>, vector<1x256x32xbf16>,
    return
  }
  func.func @transform_0(%arg0: i32, %arg1: i32) -> (i32, i32, i32, i32) {
    %c0_i32 = arith.constant 0 : i32
    %c0_i32_0 = arith.constant 0 : i32
    %c0_i32_1 = arith.constant 0 : i32
    %c0_i32_2 = arith.constant 0 : i32
    return %arg0, %c0_i32, %c0_i32_0, %c0_i32_1 : i32, i32, i32, i32
  }
  func.func @transform_1(%arg0: i32, %arg1: i32) -> (i32, i32, i32) {
    %c0_i32 = arith.constant 0 : i32
    %c0_i32_0 = arith.constant 0 : i32
    %c0_i32_1 = arith.constant 0 : i32
    return %c0_i32, %c0_i32_0, %arg1 : i32, i32, i32
  }
  func.func @transform_2(%arg0: i32, %arg1: i32) -> (i32, i32) {
    %c0_i32 = arith.constant 0 : i32
    %c0_i32_0 = arith.constant 0 : i32
    return %c0_i32, %arg1 : i32, i32
  }
  func.func @transform_3(%arg0: i32, %arg1: i32) -> (i32, i32) {
    %c0_i32 = arith.constant 0 : i32
    %c0_i32_0 = arith.constant 0 : i32
    return %c0_i32, %arg1 : i32, i32
  }
  func.func @transform_4(%arg0: i32, %arg1: i32) -> (i32, i32, i32) {
    %c0_i32 = arith.constant 0 : i32
    %c0_i32_0 = arith.constant 0 : i32
    return %arg0, %c0_i32, %arg1 : i32, i32, i32
  }
}

module attributes {stable_mosaic.version = 11 : i64} {
  func.func @_mm_bn_act_kernel(%arg0: i32, %arg1: i32, %arg2: i32, %arg3: memref<256x64xbf16, #tpu.memory_space<vmem>>, %arg4: memref<64x128xbf16, #tpu.memory_space<vmem>>, %arg5: memref<1x128xf32, #tpu.memory_space<vmem>>, %arg6: memref<1x128xf32, #tpu.memory_space<vmem>>, %arg7: memref<256x128xbf16, #tpu.memory_space<vmem>>, %arg8: memref<256x128xf32, #tpu.memory_space<vmem>>) attributes {dimension_semantics = [#tpu.dimension_semantics<parallel>, #tpu.dimension_semantics<parallel>, #tpu.dimension_semantics<arbitrary>], iteration_bounds = array<i64: 2, 1, 1>, scalar_prefetch = 0 : i64, scratch_operands = 1 : i64, tpu.core_type = #tpu.core_type<tc>, window_params = [{transform_indices = @transform_0, window_bounds = array<i64: 256, 64>}, {transform_indices = @transform_1, window_bounds = array<i64: 64, 128>}, {transform_indices = @transform_2, window_bounds = array<i64: 1, 128>}, {transform_indices = @transform_3, window_bounds = array<i64: 1, 128>}, {transform_indices = @transform_4, window_bounds = array<i64: 256, 128>}]} {
    %c0_i32 = arith.constant 0 : i32
    %0 = arith.cmpi eq, %arg2, %c0_i32 : i32
    %1 = arith.extui %0 : i1 to i32
    %c0_i32_0 = arith.constant 0 : i32
    %2 = arith.cmpi ne, %1, %c0_i32_0 : i32
    scf.if %2 {
      %cst_10 = arith.constant 0.000000e+00 : f32
      %12 = vector.broadcast %cst_10 : f32 to vector<256x128xf32>
      %c0_11 = arith.constant 0 : index
      %c0_12 = arith.constant 0 : index
      %13 = vector.load %arg8[%c0_11, %c0_12] : memref<256x128xf32, #tpu.memory_space<vmem>>, vector<256x128xf32>
      tpu.vector_store %arg8[%c0_11, %c0_12], %12 {strides = array<i32>} : memref<256x128xf32, #tpu.memory_space<vmem>>, vector<256x128xf32>,
    } else {
    }
    %c0 = arith.constant 0 : index
    %c0_1 = arith.constant 0 : index
    %3 = vector.load %arg8[%c0, %c0_1] : memref<256x128xf32, #tpu.memory_space<vmem>>, vector<256x128xf32>
    %c0_2 = arith.constant 0 : index
    %c0_3 = arith.constant 0 : index
    %4 = vector.load %arg3[%c0_2, %c0_3] : memref<256x64xbf16, #tpu.memory_space<vmem>>, vector<256x64xbf16>
    %c0_4 = arith.constant 0 : index
    %c0_5 = arith.constant 0 : index
    %5 = vector.load %arg4[%c0_4, %c0_5] : memref<64x128xbf16, #tpu.memory_space<vmem>>, vector<64x128xbf16>
    %cst = arith.constant dense<0.000000e+00> : vector<256x128xf32>
    %6 = tpu.matmul %4, %5, %cst {dimension_numbers = #tpu.dot_dimension_numbers<[1], [0], [0], [1], [0, 0, 1, 1], [], []>} : vector<256x64xbf16>, vector<64x128xbf16>, vector<256x128xf32> -> vector<256x128xf32>
    %7 = arith.addf %3, %6 : vector<256x128xf32>
    %c0_6 = arith.constant 0 : index
    %c0_7 = arith.constant 0 : index
    %8 = vector.load %arg8[%c0_6, %c0_7] : memref<256x128xf32, #tpu.memory_space<vmem>>, vector<256x128xf32>
    tpu.vector_store %arg8[%c0_6, %c0_7], %7 {strides = array<i32>} : memref<256x128xf32, #tpu.memory_space<vmem>>, vector<256x128xf32>,
    %c0_i32_8 = arith.constant 0 : i32
    %9 = arith.cmpi eq, %arg2, %c0_i32_8 : i32
    %10 = arith.extui %9 : i1 to i32
    %c0_i32_9 = arith.constant 0 : i32
    %11 = arith.cmpi ne, %10, %c0_i32_9 : i32
    scf.if %11 {
      %c0_10 = arith.constant 0 : index
      %c0_11 = arith.constant 0 : index
      %12 = vector.load %arg8[%c0_10, %c0_11] : memref<256x128xf32, #tpu.memory_space<vmem>>, vector<256x128xf32>
      %c0_12 = arith.constant 0 : index
      %c0_13 = arith.constant 0 : index
      %13 = vector.load %arg5[%c0_12, %c0_13] : memref<1x128xf32, #tpu.memory_space<vmem>>, vector<1x128xf32>
      %14 = vector.broadcast %13 : vector<1x128xf32> to vector<256x128xf32>
      %15 = arith.mulf %12, %14 : vector<256x128xf32>
      %c0_14 = arith.constant 0 : index
      %c0_15 = arith.constant 0 : index
      %16 = vector.load %arg6[%c0_14, %c0_15] : memref<1x128xf32, #tpu.memory_space<vmem>>, vector<1x128xf32>
      %17 = vector.broadcast %16 : vector<1x128xf32> to vector<256x128xf32>
      %18 = arith.addf %15, %17 : vector<256x128xf32>
      %19 = arith.truncf %18 : vector<256x128xf32> to vector<256x128xbf16>
      %c0_16 = arith.constant 0 : index
      %c0_17 = arith.constant 0 : index
      %20 = vector.load %arg7[%c0_16, %c0_17] : memref<256x128xbf16, #tpu.memory_space<vmem>>, vector<256x128xbf16>
      tpu.vector_store %arg7[%c0_16, %c0_17], %19 {strides = array<i32>} : memref<256x128xbf16, #tpu.memory_space<vmem>>, vector<256x128xbf16>,
    } else {
    }
    return
  }
  func.func @transform_0(%arg0: i32, %arg1: i32, %arg2: i32) -> (i32, i32) {
    %c0_i32 = arith.constant 0 : i32
    return %arg0, %arg2 : i32, i32
  }
  func.func @transform_1(%arg0: i32, %arg1: i32, %arg2: i32) -> (i32, i32) {
    %c0_i32 = arith.constant 0 : i32
    return %arg2, %arg1 : i32, i32
  }
  func.func @transform_2(%arg0: i32, %arg1: i32, %arg2: i32) -> (i32, i32) {
    %c0_i32 = arith.constant 0 : i32
    %c0_i32_0 = arith.constant 0 : i32
    return %c0_i32, %arg1 : i32, i32
  }
  func.func @transform_3(%arg0: i32, %arg1: i32, %arg2: i32) -> (i32, i32) {
    %c0_i32 = arith.constant 0 : i32
    %c0_i32_0 = arith.constant 0 : i32
    return %c0_i32, %arg1 : i32, i32
  }
  func.func @transform_4(%arg0: i32, %arg1: i32, %arg2: i32) -> (i32, i32) {
    %c0_i32 = arith.constant 0 : i32
    return %arg0, %arg1 : i32, i32
  }
}

module attributes {stable_mosaic.version = 11 : i64} {
  func.func @_mm_bn_act_kernel(%arg0: i32, %arg1: i32, %arg2: i32, %arg3: memref<256x32xbf16, #tpu.memory_space<vmem>>, %arg4: memref<32x128xbf16, #tpu.memory_space<vmem>>, %arg5: memref<1x128xf32, #tpu.memory_space<vmem>>, %arg6: memref<1x128xf32, #tpu.memory_space<vmem>>, %arg7: memref<256x128xbf16, #tpu.memory_space<vmem>>, %arg8: memref<256x128xf32, #tpu.memory_space<vmem>>, %arg9: memref<256x128xf32, #tpu.memory_space<vmem>>) attributes {dimension_semantics = [#tpu.dimension_semantics<parallel>, #tpu.dimension_semantics<parallel>, #tpu.dimension_semantics<arbitrary>], iteration_bounds = array<i64: 2, 1, 1>, scalar_prefetch = 0 : i64, scratch_operands = 1 : i64, tpu.core_type = #tpu.core_type<tc>, window_params = [{transform_indices = @transform_0, window_bounds = array<i64: 256, 32>}, {transform_indices = @transform_1, window_bounds = array<i64: 32, 128>}, {transform_indices = @transform_2, window_bounds = array<i64: 1, 128>}, {transform_indices = @transform_3, window_bounds = array<i64: 1, 128>}, {transform_indices = @transform_4, window_bounds = array<i64: 256, 128>}, {transform_indices = @transform_5, window_bounds = array<i64: 256, 128>}]} {
    %c0_i32 = arith.constant 0 : i32
    %0 = arith.cmpi eq, %arg2, %c0_i32 : i32
    %1 = arith.extui %0 : i1 to i32
    %c0_i32_0 = arith.constant 0 : i32
    %2 = arith.cmpi ne, %1, %c0_i32_0 : i32
    scf.if %2 {
      %cst_10 = arith.constant 0.000000e+00 : f32
      %12 = vector.broadcast %cst_10 : f32 to vector<256x128xf32>
      %c0_11 = arith.constant 0 : index
      %c0_12 = arith.constant 0 : index
      %13 = vector.load %arg9[%c0_11, %c0_12] : memref<256x128xf32, #tpu.memory_space<vmem>>, vector<256x128xf32>
      tpu.vector_store %arg9[%c0_11, %c0_12], %12 {strides = array<i32>} : memref<256x128xf32, #tpu.memory_space<vmem>>, vector<256x128xf32>,
    } else {
    }
    %c0 = arith.constant 0 : index
    %c0_1 = arith.constant 0 : index
    %3 = vector.load %arg9[%c0, %c0_1] : memref<256x128xf32, #tpu.memory_space<vmem>>, vector<256x128xf32>
    %c0_2 = arith.constant 0 : index
    %c0_3 = arith.constant 0 : index
    %4 = vector.load %arg3[%c0_2, %c0_3] : memref<256x32xbf16, #tpu.memory_space<vmem>>, vector<256x32xbf16>
    %c0_4 = arith.constant 0 : index
    %c0_5 = arith.constant 0 : index
    %5 = vector.load %arg4[%c0_4, %c0_5] : memref<32x128xbf16, #tpu.memory_space<vmem>>, vector<32x128xbf16>
    %cst = arith.constant dense<0.000000e+00> : vector<256x128xf32>
    %6 = tpu.matmul %4, %5, %cst {dimension_numbers = #tpu.dot_dimension_numbers<[1], [0], [0], [1], [0, 0, 1, 1], [], []>} : vector<256x32xbf16>, vector<32x128xbf16>, vector<256x128xf32> -> vector<256x128xf32>
    %7 = arith.addf %3, %6 : vector<256x128xf32>
    %c0_6 = arith.constant 0 : index
    %c0_7 = arith.constant 0 : index
    %8 = vector.load %arg9[%c0_6, %c0_7] : memref<256x128xf32, #tpu.memory_space<vmem>>, vector<256x128xf32>
    tpu.vector_store %arg9[%c0_6, %c0_7], %7 {strides = array<i32>} : memref<256x128xf32, #tpu.memory_space<vmem>>, vector<256x128xf32>,
    %c0_i32_8 = arith.constant 0 : i32
    %9 = arith.cmpi eq, %arg2, %c0_i32_8 : i32
    %10 = arith.extui %9 : i1 to i32
    %c0_i32_9 = arith.constant 0 : i32
    %11 = arith.cmpi ne, %10, %c0_i32_9 : i32
    scf.if %11 {
      %c0_10 = arith.constant 0 : index
      %c0_11 = arith.constant 0 : index
      %12 = vector.load %arg9[%c0_10, %c0_11] : memref<256x128xf32, #tpu.memory_space<vmem>>, vector<256x128xf32>
      %c0_12 = arith.constant 0 : index
      %c0_13 = arith.constant 0 : index
      %13 = vector.load %arg5[%c0_12, %c0_13] : memref<1x128xf32, #tpu.memory_space<vmem>>, vector<1x128xf32>
      %14 = vector.broadcast %13 : vector<1x128xf32> to vector<256x128xf32>
      %15 = arith.mulf %12, %14 : vector<256x128xf32>
      %c0_14 = arith.constant 0 : index
      %c0_15 = arith.constant 0 : index
      %16 = vector.load %arg6[%c0_14, %c0_15] : memref<1x128xf32, #tpu.memory_space<vmem>>, vector<1x128xf32>
      %17 = vector.broadcast %16 : vector<1x128xf32> to vector<256x128xf32>
      %18 = arith.addf %15, %17 : vector<256x128xf32>
      %c0_16 = arith.constant 0 : index
      %c0_17 = arith.constant 0 : index
      %19 = vector.load %arg7[%c0_16, %c0_17] : memref<256x128xbf16, #tpu.memory_space<vmem>>, vector<256x128xbf16>
      %20 = arith.extf %19 : vector<256x128xbf16> to vector<256x128xf32>
      %21 = arith.addf %18, %20 : vector<256x128xf32>
      %cst_18 = arith.constant 0.000000e+00 : f32
      %22 = vector.broadcast %cst_18 : f32 to vector<256x128xf32>
      %23 = arith.maximumf %21, %22 : vector<256x128xf32>
      %c0_19 = arith.constant 0 : index
      %c0_20 = arith.constant 0 : index
      %24 = vector.load %arg8[%c0_19, %c0_20] : memref<256x128xf32, #tpu.memory_space<vmem>>, vector<256x128xf32>
      tpu.vector_store %arg8[%c0_19, %c0_20], %23 {strides = array<i32>} : memref<256x128xf32, #tpu.memory_space<vmem>>, vector<256x128xf32>,
    } else {
    }
    return
  }
  func.func @transform_0(%arg0: i32, %arg1: i32, %arg2: i32) -> (i32, i32) {
    %c0_i32 = arith.constant 0 : i32
    return %arg0, %arg2 : i32, i32
  }
  func.func @transform_1(%arg0: i32, %arg1: i32, %arg2: i32) -> (i32, i32) {
    %c0_i32 = arith.constant 0 : i32
    return %arg2, %arg1 : i32, i32
  }
  func.func @transform_2(%arg0: i32, %arg1: i32, %arg2: i32) -> (i32, i32) {
    %c0_i32 = arith.constant 0 : i32
    %c0_i32_0 = arith.constant 0 : i32
    return %c0_i32, %arg1 : i32, i32
  }
  func.func @transform_3(%arg0: i32, %arg1: i32, %arg2: i32) -> (i32, i32) {
    %c0_i32 = arith.constant 0 : i32
    %c0_i32_0 = arith.constant 0 : i32
    return %c0_i32, %arg1 : i32, i32
  }
  func.func @transform_4(%arg0: i32, %arg1: i32, %arg2: i32) -> (i32, i32) {
    %c0_i32 = arith.constant 0 : i32
    return %arg0, %arg1 : i32, i32
  }
  func.func @transform_5(%arg0: i32, %arg1: i32, %arg2: i32) -> (i32, i32) {
    %c0_i32 = arith.constant 0 : i32
    return %arg0, %arg1 : i32, i32
  }
}

</mosaic_0001>

<bundles_post_ra>
// kernel: bottleneck_forward.4
= control target key start
LH: loop header
LB: loop body
LE: loop exit
PB: predicated region body
PF: predicated region fallthrough
CT: control target
= control target key end

     0   :  { %s1497_s15 = smov 0   ;;  %s1499_s16 = smov 0   ;;  %s1811_s0 = inlined_call_operand.vmem [shape: bf16[512,64], index: 0, kind: input, shape index: {}]   ;;  %s1812_s1 = inlined_call_operand.vmem [shape: bf16[64,32], index: 1, kind: input, shape index: {}]   ;;  %s1813_s2 = inlined_call_operand.vmem [shape: f32[1,32], index: 2, kind: input, shape index: {}]   ;;  %s1814_s3 = inlined_call_operand.vmem [shape: f32[1,32], index: 3, kind: input, shape index: {}]   ;;  %s1815_s4 = inlined_call_operand.vmem [shape: bf16[512,32], index: 4, kind: output, shape index: {}]  }
   0x1   :  { %s1501_s17 = smov 0  }
   0x2 LB: > { %s33_s18 = sadd.s32 1, %s1465_s16  ;;  %p1225_p0 = scmp.ge.s32.totalorder %s1469_s17, 1  ;;  %s1469_s17 = sphi %s1501_s17, %s14_s17   ;;  %s1465_s16 = sphi %s1499_s16, %s1817_s16   ;;  %s1461_s15 = sphi %s1497_s15, %s1816_s15  }
   0x3   : > { %p35_p1 = scmp.ge.s32.totalorder %s33_s18, 2  ;;  %p221_p2 = scmp.lt.s32.totalorder %s1469_s17, 3 }
   0x5   : > { %s1819_s18 = smov (%p35_p1, %s33_s18), 0  ;;  %p222_p3 = pnand %p1225_p0, %p221_p2 }
   0x6   : > { %v1427_v0 = vld [vmem:[%s1812_s1] sm:$0xff] (!%p222_p3)   ;;  %s1226_s21 = sshll.u32 (!%p222_p3), %s1461_s15, 5  ;;  %v1428_v1 = vld [vmem:[%s1812_s1 + $0x8] sm:$0xff] (!%p222_p3)   ;;  %v1429_v2 = vld [vmem:[%s1812_s1 + $0x10] sm:$0xff] (!%p222_p3)   ;;  %vm305_vm0 = vcmask (!%p222_p3), 261120   ;;  %v1471_v3 = vmov (!%p222_p3), 0.0  }
   0x7   : > { %225 = sbr.rel (%p222_p3) target bundleno = 296 (0x128), region = 36  ;;  %p268_p4 = scmp.lt.s32.totalorder (!%p222_p3), %s1226_s21, 63  ;;  %1354 = vmatprep.subr.bf16.mxu0 (!%p222_p3), %v1427_v0  ;;  %1394 = vmatprep.subr.bf16.mxu1 (!%p222_p3), %v1427_v0  ;;  %308 = vst.msk [vmem:[#allocation2 + $0x10] sm:$0xff] (!%p222_p3), %vm305_vm0, %v1471_v3  ;;  %306 = vst.msk [vmem:[#allocation2] sm:$0xff] (!%p222_p3), %vm305_vm0, %v1471_v3  ;;  %v1430_v4 = vld [vmem:[%s1812_s1 + $0x18] sm:$0xff] (!%p222_p3)   ;;  %vm514_vm1 = vcmask (!%p222_p3), 523264  }
   0x8   : > { %1355 = vmatpush3.bf16.msra.mxu0 (!%p222_p3), %v1427_v0  ;;  %1398 = vmatpush3.bf16.msra.mxu1 (!%p222_p3), %v1427_v0  ;;  %307 = vst.msk [vmem:[#allocation2 + $0x8] sm:$0xff] (!%p222_p3), %vm305_vm0, %v1471_v3  ;;  %309 = vst.msk [vmem:[#allocation2 + $0x18] sm:$0xff] (!%p222_p3), %vm305_vm0, %v1471_v3  ;;  %v1612_v49 = vld [vmem:[%s1813_s2] ss:$0 sm:$0xff] (!%p222_p3)  ;;  %vm1062_vm2 = vcmask (!%p222_p3), 257024  }
   0x9   : > { %1356 = vmatprep.subr.bf16.mxu0 (!%p222_p3), %v1428_v1  ;;  %1395 = vmatprep.subr.bf16.mxu1 (!%p222_p3), %v1428_v1  ;;  %310 = vst.msk [vmem:[#allocation2 + $0x20] sm:$0xff] (!%p222_p3), %vm305_vm0, %v1471_v3  ;;  %311 = vst.msk [vmem:[#allocation2 + $0x28] sm:$0xff] (!%p222_p3), %vm305_vm0, %v1471_v3  ;;  %v1617_v54 = vld [vmem:[%s1814_s3] ss:$0 sm:$0xff] (!%p222_p3) }
   0xa   : > { %312 = vst.msk [vmem:[#allocation2 + $0x30] sm:$0xff] (!%p222_p3), %vm305_vm0, %v1471_v3  ;;  %313 = vst.msk [vmem:[#allocation2 + $0x38] sm:$0xff] (!%p222_p3), %vm305_vm0, %v1471_v3 }
   0xb   : > { %314 = vst.msk [vmem:[#allocation2 + $0x40] sm:$0xff] (!%p222_p3), %vm305_vm0, %v1471_v3  ;;  %315 = vst.msk [vmem:[#allocation2 + $0x48] sm:$0xff] (!%p222_p3), %vm305_vm0, %v1471_v3 }
   0xc   : > { %316 = vst.msk [vmem:[#allocation2 + $0x50] sm:$0xff] (!%p222_p3), %vm305_vm0, %v1471_v3  ;;  %317 = vst.msk [vmem:[#allocation2 + $0x58] sm:$0xff] (!%p222_p3), %vm305_vm0, %v1471_v3  ;;  %1357 = vmatpush3.bf16.msra.mxu0 (!%p222_p3), %v1428_v1  ;;  %1399 = vmatpush3.bf16.msra.mxu1 (!%p222_p3), %v1428_v1 }
   0xd   : > { %318 = vst.msk [vmem:[#allocation2 + $0x60] sm:$0xff] (!%p222_p3), %vm305_vm0, %v1471_v3  ;;  %319 = vst.msk [vmem:[#allocation2 + $0x68] sm:$0xff] (!%p222_p3), %vm305_vm0, %v1471_v3  ;;  %1358 = vmatprep.subr.bf16.mxu0 (!%p222_p3), %v1429_v2  ;;  %1396 = vmatprep.subr.bf16.mxu1 (!%p222_p3), %v1429_v2 }
   0xe   : > { %s1821_s21 = smov (!%p268_p4, %s1226_s21), 63  ;;  %320 = vst.msk [vmem:[#allocation2 + $0x70] sm:$0xff] %vm305_vm0, %v1471_v3  ;;  %321 = vst.msk [vmem:[#allocation2 + $0x78] sm:$0xff] %vm305_vm0, %v1471_v3  ;;  %v340_v21 = vld [vmem:[#allocation2 + $0x10] sm:$0xff]  ;;  %v338_v23 = vld [vmem:[#allocation2] sm:$0xff] }
   0xf   : > { %s1227_s26 = sshll.u32 %s1821_s21, 2  ;;  %322 = vst.msk [vmem:[#allocation2 + $0x80] sm:$0xff] %vm305_vm0, %v1471_v3  ;;  %323 = vst.msk [vmem:[#allocation2 + $0x88] sm:$0xff] %vm305_vm0, %v1471_v3  ;;  %v341_v27 = vld [vmem:[#allocation2 + $0x18] sm:$0xff]  ;;  %v339_v33 = vld [vmem:[#allocation2 + $0x8] sm:$0xff] }
  0x10   : > { %324 = vst.msk [vmem:[#allocation2 + $0x90] sm:$0xff] %vm305_vm0, %v1471_v3  ;;  %325 = vst.msk [vmem:[#allocation2 + $0x98] sm:$0xff] %vm305_vm0, %v1471_v3  ;;  %s1567_s5 = scalar_lea.vmem %s1811_s0, %s1227_s26  ;;  %1359 = vmatpush3.bf16.msra.mxu0 %v1429_v2  ;;  %1400 = vmatpush3.bf16.msra.mxu1 %v1429_v2  ;;  %v342_v47 = vld [vmem:[#allocation2 + $0x20] sm:$0xff]  ;;  %v343_v59 = vld [vmem:[#allocation2 + $0x28] sm:$0xff]  ;;  %s1646_s12 = scalar_lea.vmem %s1815_s4, %s1227_s26 }
  0x11   : > { %326 = vst.msk [vmem:[#allocation2 + $0xa0] sm:$0xff] %vm305_vm0, %v1471_v3  ;;  %327 = vst.msk [vmem:[#allocation2 + $0xa8] sm:$0xff] %vm305_vm0, %v1471_v3  ;;  %v1431_v5 = vld [vmem:[%s1567_s5] sm:$0xff]   ;;  %1360 = vmatprep.subr.bf16.mxu0 %v1430_v4  ;;  %1397 = vmatprep.subr.bf16.mxu1 %v1430_v4  ;;  %v1433_v7 = vld [vmem:[%s1567_s5 + $0x8] sm:$0xff]  }
  0x12   : > { %328 = vst.msk [vmem:[#allocation2 + $0xb0] sm:$0xff] %vm305_vm0, %v1471_v3  ;;  %329 = vst.msk [vmem:[#allocation2 + $0xb8] sm:$0xff] %vm305_vm0, %v1471_v3  ;;  %v1432_v6 = vld [vmem:[%s1567_s5 + $0x40] sm:$0xff]   ;;  %1362 = vmatprep.mubr.msk.bf16.mxu0 %vm514_vm1, %v1431_v5  ;;  %v1434_v8 = vld [vmem:[%s1567_s5 + $0x48] sm:$0xff]  }
  0x13   : > { %330 = vst.msk [vmem:[#allocation2 + $0xc0] sm:$0xff] %vm305_vm0, %v1471_v3  ;;  %331 = vst.msk [vmem:[#allocation2 + $0xc8] sm:$0xff] %vm305_vm0, %v1471_v3  ;;  %1378 = vmatprep.mubr.msk.bf16.mxu1 %vm514_vm1, %v1432_v6  ;;  %v1435_v9 = vld [vmem:[%s1567_s5 + $0x10] sm:$0xff]   ;;  %v1437_v11 = vld [vmem:[%s1567_s5 + $0x18] sm:$0xff]  }
  0x14   : > { %332 = vst.msk [vmem:[#allocation2 + $0xd0] sm:$0xff] %vm305_vm0, %v1471_v3  ;;  %333 = vst.msk [vmem:[#allocation2 + $0xd8] sm:$0xff] %vm305_vm0, %v1471_v3  ;;  %1361 = vmatpush3.bf16.msra.mxu0 %v1430_v4  ;;  %1401 = vmatpush3.bf16.msra.mxu1 %v1430_v4  ;;  %v1436_v10 = vld [vmem:[%s1567_s5 + $0x50] sm:$0xff]   ;;  %v1438_v12 = vld [vmem:[%s1567_s5 + $0x58] sm:$0xff]  }
  0x15   : > { %334 = vst.msk [vmem:[#allocation2 + $0xe0] sm:$0xff] %vm305_vm0, %v1471_v3  ;;  %335 = vst.msk [vmem:[#allocation2 + $0xe8] sm:$0xff] %vm305_vm0, %v1471_v3  ;;  %v1439_v13 = vld [vmem:[%s1567_s5 + $0x20] sm:$0xff]   ;;  %v1441_v15 = vld [vmem:[%s1567_s5 + $0x28] sm:$0xff]  }
  0x16   : > { %336 = vst.msk [vmem:[#allocation2 + $0xf0] sm:$0xff] %vm305_vm0, %v1471_v3  ;;  %337 = vst.msk [vmem:[#allocation2 + $0xf8] sm:$0xff] %vm305_vm0, %v1471_v3  ;;  %v1440_v14 = vld [vmem:[%s1567_s5 + $0x60] sm:$0xff]   ;;  %v1442_v16 = vld [vmem:[%s1567_s5 + $0x68] sm:$0xff]  }
  0x17   : > { %1363 = vmatmul.mubr.msk.bf16.vlgmr.msra.gmra.mrb[0].mxu0 %vm514_vm1, %v1433_v7  ;;  %1379 = vmatmul.mubr.msk.bf16.vlgmr.msra.gmra.mrb[0].mxu1 %vm514_vm1, %v1434_v8  ;;  %v1443_v17 = vld [vmem:[%s1567_s5 + $0x30] sm:$0xff]   ;;  %v1445_v19 = vld [vmem:[%s1567_s5 + $0x38] sm:$0xff]   ;;  %v354_v24 = vld [vmem:[#allocation2 + $0x80] sm:$0xff] }
  0x18   : > { %1366 = vmatprep.mubr.msk.bf16.mxu0 %vm514_vm1, %v1435_v9  ;;  %1382 = vmatprep.mubr.msk.bf16.mxu1 %vm514_vm1, %v1436_v10  ;;  %v1444_v18 = vld [vmem:[%s1567_s5 + $0x70] sm:$0xff]   ;;  %v1446_v20 = vld [vmem:[%s1567_s5 + $0x78] sm:$0xff]   ;;  %v355_v34 = vld [vmem:[#allocation2 + $0x88] sm:$0xff] }
  0x19   : > { %v356_v22 = vld [vmem:[#allocation2 + $0x90] sm:$0xff]  ;;  %v357_v28 = vld [vmem:[#allocation2 + $0x98] sm:$0xff]  ;;  %v358_v48 = vld [vmem:[#allocation2 + $0xa0] sm:$0xff] }
  0x1a   : > { %v344_v45 = vld [vmem:[#allocation2 + $0x30] sm:$0xff]  ;;  %v345_v52 = vld [vmem:[#allocation2 + $0x38] sm:$0xff]  ;;  %v359_v60 = vld [vmem:[#allocation2 + $0xa8] sm:$0xff] }
  0x1b   : > { %v360_v46 = vld [vmem:[#allocation2 + $0xb0] sm:$0xff]  ;;  %v361_v53 = vld [vmem:[#allocation2 + $0xb8] sm:$0xff] }
  0x1f   : > { %1367 = vmatmul.mubr.msk.bf16.gmra.mrb[4].mxu0 %vm514_vm1, %v1437_v11  ;;  %1383 = vmatmul.mubr.msk.bf16.gmra.mrb[4].mxu1 %vm514_vm1, %v1438_v12 }
  0x20   : > { %1370 = vmatprep.mubr.msk.bf16.mxu0 %vm514_vm1, %v1439_v13  ;;  %1386 = vmatprep.mubr.msk.bf16.mxu1 %vm514_vm1, %v1440_v14 }
  0x27   : > { %1371 = vmatmul.mubr.msk.bf16.gmra.mrb[8].mxu0 %vm514_vm1, %v1441_v15  ;;  %1387 = vmatmul.mubr.msk.bf16.gmra.mrb[8].mxu1 %vm514_vm1, %v1442_v16 }
  0x28   : > { %1374 = vmatprep.mubr.msk.bf16.mxu0 %vm514_vm1, %v1443_v17  ;;  %1390 = vmatprep.mubr.msk.bf16.mxu1 %vm514_vm1, %v1444_v18 }
  0x2f   : > { %1375 = vmatmul.mubr.msk.bf16.gmra.mrb[12].mxu0 %vm514_vm1, %v1445_v19  ;;  %1391 = vmatmul.mubr.msk.bf16.gmra.mrb[12].mxu1 %vm514_vm1, %v1446_v20 }
  0xea   : > { %v1364_v25 = vpop.f32.mrb[0].mxu0  ;;  %v1380_v26 = vpop.f32.mrb[0].mxu1 }
  0xeb   : > { %v726_v29 = vadd.f32 %v1364_v25, %v340_v21  ;;  %v742_v30 = vadd.f32 %v1380_v26, %v356_v22  ;;  %v597_v31 = vpop.f32.mrb[1].mxu0  ;;  %v661_v32 = vpop.f32.mrb[1].mxu1 }
  0xec   : > { %v724_v35 = vadd.f32 %v597_v31, %v338_v23  ;;  %v740_v36 = vadd.f32 %v661_v32, %v354_v24  ;;  %v1365_v37 = vpop.f32.mrb[2].mxu0  ;;  %v1381_v38 = vpop.f32.mrb[2].mxu1 }
  0xed   : > { %759 = vst.msk [vmem:[#allocation2 + $0x10] sm:$0xff] %vm305_vm0, %v726_v29  ;;  %775 = vst.msk [vmem:[#allocation2 + $0x90] sm:$0xff] %vm305_vm0, %v742_v30  ;;  %v727_v39 = vadd.f32 %v1365_v37, %v341_v27  ;;  %v743_v40 = vadd.f32 %v1381_v38, %v357_v28  ;;  %v600_v41 = vpop.f32.mrb[3].mxu0  ;;  %v664_v42 = vpop.f32.mrb[3].mxu1 }
  0xee   : > { %757 = vst.msk [vmem:[#allocation2] sm:$0xff] %vm305_vm0, %v724_v35  ;;  %773 = vst.msk [vmem:[#allocation2 + $0x80] sm:$0xff] %vm305_vm0, %v740_v36  ;;  %v725_v43 = vadd.f32 %v600_v41, %v339_v33  ;;  %v741_v44 = vadd.f32 %v664_v42, %v355_v34 }
  0xef   : > { %760 = vst.msk [vmem:[#allocation2 + $0x18] sm:$0xff] %vm305_vm0, %v727_v39  ;;  %776 = vst.msk [vmem:[#allocation2 + $0x98] sm:$0xff] %vm305_vm0, %v743_v40 }
  0xf0   : > { %758 = vst.msk [vmem:[#allocation2 + $0x8] sm:$0xff] %vm305_vm0, %v725_v43  ;;  %774 = vst.msk [vmem:[#allocation2 + $0x88] sm:$0xff] %vm305_vm0, %v741_v44 }
  0xf2   : > { %v1368_v50 = vpop.f32.mrb[4].mxu0  ;;  %v1384_v51 = vpop.f32.mrb[4].mxu1 }
  0xf3   : > { %v730_v55 = vadd.f32 %v1368_v50, %v344_v45  ;;  %v746_v56 = vadd.f32 %v1384_v51, %v360_v46  ;;  %v613_v57 = vpop.f32.mrb[5].mxu0  ;;  %v677_v58 = vpop.f32.mrb[5].mxu1 }
  0xf4   : > { %v794_v61 = vld [vmem:[#allocation2 + $0x10] sm:$0xff]  ;;  %v728_v63 = vadd.f32 %v613_v57, %v342_v47  ;;  %v744_v0 = vadd.f32 %v677_v58, %v358_v48  ;;  %v1369_v1 = vpop.f32.mrb[6].mxu0  ;;  %v1385_v2 = vpop.f32.mrb[6].mxu1 }
  0xf5   : > { %v810_v62 = vld [vmem:[#allocation2 + $0x90] sm:$0xff]  ;;  %v833_v3 = vmul.f32 %v1612_v49, %v794_v61  ;;  %v792_v5 = vld [vmem:[#allocation2] sm:$0xff]  ;;  %763 = vst.msk [vmem:[#allocation2 + $0x30] sm:$0xff] %vm305_vm0, %v730_v55  ;;  %779 = vst.msk [vmem:[#allocation2 + $0xb0] sm:$0xff] %vm305_vm0, %v746_v56  ;;  %v731_v7 = vadd.f32 %v1369_v1, %v345_v52  ;;  %v747_v8 = vadd.f32 %v1385_v2, %v361_v53  ;;  %v616_v9 = vpop.f32.mrb[7].mxu0  ;;  %v680_v10 = vpop.f32.mrb[7].mxu1 }
  0xf6   : > { %v849_v4 = vmul.f32 %v1612_v49, %v810_v62  ;;  %v808_v6 = vld [vmem:[#allocation2 + $0x80] sm:$0xff]  ;;  %v831_v11 = vmul.f32 %v1612_v49, %v792_v5  ;;  %v795_v13 = vld [vmem:[#allocation2 + $0x18] sm:$0xff]  ;;  %761 = vst.msk [vmem:[#allocation2 + $0x20] sm:$0xff] %vm305_vm0, %v728_v63  ;;  %777 = vst.msk [vmem:[#allocation2 + $0xa0] sm:$0xff] %vm305_vm0, %v744_v0  ;;  %v729_v15 = vadd.f32 %v616_v9, %v343_v59 }
  0xf7   : > { %v847_v12 = vmul.f32 %v1612_v49, %v808_v6  ;;  %v811_v14 = vld [vmem:[#allocation2 + $0x98] sm:$0xff]  ;;  %v745_v16 = vadd.f32 %v680_v10, %v359_v60  ;;  %v872_v17 = vadd.f32 %v1617_v54, %v833_v3  ;;  %v834_v19 = vmul.f32 %v1612_v49, %v795_v13  ;;  %v793_v21 = vld [vmem:[#allocation2 + $0x8] sm:$0xff]  ;;  %764 = vst.msk [vmem:[#allocation2 + $0x38] sm:$0xff] %vm305_vm0, %v731_v7  ;;  %v348_v13 = vld [vmem:[#allocation2 + $0x50] sm:$0xff] }
  0xf8   : > { %v888_v18 = vadd.f32 %v1617_v54, %v849_v4  ;;  %v850_v20 = vmul.f32 %v1612_v49, %v811_v14  ;;  %v809_v22 = vld [vmem:[#allocation2 + $0x88] sm:$0xff]  ;;  %780 = vst.msk [vmem:[#allocation2 + $0xb8] sm:$0xff] %vm305_vm0, %v747_v8  ;;  %v870_v23 = vadd.f32 %v1617_v54, %v831_v11  ;;  %v832_v25 = vmul.f32 %v1612_v49, %v793_v21 }
  0xf9   : > { %v886_v24 = vadd.f32 %v1617_v54, %v847_v12  ;;  %v848_v26 = vmul.f32 %v1612_v49, %v809_v22  ;;  %762 = vst.msk [vmem:[#allocation2 + $0x28] sm:$0xff] %vm305_vm0, %v729_v15  ;;  %778 = vst.msk [vmem:[#allocation2 + $0xa8] sm:$0xff] %vm305_vm0, %v745_v16  ;;  %v904_v27 = vmax.f32 %v872_v17, 0.0  ;;  %v873_v29 = vadd.f32 %v1617_v54, %v834_v19  ;;  %v346_v19 = vld [vmem:[#allocation2 + $0x40] sm:$0xff] }
  0xfa   : > { %v920_v28 = vmax.f32 %v888_v18, 0.0  ;;  %v889_v30 = vadd.f32 %v1617_v54, %v850_v20  ;;  %v902_v31 = vmax.f32 %v870_v23, 0.0  ;;  %v871_v33 = vadd.f32 %v1617_v54, %v832_v25  ;;  %v1650_v35 = vpop.f32.mrb[8].mxu0  ;;  %v1652_v36 = vpop.f32.mrb[8].mxu1  ;;  %v364_v18 = vld [vmem:[#allocation2 + $0xd0] sm:$0xff]  ;;  %v362_v20 = vld [vmem:[#allocation2 + $0xc0] sm:$0xff] }
  0xfb   : > { %v918_v32 = vmax.f32 %v886_v24, 0.0  ;;  %v887_v34 = vadd.f32 %v1617_v54, %v848_v26  ;;  %v1304_v37 = vpack.c.bf16 %v904_v27, %v904_v27  ;;  %v905_v39 = vmax.f32 %v873_v29, 0.0  ;;  %v1654_v41 = vpop.f32.mrb[9].mxu0  ;;  %v1656_v42 = vpop.f32.mrb[9].mxu1  ;;  %v349_v25 = vld [vmem:[#allocation2 + $0x58] sm:$0xff] }
  0xfc   : > { %v1320_v38 = vpack.c.bf16 %v920_v28, %v920_v28  ;;  %v921_v40 = vmax.f32 %v889_v30, 0.0  ;;  %v1302_v43 = vpack.c.bf16 %v902_v31, %v902_v31  ;;  %v903_v45 = vmax.f32 %v871_v33, 0.0  ;;  %v798_v47 = vld [vmem:[#allocation2 + $0x30] sm:$0xff]  ;;  %v1658_v50 = vpop.f32.mrb[10].mxu0  ;;  %v1660_v51 = vpop.f32.mrb[10].mxu1  ;;  %v365_v26 = vld [vmem:[#allocation2 + $0xd8] sm:$0xff] }
  0xfd   : > { %v1318_v44 = vpack.c.bf16 %v918_v32, %v918_v32  ;;  %v919_v46 = vmax.f32 %v887_v34, 0.0  ;;  %v814_v48 = vld [vmem:[#allocation2 + $0xb0] sm:$0xff]  ;;  %1065 = vst.msk [vmem:[%s1646_s12 + $0x8] sm:$0xf] %vm1062_vm2, %v1304_v37  ;;  %v1305_v52 = vpack.c.bf16 %v905_v39, %v905_v39  ;;  %v837_v55 = vmul.f32 %v1612_v49, %v798_v47  ;;  %v796_v57 = vld [vmem:[#allocation2 + $0x20] sm:$0xff]  ;;  %v1668_v59 = vpop.f32.mrb[11].mxu0 }
  0xfe   : > { %1081 = vst.msk [vmem:[%s1646_s12 + $0x48] sm:$0xf] %vm1062_vm2, %v1320_v38  ;;  %v1321_v53 = vpack.c.bf16 %v921_v40, %v921_v40  ;;  %v853_v56 = vmul.f32 %v1612_v49, %v814_v48  ;;  %v812_v58 = vld [vmem:[#allocation2 + $0xa0] sm:$0xff]  ;;  %v1670_v60 = vpop.f32.mrb[11].mxu1  ;;  %1063 = vst.msk [vmem:[%s1646_s12] sm:$0xf] %vm1062_vm2, %v1302_v43  ;;  %v1303_v61 = vpack.c.bf16 %v903_v45, %v903_v45 }
  0xff   : > { %1079 = vst.msk [vmem:[%s1646_s12 + $0x40] sm:$0xf] %vm1062_vm2, %v1318_v44  ;;  %v1319_v62 = vpack.c.bf16 %v919_v46, %v919_v46  ;;  %v835_v63 = vmul.f32 %v1612_v49, %v796_v57  ;;  %v851_v0 = vmul.f32 %v1612_v49, %v812_v58  ;;  %v799_v1 = vld [vmem:[#allocation2 + $0x38] sm:$0xff]  ;;  %1066 = vst.msk [vmem:[%s1646_s12 + $0xc] sm:$0xf] %vm1062_vm2, %v1305_v52  ;;  %v347_v33 = vld [vmem:[#allocation2 + $0x48] sm:$0xff] }
 0x100   : > { %v815_v2 = vld [vmem:[#allocation2 + $0xb8] sm:$0xff]  ;;  %1082 = vst.msk [vmem:[%s1646_s12 + $0x4c] sm:$0xf] %vm1062_vm2, %v1321_v53  ;;  %v876_v3 = vadd.f32 %v1617_v54, %v837_v55  ;;  %v892_v4 = vadd.f32 %v1617_v54, %v853_v56  ;;  %v838_v5 = vmul.f32 %v1612_v49, %v799_v1  ;;  %v797_v7 = vld [vmem:[#allocation2 + $0x28] sm:$0xff]  ;;  %1064 = vst.msk [vmem:[%s1646_s12 + $0x4] sm:$0xf] %vm1062_vm2, %v1303_v61 }
 0x101   : > { %v854_v6 = vmul.f32 %v1612_v49, %v815_v2  ;;  %v813_v8 = vld [vmem:[#allocation2 + $0xa8] sm:$0xff]  ;;  %1080 = vst.msk [vmem:[%s1646_s12 + $0x44] sm:$0xf] %vm1062_vm2, %v1319_v62  ;;  %v874_v9 = vadd.f32 %v1617_v54, %v835_v63  ;;  %v890_v10 = vadd.f32 %v1617_v54, %v851_v0  ;;  %v836_v11 = vmul.f32 %v1612_v49, %v797_v7  ;;  %v352_v45 = vld [vmem:[#allocation2 + $0x70] sm:$0xff]  ;;  %v350_v57 = vld [vmem:[#allocation2 + $0x60] sm:$0xff] }
 0x102   : > { %v852_v12 = vmul.f32 %v1612_v49, %v813_v8  ;;  %v908_v14 = vmax.f32 %v876_v3, 0.0  ;;  %v924_v15 = vmax.f32 %v892_v4, 0.0  ;;  %v877_v16 = vadd.f32 %v1617_v54, %v838_v5  ;;  %v1376_v27 = vpop.f32.mrb[12].mxu0  ;;  %v1392_v28 = vpop.f32.mrb[12].mxu1  ;;  %v363_v34 = vld [vmem:[#allocation2 + $0xc8] sm:$0xff]  ;;  %v368_v46 = vld [vmem:[#allocation2 + $0xf0] sm:$0xff] }
 0x103   : > { %v893_v17 = vadd.f32 %v1617_v54, %v854_v6  ;;  %v906_v21 = vmax.f32 %v874_v9, 0.0  ;;  %v922_v22 = vmax.f32 %v890_v10, 0.0  ;;  %v875_v23 = vadd.f32 %v1617_v54, %v836_v11  ;;  %v645_v37 = vpop.f32.mrb[13].mxu0  ;;  %v709_v38 = vpop.f32.mrb[13].mxu1  ;;  %v366_v58 = vld [vmem:[#allocation2 + $0xe0] sm:$0xff]  ;;  %v353_v61 = vld [vmem:[#allocation2 + $0x78] sm:$0xff] }
 0x104   : > { %v891_v24 = vadd.f32 %v1617_v54, %v852_v12  ;;  %v1308_v29 = vpack.c.bf16 %v908_v14, %v908_v14  ;;  %v1324_v30 = vpack.c.bf16 %v924_v15, %v924_v15  ;;  %v909_v31 = vmax.f32 %v877_v16, 0.0  ;;  %v1377_v47 = vpop.f32.mrb[14].mxu0  ;;  %v1393_v48 = vpop.f32.mrb[14].mxu1  ;;  %v369_v3 = vld [vmem:[#allocation2 + $0xf8] sm:$0xff]  ;;  %v367_v4 = vld [vmem:[#allocation2 + $0xe8] sm:$0xff] }
 0x105   : > { %v925_v32 = vmax.f32 %v893_v17, 0.0  ;;  %v1306_v39 = vpack.c.bf16 %v906_v21, %v906_v21  ;;  %v1322_v40 = vpack.c.bf16 %v922_v22, %v922_v22  ;;  %v907_v43 = vmax.f32 %v875_v23, 0.0  ;;  %v648_v62 = vpop.f32.mrb[15].mxu0  ;;  %v712_v63 = vpop.f32.mrb[15].mxu1 }
 0x106   : > { %v923_v44 = vmax.f32 %v891_v24, 0.0  ;;  %1069 = vst.msk [vmem:[%s1646_s12 + $0x18] sm:$0xf] %vm1062_vm2, %v1308_v29  ;;  %1085 = vst.msk [vmem:[%s1646_s12 + $0x58] sm:$0xf] %vm1062_vm2, %v1324_v30  ;;  %v1309_v52 = vpack.c.bf16 %v909_v31, %v909_v31  ;;  %v734_v55 = vadd.f32 %v1650_v35, %v348_v13  ;;  %v750_v56 = vadd.f32 %v1652_v36, %v364_v18  ;;  %v351_v36 = vld [vmem:[#allocation2 + $0x68] sm:$0xff] }
 0x107   : > { %v1325_v53 = vpack.c.bf16 %v925_v32, %v925_v32  ;;  %1067 = vst.msk [vmem:[%s1646_s12 + $0x10] sm:$0xf] %vm1062_vm2, %v1306_v39  ;;  %1083 = vst.msk [vmem:[%s1646_s12 + $0x50] sm:$0xf] %vm1062_vm2, %v1322_v40  ;;  %v1307_v0 = vpack.c.bf16 %v907_v43, %v907_v43  ;;  %v732_v2 = vadd.f32 %v1654_v41, %v346_v19 }
 0x108   : > { %v1323_v1 = vpack.c.bf16 %v923_v44, %v923_v44  ;;  %v748_v35 = vadd.f32 %v1656_v42, %v362_v20  ;;  %1070 = vst.msk [vmem:[%s1646_s12 + $0x1c] sm:$0xf] %vm1062_vm2, %v1309_v52  ;;  %v735_v5 = vadd.f32 %v1658_v50, %v349_v25  ;;  %v751_v6 = vadd.f32 %v1660_v51, %v365_v26 }
 0x109   : > { %1086 = vst.msk [vmem:[%s1646_s12 + $0x5c] sm:$0xf] %vm1062_vm2, %v1325_v53  ;;  %v733_v7 = vadd.f32 %v1668_v59, %v347_v33  ;;  %v749_v41 = vadd.f32 %v1670_v60, %v363_v34  ;;  %1068 = vst.msk [vmem:[%s1646_s12 + $0x14] sm:$0xf] %vm1062_vm2, %v1307_v0  ;;  %v738_v42 = vadd.f32 %v1376_v27, %v352_v45 }
 0x10a   : > { %767 = vst.msk [vmem:[#allocation2 + $0x50] sm:$0xff] %vm305_vm0, %v734_v55  ;;  %783 = vst.msk [vmem:[#allocation2 + $0xd0] sm:$0xff] %vm305_vm0, %v750_v56  ;;  %v754_v8 = vadd.f32 %v1392_v28, %v368_v46  ;;  %v736_v9 = vadd.f32 %v645_v37, %v350_v57  ;;  %v752_v10 = vadd.f32 %v709_v38, %v366_v58 }
 0x10b   : > { %1084 = vst.msk [vmem:[%s1646_s12 + $0x54] sm:$0xf] %vm1062_vm2, %v1323_v1  ;;  %v739_v50 = vadd.f32 %v1377_v47, %v353_v61  ;;  %v755_v51 = vadd.f32 %v1393_v48, %v369_v3  ;;  %v737_v59 = vadd.f32 %v648_v62, %v351_v36  ;;  %v753_v60 = vadd.f32 %v712_v63, %v367_v4 }
 0x10c   : > { %765 = vst.msk [vmem:[#allocation2 + $0x40] sm:$0xff] %vm305_vm0, %v732_v2  ;;  %781 = vst.msk [vmem:[#allocation2 + $0xc0] sm:$0xff] %vm305_vm0, %v748_v35 }
 0x10d   : > { %768 = vst.msk [vmem:[#allocation2 + $0x58] sm:$0xff] %vm305_vm0, %v735_v5  ;;  %784 = vst.msk [vmem:[#allocation2 + $0xd8] sm:$0xff] %vm305_vm0, %v751_v6 }
 0x10e   : > { %766 = vst.msk [vmem:[#allocation2 + $0x48] sm:$0xff] %vm305_vm0, %v733_v7  ;;  %782 = vst.msk [vmem:[#allocation2 + $0xc8] sm:$0xff] %vm305_vm0, %v749_v41 }
 0x10f   : > { %771 = vst.msk [vmem:[#allocation2 + $0x70] sm:$0xff] %vm305_vm0, %v738_v42  ;;  %787 = vst.msk [vmem:[#allocation2 + $0xf0] sm:$0xff] %vm305_vm0, %v754_v8 }
 0x110   : > { %769 = vst.msk [vmem:[#allocation2 + $0x60] sm:$0xff] %vm305_vm0, %v736_v9  ;;  %785 = vst.msk [vmem:[#allocation2 + $0xe0] sm:$0xff] %vm305_vm0, %v752_v10 }
 0x111   : > { %772 = vst.msk [vmem:[#allocation2 + $0x78] sm:$0xff] %vm305_vm0, %v739_v50  ;;  %788 = vst.msk [vmem:[#allocation2 + $0xf8] sm:$0xff] %vm305_vm0, %v755_v51  ;;  %v802_v11 = vld [vmem:[#allocation2 + $0x50] sm:$0xff] }
 0x112   : > { %770 = vst.msk [vmem:[#allocation2 + $0x68] sm:$0xff] %vm305_vm0, %v737_v59  ;;  %786 = vst.msk [vmem:[#allocation2 + $0xe8] sm:$0xff] %vm305_vm0, %v753_v60  ;;  %v818_v12 = vld [vmem:[#allocation2 + $0xd0] sm:$0xff]  ;;  %v841_v13 = vmul.f32 %v1612_v49, %v802_v11 }
 0x113   : > { %v857_v14 = vmul.f32 %v1612_v49, %v818_v12  ;;  %v800_v15 = vld [vmem:[#allocation2 + $0x40] sm:$0xff] }
 0x114   : > { %v816_v16 = vld [vmem:[#allocation2 + $0xc0] sm:$0xff]  ;;  %v839_v17 = vmul.f32 %v1612_v49, %v800_v15  ;;  %v803_v19 = vld [vmem:[#allocation2 + $0x58] sm:$0xff]  ;;  %v880_v22 = vadd.f32 %v1617_v54, %v841_v13 }
 0x115   : > { %v855_v18 = vmul.f32 %v1612_v49, %v816_v16  ;;  %v819_v20 = vld [vmem:[#allocation2 + $0xd8] sm:$0xff]  ;;  %v801_v21 = vld [vmem:[#allocation2 + $0x48] sm:$0xff]  ;;  %v896_v23 = vadd.f32 %v1617_v54, %v857_v14  ;;  %v842_v24 = vmul.f32 %v1612_v49, %v803_v19 }
 0x116   : > { %v858_v25 = vmul.f32 %v1612_v49, %v819_v20  ;;  %v817_v26 = vld [vmem:[#allocation2 + $0xc8] sm:$0xff]  ;;  %v878_v27 = vadd.f32 %v1617_v54, %v839_v17  ;;  %v840_v29 = vmul.f32 %v1612_v49, %v801_v21  ;;  %v912_v31 = vmax.f32 %v880_v22, 0.0  ;;  %v806_v43 = vld [vmem:[#allocation2 + $0x70] sm:$0xff] }
 0x117   : > { %v894_v28 = vadd.f32 %v1617_v54, %v855_v18  ;;  %v856_v30 = vmul.f32 %v1612_v49, %v817_v26  ;;  %v928_v32 = vmax.f32 %v896_v23, 0.0  ;;  %v881_v33 = vadd.f32 %v1617_v54, %v842_v24  ;;  %v822_v44 = vld [vmem:[#allocation2 + $0xf0] sm:$0xff]  ;;  %v804_v52 = vld [vmem:[#allocation2 + $0x60] sm:$0xff] }
 0x118   : > { %v897_v34 = vadd.f32 %v1617_v54, %v858_v25  ;;  %v910_v37 = vmax.f32 %v878_v27, 0.0  ;;  %v879_v39 = vadd.f32 %v1617_v54, %v840_v29  ;;  %v1312_v45 = vpack.c.bf16 %v912_v31, %v912_v31  ;;  %v820_v53 = vld [vmem:[#allocation2 + $0xe0] sm:$0xff]  ;;  %v807_v61 = vld [vmem:[#allocation2 + $0x78] sm:$0xff] }
 0x119   : > { %v926_v38 = vmax.f32 %v894_v28, 0.0  ;;  %v895_v40 = vadd.f32 %v1617_v54, %v856_v30  ;;  %v1328_v46 = vpack.c.bf16 %v928_v32, %v928_v32  ;;  %v913_v47 = vmax.f32 %v881_v33, 0.0  ;;  %v823_v62 = vld [vmem:[#allocation2 + $0xf8] sm:$0xff]  ;;  %v805_v35 = vld [vmem:[#allocation2 + $0x68] sm:$0xff] }
 0x11a   : > { %v929_v48 = vmax.f32 %v897_v34, 0.0  ;;  %v1310_v55 = vpack.c.bf16 %v910_v37, %v910_v37  ;;  %v911_v57 = vmax.f32 %v879_v39, 0.0  ;;  %1073 = vst.msk [vmem:[%s1646_s12 + $0x28] sm:$0xf] %vm1062_vm2, %v1312_v45  ;;  %v845_v1 = vmul.f32 %v1612_v49, %v806_v43  ;;  %v821_v3 = vld [vmem:[#allocation2 + $0xe8] sm:$0xff] }
 0x11b   : > { %v1326_v56 = vpack.c.bf16 %v926_v38, %v926_v38  ;;  %v927_v58 = vmax.f32 %v895_v40, 0.0  ;;  %1089 = vst.msk [vmem:[%s1646_s12 + $0x68] sm:$0xf] %vm1062_vm2, %v1328_v46  ;;  %v1313_v63 = vpack.c.bf16 %v913_v47, %v913_v47  ;;  %v861_v2 = vmul.f32 %v1612_v49, %v822_v44 }
 0x11c   : > { %v1329_v0 = vpack.c.bf16 %v929_v48, %v929_v48  ;;  %1071 = vst.msk [vmem:[%s1646_s12 + $0x20] sm:$0xf] %vm1062_vm2, %v1310_v55  ;;  %v1311_v36 = vpack.c.bf16 %v911_v57, %v911_v57  ;;  %v843_v5 = vmul.f32 %v1612_v49, %v804_v52  ;;  %v859_v6 = vmul.f32 %v1612_v49, %v820_v53 }
 0x11d   : > { %1087 = vst.msk [vmem:[%s1646_s12 + $0x60] sm:$0xf] %vm1062_vm2, %v1326_v56  ;;  %v1327_v4 = vpack.c.bf16 %v927_v58, %v927_v58  ;;  %1074 = vst.msk [vmem:[%s1646_s12 + $0x2c] sm:$0xf] %vm1062_vm2, %v1313_v63  ;;  %v884_v7 = vadd.f32 %v1617_v54, %v845_v1  ;;  %v900_v41 = vadd.f32 %v1617_v54, %v861_v2 }
 0x11e   : > { %1090 = vst.msk [vmem:[%s1646_s12 + $0x6c] sm:$0xf] %vm1062_vm2, %v1329_v0  ;;  %v846_v42 = vmul.f32 %v1612_v49, %v807_v61  ;;  %v862_v8 = vmul.f32 %v1612_v49, %v823_v62  ;;  %1072 = vst.msk [vmem:[%s1646_s12 + $0x24] sm:$0xf] %vm1062_vm2, %v1311_v36  ;;  %v882_v9 = vadd.f32 %v1617_v54, %v843_v5 }
 0x11f   : > { %1088 = vst.msk [vmem:[%s1646_s12 + $0x64] sm:$0xf] %vm1062_vm2, %v1327_v4  ;;  %v898_v10 = vadd.f32 %v1617_v54, %v859_v6  ;;  %v844_v50 = vmul.f32 %v1612_v49, %v805_v35  ;;  %v860_v51 = vmul.f32 %v1612_v49, %v821_v3  ;;  %v916_v59 = vmax.f32 %v884_v7, 0.0 }
 0x120   : > { %v932_v60 = vmax.f32 %v900_v41, 0.0  ;;  %v885_v11 = vadd.f32 %v1617_v54, %v846_v42  ;;  %v901_v12 = vadd.f32 %v1617_v54, %v862_v8  ;;  %v914_v13 = vmax.f32 %v882_v9, 0.0 }
 0x121   : > { %v930_v14 = vmax.f32 %v898_v10, 0.0  ;;  %v883_v15 = vadd.f32 %v1617_v54, %v844_v50  ;;  %v899_v16 = vadd.f32 %v1617_v54, %v860_v51  ;;  %v1316_v17 = vpack.c.bf16 %v916_v59, %v916_v59 }
 0x122   : > { %v1332_v18 = vpack.c.bf16 %v932_v60, %v932_v60  ;;  %v917_v49 = vmax.f32 %v885_v11, 0.0  ;;  %v933_v19 = vmax.f32 %v901_v12, 0.0  ;;  %v1314_v20 = vpack.c.bf16 %v914_v13, %v914_v13 }
 0x123   : > { %v1330_v21 = vpack.c.bf16 %v930_v14, %v930_v14  ;;  %v915_v22 = vmax.f32 %v883_v15, 0.0  ;;  %v931_v23 = vmax.f32 %v899_v16, 0.0  ;;  %1077 = vst.msk [vmem:[%s1646_s12 + $0x38] sm:$0xf] %vm1062_vm2, %v1316_v17 }
 0x124   : > { %1093 = vst.msk [vmem:[%s1646_s12 + $0x78] sm:$0xf] %vm1062_vm2, %v1332_v18  ;;  %v1317_v24 = vpack.c.bf16 %v917_v49, %v917_v49  ;;  %v1333_v25 = vpack.c.bf16 %v933_v19, %v933_v19  ;;  %1075 = vst.msk [vmem:[%s1646_s12 + $0x30] sm:$0xf] %vm1062_vm2, %v1314_v20 }
 0x125   : > { %1091 = vst.msk [vmem:[%s1646_s12 + $0x70] sm:$0xf] %vm1062_vm2, %v1330_v21  ;;  %v1315_v54 = vpack.c.bf16 %v915_v22, %v915_v22  ;;  %v1331_v26 = vpack.c.bf16 %v931_v23, %v931_v23 }
 0x126   : > { %1078 = vst.msk [vmem:[%s1646_s12 + $0x3c] sm:$0xf] %vm1062_vm2, %v1317_v24  ;;  %1094 = vst.msk [vmem:[%s1646_s12 + $0x7c] sm:$0xf] %vm1062_vm2, %v1333_v25 }
 0x127   : > { %1076 = vst.msk [vmem:[%s1646_s12 + $0x34] sm:$0xf] %vm1062_vm2, %v1315_v54  ;;  %1092 = vst.msk [vmem:[%s1646_s12 + $0x74] sm:$0xf] %vm1062_vm2, %v1331_v26 }
 0x128 PF: > { %s14_s17 = sadd.s32 1, %s1469_s17   ;;  %s1816_s15 = smov %s1465_s16 }
 0x129   : > { %p11_p5 = scmp.ge.s32.totalorder %s14_s17, 4   ;;  %s1817_s16 = smov %s1819_s18 }
 0x12b   :  { %13 = sbr.rel (!%p11_p5) target bundleno = 2 (0x2), region = 83 }

// kernel: bottleneck_forward.6
= control target key start
LH: loop header
LB: loop body
LE: loop exit
PB: predicated region body
PF: predicated region fallthrough
CT: control target
= control target key end

     0   :  { %s1555_s15 = smov 0   ;;  %s1557_s16 = smov 0   ;;  %s1733_s0 = inlined_call_operand.vmem [shape: bf16[512,64], index: 0, kind: input, shape index: {}]   ;;  %s1734_s1 = inlined_call_operand.vmem [shape: bf16[64,128], index: 1, kind: input, shape index: {}]   ;;  %s1735_s2 = inlined_call_operand.vmem [shape: f32[1,128], index: 2, kind: input, shape index: {}]   ;;  %s1736_s3 = inlined_call_operand.vmem [shape: f32[1,128], index: 3, kind: input, shape index: {}]   ;;  %s1737_s4 = inlined_call_operand.vmem [shape: bf16[512,128], index: 4, kind: output, shape index: {}]  }
   0x1   :  { %s1559_s17 = smov 0  }
   0x2 LB: > { %s33_s18 = sadd.s32 1, %s1524_s16  ;;  %p1190_p0 = scmp.ge.s32.totalorder %s1528_s17, 1  ;;  %s1528_s17 = sphi %s1559_s17, %s14_s17   ;;  %s1524_s16 = sphi %s1557_s16, %s1739_s16   ;;  %s1520_s15 = sphi %s1555_s15, %s1738_s15  }
   0x3   : > { %p35_p1 = scmp.ge.s32.totalorder %s33_s18, 2  ;;  %p221_p2 = scmp.lt.s32.totalorder %s1528_s17, 3 }
   0x5   : > { %s1741_s18 = smov (%p35_p1, %s33_s18), 0  ;;  %p222_p3 = pnand %p1190_p0, %p221_p2 }
   0x6   : > { %v1486_v0 = vld [vmem:[%s1734_s1] sm:$0xff] (!%p222_p3)   ;;  %s1191_s21 = sshll.u32 (!%p222_p3), %s1520_s15, 5  ;;  %v1487_v1 = vld [vmem:[%s1734_s1 + $0x8] sm:$0xff] (!%p222_p3)   ;;  %v1488_v2 = vld [vmem:[%s1734_s1 + $0x10] sm:$0xff] (!%p222_p3)   ;;  %vm513_vm0 = vcmask (!%p222_p3), 523264  }
   0x7   : > { %225 = sbr.rel (%p222_p3) target bundleno = 269 (0x10d), region = 36  ;;  %p268_p4 = scmp.lt.s32.totalorder (!%p222_p3), %s1191_s21, 63  ;;  %1414 = vmatprep.subr.bf16.mxu0 (!%p222_p3), %v1486_v0  ;;  %1454 = vmatprep.subr.bf16.mxu1 (!%p222_p3), %v1486_v0  ;;  %v1489_v3 = vld [vmem:[%s1734_s1 + $0x18] sm:$0xff] (!%p222_p3)   ;;  %v1630_v20 = vld [vmem:[%s1735_s2] ss:$0 sm:$0xff] (!%p222_p3) }
   0x8   : > { %1415 = vmatpush3.bf16.msra.mxu0 (!%p222_p3), %v1486_v0  ;;  %1458 = vmatpush3.bf16.msra.mxu1 (!%p222_p3), %v1486_v0  ;;  %v1637_v27 = vld [vmem:[%s1736_s3] ss:$0 sm:$0xff] (!%p222_p3) }
   0x9   : > { %1416 = vmatprep.subr.bf16.mxu0 (!%p222_p3), %v1487_v1  ;;  %1455 = vmatprep.subr.bf16.mxu1 (!%p222_p3), %v1487_v1 }
   0xc   : > { %1417 = vmatpush3.bf16.msra.mxu0 (!%p222_p3), %v1487_v1  ;;  %1459 = vmatpush3.bf16.msra.mxu1 (!%p222_p3), %v1487_v1 }
   0xd   : > { %1418 = vmatprep.subr.bf16.mxu0 (!%p222_p3), %v1488_v2  ;;  %1456 = vmatprep.subr.bf16.mxu1 (!%p222_p3), %v1488_v2 }
   0xe   : > { %s1743_s21 = smov (!%p268_p4, %s1191_s21), 63 }
   0xf   : > { %s1192_s26 = sshll.u32 %s1743_s21, 2 }
  0x10   : > { %s1593_s5 = scalar_lea.vmem %s1733_s0, %s1192_s26  ;;  %1419 = vmatpush3.bf16.msra.mxu0 %v1488_v2  ;;  %1460 = vmatpush3.bf16.msra.mxu1 %v1488_v2  ;;  %s1656_s12 = scalar_lea.vmem %s1737_s4, %s1192_s26 }
  0x11   : > { %v1490_v4 = vld [vmem:[%s1593_s5] sm:$0xff]   ;;  %1420 = vmatprep.subr.bf16.mxu0 %v1489_v3  ;;  %1457 = vmatprep.subr.bf16.mxu1 %v1489_v3  ;;  %v1492_v6 = vld [vmem:[%s1593_s5 + $0x8] sm:$0xff]   ;;  %v1494_v8 = vld [vmem:[%s1593_s5 + $0x10] sm:$0xff]  }
  0x12   : > { %v1491_v5 = vld [vmem:[%s1593_s5 + $0x40] sm:$0xff]   ;;  %1422 = vmatprep.mubr.msk.bf16.mxu0 %vm513_vm0, %v1490_v4  ;;  %v1493_v7 = vld [vmem:[%s1593_s5 + $0x48] sm:$0xff]   ;;  %v1495_v9 = vld [vmem:[%s1593_s5 + $0x50] sm:$0xff]  }
  0x13   : > { %1438 = vmatprep.mubr.msk.bf16.mxu1 %vm513_vm0, %v1491_v5  ;;  %v1496_v10 = vld [vmem:[%s1593_s5 + $0x18] sm:$0xff]   ;;  %v1498_v12 = vld [vmem:[%s1593_s5 + $0x20] sm:$0xff]   ;;  %v1500_v14 = vld [vmem:[%s1593_s5 + $0x28] sm:$0xff]  }
  0x14   : > { %1421 = vmatpush3.bf16.msra.mxu0 %v1489_v3  ;;  %1461 = vmatpush3.bf16.msra.mxu1 %v1489_v3  ;;  %v1497_v11 = vld [vmem:[%s1593_s5 + $0x58] sm:$0xff]   ;;  %v1499_v13 = vld [vmem:[%s1593_s5 + $0x60] sm:$0xff]   ;;  %v1501_v15 = vld [vmem:[%s1593_s5 + $0x68] sm:$0xff]  }
  0x15   : > { %v1502_v16 = vld [vmem:[%s1593_s5 + $0x30] sm:$0xff]   ;;  %v1504_v18 = vld [vmem:[%s1593_s5 + $0x38] sm:$0xff]  }
  0x16   : > { %v1503_v17 = vld [vmem:[%s1593_s5 + $0x70] sm:$0xff]   ;;  %v1505_v19 = vld [vmem:[%s1593_s5 + $0x78] sm:$0xff]  }
  0x17   : > { %1423 = vmatmul.mubr.msk.bf16.vlgmr.msra.gmra.mrb[0].mxu0 %vm513_vm0, %v1492_v6  ;;  %1439 = vmatmul.mubr.msk.bf16.vlgmr.msra.gmra.mrb[0].mxu1 %vm513_vm0, %v1493_v7 }
  0x18   : > { %1426 = vmatprep.mubr.msk.bf16.mxu0 %vm513_vm0, %v1494_v8  ;;  %1442 = vmatprep.mubr.msk.bf16.mxu1 %vm513_vm0, %v1495_v9 }
  0x1f   : > { %1427 = vmatmul.mubr.msk.bf16.gmra.mrb[4].mxu0 %vm513_vm0, %v1496_v10  ;;  %1443 = vmatmul.mubr.msk.bf16.gmra.mrb[4].mxu1 %vm513_vm0, %v1497_v11 }
  0x20   : > { %1430 = vmatprep.mubr.msk.bf16.mxu0 %vm513_vm0, %v1498_v12  ;;  %1446 = vmatprep.mubr.msk.bf16.mxu1 %vm513_vm0, %v1499_v13 }
  0x27   : > { %1431 = vmatmul.mubr.msk.bf16.gmra.mrb[8].mxu0 %vm513_vm0, %v1500_v14  ;;  %1447 = vmatmul.mubr.msk.bf16.gmra.mrb[8].mxu1 %vm513_vm0, %v1501_v15 }
  0x28   : > { %1434 = vmatprep.mubr.msk.bf16.mxu0 %vm513_vm0, %v1502_v16  ;;  %1450 = vmatprep.mubr.msk.bf16.mxu1 %vm513_vm0, %v1503_v17 }
  0x2f   : > { %1435 = vmatmul.mubr.msk.bf16.gmra.mrb[12].mxu0 %vm513_vm0, %v1504_v18  ;;  %1451 = vmatmul.mubr.msk.bf16.gmra.mrb[12].mxu1 %vm513_vm0, %v1505_v19 }
  0xea   : > { %v1424_v21 = vpop.f32.mrb[0].mxu0  ;;  %v1440_v22 = vpop.f32.mrb[0].mxu1 }
  0xeb   : > { %v831_v23 = vmul.f32 %v1424_v21, %v1630_v20  ;;  %v847_v24 = vmul.f32 %v1440_v22, %v1630_v20  ;;  %v596_v25 = vpop.f32.mrb[1].mxu0  ;;  %v660_v26 = vpop.f32.mrb[1].mxu1 }
  0xec   : > { %v829_v28 = vmul.f32 %v1630_v20, %v596_v25  ;;  %v845_v29 = vmul.f32 %v1630_v20, %v660_v26  ;;  %v1425_v30 = vpop.f32.mrb[2].mxu0  ;;  %v1441_v31 = vpop.f32.mrb[2].mxu1 }
  0xed   : > { %v832_v32 = vmul.f32 %v1425_v30, %v1630_v20  ;;  %v848_v33 = vmul.f32 %v1441_v31, %v1630_v20  ;;  %v599_v34 = vpop.f32.mrb[3].mxu0  ;;  %v663_v35 = vpop.f32.mrb[3].mxu1  ;;  %v870_v38 = vadd.f32 %v1637_v27, %v831_v23  ;;  %v886_v39 = vadd.f32 %v1637_v27, %v847_v24 }
  0xee   : > { %v830_v36 = vmul.f32 %v1630_v20, %v599_v34  ;;  %v846_v37 = vmul.f32 %v1630_v20, %v663_v35  ;;  %v868_v42 = vadd.f32 %v1637_v27, %v829_v28  ;;  %v884_v43 = vadd.f32 %v1637_v27, %v845_v29 }
  0xef   : > { %v871_v40 = vadd.f32 %v1637_v27, %v832_v32  ;;  %v887_v41 = vadd.f32 %v1637_v27, %v848_v33 }
  0xf0   : > { %v869_v44 = vadd.f32 %v1637_v27, %v830_v36  ;;  %v885_v45 = vadd.f32 %v1637_v27, %v846_v37 }
  0xf1   : > { %v1307_v46 = vpack.c.bf16 %v871_v40, %v870_v38  ;;  %v1347_v47 = vpack.c.bf16 %v887_v41, %v886_v39 }
  0xf2   : > { %v1302_v48 = vpack.c.bf16 %v869_v44, %v868_v42  ;;  %v1342_v49 = vpack.c.bf16 %v885_v45, %v884_v43  ;;  %v1428_v50 = vpop.f32.mrb[4].mxu0  ;;  %v1444_v51 = vpop.f32.mrb[4].mxu1 }
  0xf3   : > { %1379 = vst [vmem:[%s1656_s12 + $0x8] sm:$0xff] %v1307_v46   ;;  %1387 = vst [vmem:[%s1656_s12 + $0x48] sm:$0xff] %v1347_v47   ;;  %v835_v52 = vmul.f32 %v1428_v50, %v1630_v20  ;;  %v851_v53 = vmul.f32 %v1444_v51, %v1630_v20  ;;  %v612_v54 = vpop.f32.mrb[5].mxu0  ;;  %v676_v55 = vpop.f32.mrb[5].mxu1 }
  0xf4   : > { %1303 = vst [vmem:[%s1656_s12] sm:$0xff] %v1302_v48   ;;  %1386 = vst [vmem:[%s1656_s12 + $0x40] sm:$0xff] %v1342_v49   ;;  %v833_v56 = vmul.f32 %v1630_v20, %v612_v54  ;;  %v849_v57 = vmul.f32 %v1630_v20, %v676_v55  ;;  %v1429_v58 = vpop.f32.mrb[6].mxu0  ;;  %v1445_v59 = vpop.f32.mrb[6].mxu1 }
  0xf5   : > { %v836_v60 = vmul.f32 %v1429_v58, %v1630_v20  ;;  %v852_v61 = vmul.f32 %v1445_v59, %v1630_v20  ;;  %v615_v62 = vpop.f32.mrb[7].mxu0  ;;  %v679_v63 = vpop.f32.mrb[7].mxu1  ;;  %v874_v2 = vadd.f32 %v1637_v27, %v835_v52  ;;  %v890_v3 = vadd.f32 %v1637_v27, %v851_v53 }
  0xf6   : > { %v834_v0 = vmul.f32 %v1630_v20, %v615_v62  ;;  %v850_v1 = vmul.f32 %v1630_v20, %v679_v63  ;;  %v872_v6 = vadd.f32 %v1637_v27, %v833_v56  ;;  %v888_v7 = vadd.f32 %v1637_v27, %v849_v57 }
  0xf7   : > { %v875_v4 = vadd.f32 %v1637_v27, %v836_v60  ;;  %v891_v5 = vadd.f32 %v1637_v27, %v852_v61 }
  0xf8   : > { %v873_v8 = vadd.f32 %v1637_v27, %v834_v0  ;;  %v889_v9 = vadd.f32 %v1637_v27, %v850_v1 }
  0xf9   : > { %v1317_v10 = vpack.c.bf16 %v875_v4, %v874_v2  ;;  %v1357_v11 = vpack.c.bf16 %v891_v5, %v890_v3 }
  0xfa   : > { %v1312_v12 = vpack.c.bf16 %v873_v8, %v872_v6  ;;  %v1352_v13 = vpack.c.bf16 %v889_v9, %v888_v7  ;;  %v1432_v14 = vpop.f32.mrb[8].mxu0  ;;  %v1448_v15 = vpop.f32.mrb[8].mxu1 }
  0xfb   : > { %1381 = vst [vmem:[%s1656_s12 + $0x18] sm:$0xff] %v1317_v10   ;;  %1389 = vst [vmem:[%s1656_s12 + $0x58] sm:$0xff] %v1357_v11   ;;  %v839_v16 = vmul.f32 %v1432_v14, %v1630_v20  ;;  %v855_v17 = vmul.f32 %v1448_v15, %v1630_v20  ;;  %v628_v18 = vpop.f32.mrb[9].mxu0  ;;  %v692_v19 = vpop.f32.mrb[9].mxu1 }
  0xfc   : > { %1380 = vst [vmem:[%s1656_s12 + $0x10] sm:$0xff] %v1312_v12   ;;  %1388 = vst [vmem:[%s1656_s12 + $0x50] sm:$0xff] %v1352_v13   ;;  %v837_v21 = vmul.f32 %v1630_v20, %v628_v18  ;;  %v853_v22 = vmul.f32 %v1630_v20, %v692_v19  ;;  %v1433_v23 = vpop.f32.mrb[10].mxu0  ;;  %v1449_v24 = vpop.f32.mrb[10].mxu1 }
  0xfd   : > { %v840_v25 = vmul.f32 %v1433_v23, %v1630_v20  ;;  %v856_v26 = vmul.f32 %v1449_v24, %v1630_v20  ;;  %v631_v28 = vpop.f32.mrb[11].mxu0  ;;  %v695_v29 = vpop.f32.mrb[11].mxu1  ;;  %v878_v32 = vadd.f32 %v1637_v27, %v839_v16  ;;  %v894_v33 = vadd.f32 %v1637_v27, %v855_v17 }
  0xfe   : > { %v838_v30 = vmul.f32 %v1630_v20, %v631_v28  ;;  %v854_v31 = vmul.f32 %v1630_v20, %v695_v29  ;;  %v876_v36 = vadd.f32 %v1637_v27, %v837_v21  ;;  %v892_v37 = vadd.f32 %v1637_v27, %v853_v22 }
  0xff   : > { %v879_v34 = vadd.f32 %v1637_v27, %v840_v25  ;;  %v895_v35 = vadd.f32 %v1637_v27, %v856_v26 }
 0x100   : > { %v877_v38 = vadd.f32 %v1637_v27, %v838_v30  ;;  %v893_v39 = vadd.f32 %v1637_v27, %v854_v31 }
 0x101   : > { %v1327_v40 = vpack.c.bf16 %v879_v34, %v878_v32  ;;  %v1367_v41 = vpack.c.bf16 %v895_v35, %v894_v33 }
 0x102   : > { %v1322_v42 = vpack.c.bf16 %v877_v38, %v876_v36  ;;  %v1362_v43 = vpack.c.bf16 %v893_v39, %v892_v37  ;;  %v1436_v44 = vpop.f32.mrb[12].mxu0  ;;  %v1452_v45 = vpop.f32.mrb[12].mxu1 }
 0x103   : > { %1383 = vst [vmem:[%s1656_s12 + $0x28] sm:$0xff] %v1327_v40   ;;  %1391 = vst [vmem:[%s1656_s12 + $0x68] sm:$0xff] %v1367_v41   ;;  %v843_v46 = vmul.f32 %v1436_v44, %v1630_v20  ;;  %v859_v47 = vmul.f32 %v1452_v45, %v1630_v20  ;;  %v644_v48 = vpop.f32.mrb[13].mxu0  ;;  %v708_v49 = vpop.f32.mrb[13].mxu1 }
 0x104   : > { %1382 = vst [vmem:[%s1656_s12 + $0x20] sm:$0xff] %v1322_v42   ;;  %1390 = vst [vmem:[%s1656_s12 + $0x60] sm:$0xff] %v1362_v43   ;;  %v841_v50 = vmul.f32 %v1630_v20, %v644_v48  ;;  %v857_v51 = vmul.f32 %v1630_v20, %v708_v49  ;;  %v1437_v52 = vpop.f32.mrb[14].mxu0  ;;  %v1453_v53 = vpop.f32.mrb[14].mxu1 }
 0x105   : > { %v844_v54 = vmul.f32 %v1437_v52, %v1630_v20  ;;  %v860_v55 = vmul.f32 %v1453_v53, %v1630_v20  ;;  %v647_v56 = vpop.f32.mrb[15].mxu0  ;;  %v711_v57 = vpop.f32.mrb[15].mxu1  ;;  %v882_v60 = vadd.f32 %v1637_v27, %v843_v46  ;;  %v898_v61 = vadd.f32 %v1637_v27, %v859_v47 }
 0x106   : > { %v842_v58 = vmul.f32 %v1630_v20, %v647_v56  ;;  %v858_v59 = vmul.f32 %v1630_v20, %v711_v57  ;;  %v880_v0 = vadd.f32 %v1637_v27, %v841_v50  ;;  %v896_v1 = vadd.f32 %v1637_v27, %v857_v51 }
 0x107   : > { %v883_v62 = vadd.f32 %v1637_v27, %v844_v54  ;;  %v899_v63 = vadd.f32 %v1637_v27, %v860_v55 }
 0x108   : > { %v881_v2 = vadd.f32 %v1637_v27, %v842_v58  ;;  %v897_v3 = vadd.f32 %v1637_v27, %v858_v59 }
 0x109   : > { %v1337_v4 = vpack.c.bf16 %v883_v62, %v882_v60  ;;  %v1377_v5 = vpack.c.bf16 %v899_v63, %v898_v61 }
 0x10a   : > { %v1332_v20 = vpack.c.bf16 %v881_v2, %v880_v0  ;;  %v1372_v6 = vpack.c.bf16 %v897_v3, %v896_v1 }
 0x10b   : > { %1385 = vst [vmem:[%s1656_s12 + $0x38] sm:$0xff] %v1337_v4   ;;  %1393 = vst [vmem:[%s1656_s12 + $0x78] sm:$0xff] %v1377_v5  }
 0x10c   : > { %1384 = vst [vmem:[%s1656_s12 + $0x30] sm:$0xff] %v1332_v20   ;;  %1392 = vst [vmem:[%s1656_s12 + $0x70] sm:$0xff] %v1372_v6  }
 0x10d PF: > { %s14_s17 = sadd.s32 1, %s1528_s17   ;;  %s1738_s15 = smov %s1524_s16 }
 0x10e   : > { %p11_p5 = scmp.ge.s32.totalorder %s14_s17, 4   ;;  %s1739_s16 = smov %s1741_s18 }
 0x110   :  { %13 = sbr.rel (!%p11_p5) target bundleno = 2 (0x2), region = 83 }

// kernel: bottleneck_forward.7
= control target key start
LH: loop header
LB: loop body
LE: loop exit
PB: predicated region body
PF: predicated region fallthrough
CT: control target
= control target key end

     0   :  { %10 = vsyncpa [#allocation4], 0  ;;  %s2049_s0 = inlined_call_operand.vmem [shape: bf16[512,32], index: 0, kind: input, shape index: {}]   ;;  %s2050_s1 = inlined_call_operand.vmem [shape: bf16[32,128], index: 1, kind: input, shape index: {}]   ;;  %s2051_s2 = inlined_call_operand.vmem [shape: f32[1,128], index: 2, kind: input, shape index: {}]   ;;  %s2052_s3 = inlined_call_operand.vmem [shape: f32[1,128], index: 3, kind: input, shape index: {}]   ;;  %s2053_s4 = inlined_call_operand.vmem [shape: bf16[512,128], index: 4, kind: input, shape index: {}]   ;;  %s2054_s5 = inlined_call_operand.hbm [shape: f32[512,128], index: 5, kind: output, shape index: {}]  }
   0x1   :  { %12 = vsyncpa [#allocation4 + $0x1], 0  ;;  %s1626_s18 = smov 0   ;;  %s1628_s19 = smov 0  }
   0x2   :  { %s1630_s20 = smov 0   ;;  %s1632_s21 = smov 0  }
   0x3   :  { %s1634_s22 = smov 0   ;;  %s1636_s23 = smov 0  }
   0x4 LB: > { %s1246_s24 = sadd.s32 4294967295, %s1591_s23   ;;  %s1247_s25 = sadd.s32 4294967294, %s1591_s23   ;;  %s1591_s23 = sphi %s1636_s23, %s18_s23   ;;  %s1587_s22 = sphi %s1634_s22, %s2064_s22   ;;  %s1583_s21 = sphi %s1632_s21, %s2063_s21   ;;  %s1579_s20 = sphi %s1630_s20, %s2062_s20   ;;  %s1575_s19 = sphi %s1628_s19, %s2061_s19   ;;  %s1571_s18 = sphi %s1626_s18, %s2060_s18  }
   0x5   : > { %s37_s26 = sadd.s32 1, %s1587_s22  ;;  %s182_s27 = sadd.s32 1, %s1579_s20 }
   0x6   : > { %p39_p0 = scmp.ge.s32.totalorder %s37_s26, 2  ;;  %p192_p1 = scmp.ne.s32.totalorder %s1579_s20, %s1575_s19 }
   0x7   : > { %p193_p2 = scmp.eq.s32.totalorder %s1246_s24, 1  ;;  %p198_p3 = scmp.ne.s32.totalorder %s1575_s19, %s1571_s18 }
   0x8   : > { %s2066_s26 = smov (%p39_p0, %s37_s26), 0  ;;  %p199_p5 = scmp.eq.s32.totalorder %s1247_s25, 1 }
   0x9   : > { %p1666_p4 = por %p193_p2, %p192_p1  ;;  %s177_s29 = ssub.s32 %s1587_s22, %s2066_s26 }
   0xa   : > { %p1253_p6 = scmp.ge.s32.totalorder %s1591_s23, 1  ;;  %p180_p7 = scmp.eq.s32.totalorder %s177_s29, 0 }
   0xb   : > { %p1673_p8 = por %p199_p5, %p198_p3  ;;  %p265_p9 = scmp.lt.s32.totalorder %s1591_s23, 3 }
   0xc   : > { %s1679_s6 = scalar_select %p180_p7, %s1579_s20, %s182_s27  }
   0xd   : > { %p266_p10 = pnand %p1253_p6, %p265_p9 }
   0xe   : > { %v1495_v0 = vld [vmem:[%s2050_s1] sm:$0xff] (!%p266_p10)   ;;  %s1255_s9 = sshll.u32 (!%p266_p10), %s1583_s21, 5  ;;  %v1496_v1 = vld [vmem:[%s2050_s1 + $0x8] sm:$0xff] (!%p266_p10)   ;;  %vm549_vm0 = vcmask (!%p266_p10), 261120   ;;  %s315_s29 = sand.u32 (!%p266_p10), 1, %s1575_s19  }
   0xf   : > { %269 = sbr.rel (%p266_p10) target bundleno = 292 (0x124), region = 40  ;;  %p319_p11 = scmp.lt.s32.totalorder (!%p266_p10), %s1255_s9, 63  ;;  %1398 = vmatprep.subr.bf16.mxu0 (!%p266_p10), %v1495_v0  ;;  %1434 = vmatprep.subr.bf16.mxu1 (!%p266_p10), %v1495_v0  ;;  %v1796_v46 = vld [vmem:[%s2051_s2] ss:$0 sm:$0xff] (!%p266_p10) }
  0x10   : > { %1399 = vmatpush3.bf16.msra.mxu0 (!%p266_p10), %v1495_v0  ;;  %1436 = vmatpush3.bf16.msra.mxu1 (!%p266_p10), %v1495_v0  ;;  %v1816_v58 = vld [vmem:[%s2052_s3] ss:$0 sm:$0xff] (!%p266_p10)  ;;  %s1300_s11 = sshll.u32 (!%p266_p10), %s1583_s21, 12  ;;  %s1593_s17 = smov (!%p266_p10), [#allocation3]  }
  0x11   : > { %1400 = vmatprep.subr.bf16.mxu0 (!%p266_p10), %v1496_v1  ;;  %1435 = vmatprep.subr.bf16.mxu1 (!%p266_p10), %v1496_v1  ;;  %s1992_s14 = scalar_lea.hbm (!%p266_p10), %s2054_s5, %s1300_s11 }
  0x14   : > { %1401 = vmatpush3.bf16.msra.mxu0 (!%p266_p10), %v1496_v1  ;;  %1437 = vmatpush3.bf16.msra.mxu1 (!%p266_p10), %v1496_v1 }
  0x16   : > { %s2068_s9 = smov (!%p319_p11, %s1255_s9), 63 }
  0x17   : > { %s1256_s12 = sshll.u32 %s2068_s9, 2  ;;  %s1254_s9 = sshll.u32 %s315_s29, 8 }
  0x18   : > { %s1696_s15 = scalar_lea.vmem %s2049_s0, %s1256_s12  ;;  %s1735_s24 = scalar_lea.vmem %s2053_s4, %s1256_s12 }
  0x19   : > { %v1497_v2 = vld [vmem:[%s1696_s15] sm:$0xff]   ;;  %v1499_v4 = vld [vmem:[%s1696_s15 + $0x8] sm:$0xff]   ;;  %v1501_v6 = vld [vmem:[%s1696_s15 + $0x10] sm:$0xff]   ;;  %s1860_s10 = scalar_lea.vmem [#allocation3], %s1254_s9 }
  0x1a   : > { %v1498_v3 = vld [vmem:[%s1696_s15 + $0x40] sm:$0xff]   ;;  %1402 = vmatprep.mubr.msk.bf16.mxu0 %vm549_vm0, %v1497_v2  ;;  %v1500_v5 = vld [vmem:[%s1696_s15 + $0x48] sm:$0xff]   ;;  %v1502_v7 = vld [vmem:[%s1696_s15 + $0x50] sm:$0xff]   ;;  %s1111_s12 = sshll.u32 %s1860_s10, 4  ;;  %s1994_s12 = int_to_ptr.vmem [resolvable:$true] %s1111_s12 }
  0x1b   : > { %1418 = vmatprep.mubr.msk.bf16.mxu1 %vm549_vm0, %v1498_v3  ;;  %1403 = vmatmul.mubr.msk.bf16.vlgmr.msra.gmra.mrb[0].mxu0 %vm549_vm0, %v1499_v4  ;;  %v1503_v8 = vld [vmem:[%s1696_s15 + $0x18] sm:$0xff]   ;;  %v1505_v10 = vld [vmem:[%s1696_s15 + $0x20] sm:$0xff]   ;;  %v1507_v12 = vld [vmem:[%s1696_s15 + $0x28] sm:$0xff]   ;;  %s1513_s16 = scalar_lea.vmem %s1994_s12, 4096 }
  0x1c   : > { %1419 = vmatmul.mubr.msk.bf16.vlgmr.msra.gmra.mrb[0].mxu1 %vm549_vm0, %v1500_v5  ;;  %1406 = vmatprep.mubr.msk.bf16.mxu0 %vm549_vm0, %v1501_v6  ;;  %v1504_v9 = vld [vmem:[%s1696_s15 + $0x58] sm:$0xff]   ;;  %v1506_v11 = vld [vmem:[%s1696_s15 + $0x60] sm:$0xff]   ;;  %v1508_v13 = vld [vmem:[%s1696_s15 + $0x68] sm:$0xff]   ;;  %p1514_p12 = scmp.ne.s32.totalorder %s1994_s12, %s1513_s16 }
  0x1d   : > { %1422 = vmatprep.mubr.msk.bf16.mxu1 %vm549_vm0, %v1502_v7  ;;  %v1509_v14 = vld [vmem:[%s1696_s15 + $0x30] sm:$0xff]   ;;  %v1511_v16 = vld [vmem:[%s1696_s15 + $0x38] sm:$0xff]   ;;  %v1738_v18 = vld [vmem:[%s1735_s24 + $0x8] sm:$0xff]  }
  0x1e   : > { %v1510_v15 = vld [vmem:[%s1696_s15 + $0x70] sm:$0xff]   ;;  %v1512_v17 = vld [vmem:[%s1696_s15 + $0x78] sm:$0xff]   ;;  %v1741_v19 = vld [vmem:[%s1735_s24 + $0x48] sm:$0xff]   ;;  %v1307_v24 = vunpack.c.l.bf16 %v1738_v18  ;;  %v1308_v30 = vunpack.c.h.bf16 %v1738_v18  ;;  %s2003_s15 = scalar_lea.sflag [#allocation4], %s315_s29  ;;  %p1515_p13 = pnand %p1514_p12, %p1666_p4 }
  0x1f   : > { %v1744_v20 = vld [vmem:[%s1735_s24] sm:$0xff]   ;;  %v1750_v22 = vld [vmem:[%s1735_s24 + $0x18] sm:$0xff]   ;;  %v1339_v25 = vunpack.c.l.bf16 %v1741_v19  ;;  %v1758_v26 = vld [vmem:[%s1735_s24 + $0x10] sm:$0xff]   ;;  %v1340_v31 = vunpack.c.h.bf16 %v1741_v19 }
  0x20   : > { %v1747_v21 = vld [vmem:[%s1735_s24 + $0x40] sm:$0xff]   ;;  %v1753_v23 = vld [vmem:[%s1735_s24 + $0x58] sm:$0xff]   ;;  %v1761_v27 = vld [vmem:[%s1735_s24 + $0x50] sm:$0xff]   ;;  %v1303_v28 = vunpack.c.l.bf16 %v1744_v20  ;;  %v1304_v34 = vunpack.c.h.bf16 %v1744_v20  ;;  %v1315_v36 = vunpack.c.l.bf16 %v1750_v22  ;;  %v1311_v40 = vunpack.c.l.bf16 %v1758_v26  ;;  %p1516_p0 = pneg %p1515_p13 }
  0x21   : > { %v1335_v29 = vunpack.c.l.bf16 %v1747_v21  ;;  %v1768_v32 = vld [vmem:[%s1735_s24 + $0x28] sm:$0xff]   ;;  %v1336_v35 = vunpack.c.h.bf16 %v1747_v21  ;;  %v1347_v37 = vunpack.c.l.bf16 %v1753_v23  ;;  %v1778_v38 = vld [vmem:[%s1735_s24 + $0x20] sm:$0xff]   ;;  %v1343_v41 = vunpack.c.l.bf16 %v1761_v27  ;;  %v1788_v44 = vld [vmem:[%s1735_s24 + $0x38] sm:$0xff]  }
  0x22   : > { %v1771_v33 = vld [vmem:[%s1735_s24 + $0x68] sm:$0xff]   ;;  %v1781_v39 = vld [vmem:[%s1735_s24 + $0x60] sm:$0xff]   ;;  %v1316_v42 = vunpack.c.h.bf16 %v1750_v22  ;;  %v1348_v43 = vunpack.c.h.bf16 %v1753_v23  ;;  %v1791_v45 = vld [vmem:[%s1735_s24 + $0x78] sm:$0xff]   ;;  %v1312_v47 = vunpack.c.h.bf16 %v1758_v26  ;;  %v1344_v48 = vunpack.c.h.bf16 %v1761_v27 }
  0x23   : > { %1407 = vmatmul.mubr.msk.bf16.gmra.mrb[4].mxu0 %vm549_vm0, %v1503_v8  ;;  %v1323_v49 = vunpack.c.l.bf16 %v1768_v32  ;;  %v1355_v50 = vunpack.c.l.bf16 %v1771_v33  ;;  %v1803_v51 = vld [vmem:[%s1735_s24 + $0x30] sm:$0xff]   ;;  %v1319_v53 = vunpack.c.l.bf16 %v1778_v38  ;;  %v1351_v54 = vunpack.c.l.bf16 %v1781_v39 }
  0x24   : > { %1423 = vmatmul.mubr.msk.bf16.gmra.mrb[4].mxu1 %vm549_vm0, %v1504_v9  ;;  %1410 = vmatprep.mubr.msk.bf16.mxu0 %vm549_vm0, %v1505_v10  ;;  %v1806_v52 = vld [vmem:[%s1735_s24 + $0x70] sm:$0xff]   ;;  %v1324_v55 = vunpack.c.h.bf16 %v1768_v32  ;;  %v1356_v56 = vunpack.c.h.bf16 %v1771_v33  ;;  %v1320_v59 = vunpack.c.h.bf16 %v1778_v38  ;;  %v1352_v60 = vunpack.c.h.bf16 %v1781_v39  ;;  %s1517_s24 = sshll.u32 %s1593_s17, 4  ;;  %s1518_s24 = int_to_ptr.vmem [resolvable:$false] %s1517_s24 }
  0x25   : > { %1426 = vmatprep.mubr.msk.bf16.mxu1 %vm549_vm0, %v1506_v11  ;;  %v1331_v61 = vunpack.c.l.bf16 %v1788_v44  ;;  %v1363_v62 = vunpack.c.l.bf16 %v1791_v45  ;;  %v1327_v2 = vunpack.c.l.bf16 %v1803_v51  ;;  %v1359_v3 = vunpack.c.l.bf16 %v1806_v52  ;;  %s1519_s25 = scalar_lea.vmem %s1518_s24, 8192  ;;  %p1520_p1 = scmp.lt.s32.totalorder %s1994_s12, %s1518_s24 }
  0x26   : > { %v1332_v4 = vunpack.c.h.bf16 %v1788_v44  ;;  %p1521_p2 = scmp.lt.s32.totalorder %s1519_s25, %s1513_s16 }
  0x28   : > { %p1522_p3 = por %p1521_p2, %p1520_p1 }
  0x2a   : > { %p1523_p5 = pnand %p1522_p3, %p1516_p0 }
  0x2b   : > { %1411 = vmatmul.mubr.msk.bf16.gmra.mrb[8].mxu0 %vm549_vm0, %v1507_v12 }
  0x2c   : > { %1427 = vmatmul.mubr.msk.bf16.gmra.mrb[8].mxu1 %vm549_vm0, %v1508_v13  ;;  %1414 = vmatprep.mubr.msk.bf16.mxu0 %vm549_vm0, %v1509_v14 }
  0x2d   : > { %1430 = vmatprep.mubr.msk.bf16.mxu1 %vm549_vm0, %v1510_v15 }
  0x33   : > { %1415 = vmatmul.mubr.msk.bf16.gmra.mrb[12].mxu0 %vm549_vm0, %v1511_v16 }
  0x34   : > { %1431 = vmatmul.mubr.msk.bf16.gmra.mrb[12].mxu1 %vm549_vm0, %v1512_v17 }
  0xee   : > { %v1404_v57 = vpop.f32.mrb[0].mxu0 }
  0xef   : > { %v867_v63 = vmul.f32 %v1404_v57, %v1796_v46  ;;  %v1420_v0 = vpop.f32.mrb[0].mxu1  ;;  %v632_v1 = vpop.f32.mrb[1].mxu0 }
  0xf0   : > { %v883_v5 = vmul.f32 %v1420_v0, %v1796_v46  ;;  %v865_v6 = vmul.f32 %v1796_v46, %v632_v1  ;;  %v696_v7 = vpop.f32.mrb[1].mxu1  ;;  %v1405_v8 = vpop.f32.mrb[2].mxu0 }
  0xf1   : > { %v906_v11 = vadd.f32 %v1816_v58, %v867_v63  ;;  %v881_v12 = vmul.f32 %v1796_v46, %v696_v7  ;;  %v868_v13 = vmul.f32 %v1405_v8, %v1796_v46  ;;  %v1421_v14 = vpop.f32.mrb[2].mxu1  ;;  %v635_v15 = vpop.f32.mrb[3].mxu0 }
  0xf2   : > { %v922_v17 = vadd.f32 %v1816_v58, %v883_v5  ;;  %v904_v57 = vadd.f32 %v1816_v58, %v865_v6  ;;  %v884_v0 = vmul.f32 %v1421_v14, %v1796_v46  ;;  %v866_v1 = vmul.f32 %v1796_v46, %v635_v15  ;;  %v699_v10 = vpop.f32.mrb[3].mxu1 }
  0xf3   : > { %v1002_v63 = vadd.f32 %v1307_v24, %v906_v11  ;;  %v920_v7 = vadd.f32 %v1816_v58, %v881_v12  ;;  %v907_v8 = vadd.f32 %v1816_v58, %v868_v13  ;;  %v882_v9 = vmul.f32 %v1796_v46, %v699_v10 }
  0xf4   : > { %v1018_v16 = vadd.f32 %v1339_v25, %v922_v17  ;;  %v1000_v5 = vadd.f32 %v1303_v28, %v904_v57  ;;  %v923_v6 = vadd.f32 %v1816_v58, %v884_v0  ;;  %v905_v14 = vadd.f32 %v1816_v58, %v866_v1 }
  0xf5   : > { %v1034_v15 = vmax.f32 %v1002_v63, 0.0  ;;  %v1016_v24 = vadd.f32 %v1335_v29, %v920_v7  ;;  %v1003_v11 = vadd.f32 %v1308_v30, %v907_v8  ;;  %v921_v12 = vadd.f32 %v1816_v58, %v882_v9 }
  0xf6   : > { %v1050_v10 = vmax.f32 %v1018_v16, 0.0  ;;  %v1032_v13 = vmax.f32 %v1000_v5, 0.0  ;;  %v1019_v25 = vadd.f32 %v1340_v31, %v923_v6  ;;  %v1001_v28 = vadd.f32 %v1304_v34, %v905_v14  ;;  %v1408_v17 = vpop.f32.mrb[4].mxu0 }
  0xf7   : > { %1066 = vst [vmem:[%s1860_s10 + $0x10] sm:$0xff] %v1034_v15  ;;  %v1048_v18 = vmax.f32 %v1016_v24, 0.0  ;;  %v1035_v29 = vmax.f32 %v1003_v11, 0.0  ;;  %v1017_v30 = vadd.f32 %v1336_v35, %v921_v12  ;;  %v871_v19 = vmul.f32 %v1408_v17, %v1796_v46  ;;  %v1424_v31 = vpop.f32.mrb[4].mxu1  ;;  %v648_v9 = vpop.f32.mrb[5].mxu0 }
  0xf8   : > { %1082 = vst [vmem:[%s1860_s10 + $0x90] sm:$0xff] %v1050_v10  ;;  %1064 = vst [vmem:[%s1860_s10] sm:$0xff] %v1032_v13  ;;  %v1051_v20 = vmax.f32 %v1019_v25, 0.0  ;;  %v1033_v34 = vmax.f32 %v1001_v28, 0.0  ;;  %v887_v16 = vmul.f32 %v1424_v31, %v1796_v46  ;;  %v869_v57 = vmul.f32 %v1796_v46, %v648_v9  ;;  %v712_v0 = vpop.f32.mrb[5].mxu1  ;;  %v1409_v1 = vpop.f32.mrb[6].mxu0 }
  0xf9   : > { %1080 = vst [vmem:[%s1860_s10 + $0x80] sm:$0xff] %v1048_v18  ;;  %1067 = vst [vmem:[%s1860_s10 + $0x18] sm:$0xff] %v1035_v29  ;;  %v1049_v21 = vmax.f32 %v1017_v30, 0.0  ;;  %v910_v35 = vadd.f32 %v1816_v58, %v871_v19  ;;  %v885_v63 = vmul.f32 %v1796_v46, %v712_v0  ;;  %v872_v7 = vmul.f32 %v1409_v1, %v1796_v46  ;;  %v1425_v8 = vpop.f32.mrb[6].mxu1  ;;  %v651_v5 = vpop.f32.mrb[7].mxu0 }
  0xfa   : > { %1083 = vst [vmem:[%s1860_s10 + $0x98] sm:$0xff] %v1051_v20  ;;  %1065 = vst [vmem:[%s1860_s10 + $0x8] sm:$0xff] %v1033_v34  ;;  %v926_v6 = vadd.f32 %v1816_v58, %v887_v16  ;;  %v908_v14 = vadd.f32 %v1816_v58, %v869_v57  ;;  %v888_v15 = vmul.f32 %v1425_v8, %v1796_v46  ;;  %v715_v11 = vpop.f32.mrb[7].mxu1 }
  0xfb   : > { %v870_v24 = vmul.f32 %v1796_v46, %v651_v5  ;;  %1081 = vst [vmem:[%s1860_s10 + $0x88] sm:$0xff] %v1049_v21  ;;  %v1006_v12 = vadd.f32 %v1315_v36, %v910_v35  ;;  %v924_v10 = vadd.f32 %v1816_v58, %v885_v63  ;;  %v911_v13 = vadd.f32 %v1816_v58, %v872_v7 }
  0xfc   : > { %v886_v25 = vmul.f32 %v1796_v46, %v715_v11  ;;  %v1022_v28 = vadd.f32 %v1347_v37, %v926_v6  ;;  %v1004_v17 = vadd.f32 %v1311_v40, %v908_v14  ;;  %v927_v18 = vadd.f32 %v1816_v58, %v888_v15 }
  0xfd   : > { %v909_v29 = vadd.f32 %v1816_v58, %v870_v24  ;;  %v1038_v30 = vmax.f32 %v1006_v12, 0.0  ;;  %v1020_v36 = vadd.f32 %v1343_v41, %v924_v10  ;;  %v1007_v19 = vadd.f32 %v1316_v42, %v911_v13 }
  0xfe   : > { %v925_v31 = vadd.f32 %v1816_v58, %v886_v25  ;;  %v1054_v9 = vmax.f32 %v1022_v28, 0.0  ;;  %v1036_v37 = vmax.f32 %v1004_v17, 0.0  ;;  %v1023_v40 = vadd.f32 %v1348_v43, %v927_v18  ;;  %v1412_v34 = vpop.f32.mrb[8].mxu0 }
  0xff   : > { %v1005_v20 = vadd.f32 %v1312_v47, %v909_v29  ;;  %1070 = vst [vmem:[%s1860_s10 + $0x30] sm:$0xff] %v1038_v30  ;;  %v1052_v16 = vmax.f32 %v1020_v36, 0.0  ;;  %v1039_v41 = vmax.f32 %v1007_v19, 0.0  ;;  %v875_v42 = vmul.f32 %v1412_v34, %v1796_v46  ;;  %v1428_v57 = vpop.f32.mrb[8].mxu1  ;;  %v664_v0 = vpop.f32.mrb[9].mxu0 }
 0x100   : > { %v1021_v22 = vadd.f32 %v1344_v48, %v925_v31  ;;  %1086 = vst [vmem:[%s1860_s10 + $0xb0] sm:$0xff] %v1054_v9  ;;  %1068 = vst [vmem:[%s1860_s10 + $0x20] sm:$0xff] %v1036_v37  ;;  %v1055_v23 = vmax.f32 %v1023_v40, 0.0  ;;  %v891_v43 = vmul.f32 %v1428_v57, %v1796_v46  ;;  %v873_v47 = vmul.f32 %v1796_v46, %v664_v0  ;;  %v728_v1 = vpop.f32.mrb[9].mxu1  ;;  %v1413_v21 = vpop.f32.mrb[10].mxu0 }
 0x101   : > { %v1037_v26 = vmax.f32 %v1005_v20, 0.0  ;;  %1084 = vst [vmem:[%s1860_s10 + $0xa0] sm:$0xff] %v1052_v16  ;;  %1071 = vst [vmem:[%s1860_s10 + $0x38] sm:$0xff] %v1039_v41  ;;  %v914_v48 = vadd.f32 %v1816_v58, %v875_v42  ;;  %v889_v35 = vmul.f32 %v1796_v46, %v728_v1  ;;  %v876_v63 = vmul.f32 %v1413_v21, %v1796_v46  ;;  %v1429_v7 = vpop.f32.mrb[10].mxu1  ;;  %v667_v8 = vpop.f32.mrb[11].mxu0 }
 0x102   : > { %v1053_v27 = vmax.f32 %v1021_v22, 0.0  ;;  %1087 = vst [vmem:[%s1860_s10 + $0xb8] sm:$0xff] %v1055_v23  ;;  %v930_v5 = vadd.f32 %v1816_v58, %v891_v43  ;;  %v912_v6 = vadd.f32 %v1816_v58, %v873_v47  ;;  %v892_v14 = vmul.f32 %v1429_v7, %v1796_v46  ;;  %v731_v24 = vpop.f32.mrb[11].mxu1 }
 0x103   : > { %1069 = vst [vmem:[%s1860_s10 + $0x28] sm:$0xff] %v1037_v26  ;;  %v874_v15 = vmul.f32 %v1796_v46, %v667_v8  ;;  %v1010_v11 = vadd.f32 %v1323_v49, %v914_v48  ;;  %v928_v12 = vadd.f32 %v1816_v58, %v889_v35  ;;  %v915_v10 = vadd.f32 %v1816_v58, %v876_v63 }
 0x104   : > { %1085 = vst [vmem:[%s1860_s10 + $0xa8] sm:$0xff] %v1053_v27  ;;  %v890_v13 = vmul.f32 %v1796_v46, %v731_v24  ;;  %v1026_v25 = vadd.f32 %v1355_v50, %v930_v5  ;;  %v1008_v28 = vadd.f32 %v1319_v53, %v912_v6  ;;  %v931_v17 = vadd.f32 %v1816_v58, %v892_v14 }
 0x105   : > { %v913_v18 = vadd.f32 %v1816_v58, %v874_v15  ;;  %v1042_v29 = vmax.f32 %v1010_v11, 0.0  ;;  %v1024_v49 = vadd.f32 %v1351_v54, %v928_v12  ;;  %v1011_v30 = vadd.f32 %v1324_v55, %v915_v10 }
 0x106   : > { %v929_v36 = vadd.f32 %v1816_v58, %v890_v13  ;;  %v1058_v19 = vmax.f32 %v1026_v25, 0.0  ;;  %v1040_v50 = vmax.f32 %v1008_v28, 0.0  ;;  %v1027_v53 = vadd.f32 %v1356_v56, %v931_v17  ;;  %v1416_v9 = vpop.f32.mrb[12].mxu0 }
 0x107   : > { %v1009_v31 = vadd.f32 %v1320_v59, %v913_v18  ;;  %1074 = vst [vmem:[%s1860_s10 + $0x50] sm:$0xff] %v1042_v29  ;;  %v1056_v37 = vmax.f32 %v1024_v49, 0.0  ;;  %v1043_v54 = vmax.f32 %v1011_v30, 0.0  ;;  %v879_v55 = vmul.f32 %v1416_v9, %v1796_v46  ;;  %v1432_v40 = vpop.f32.mrb[12].mxu1  ;;  %v680_v20 = vpop.f32.mrb[13].mxu0 }
 0x108   : > { %v1025_v32 = vadd.f32 %v1352_v60, %v929_v36  ;;  %1090 = vst [vmem:[%s1860_s10 + $0xd0] sm:$0xff] %v1058_v19  ;;  %1072 = vst [vmem:[%s1860_s10 + $0x40] sm:$0xff] %v1040_v50  ;;  %v1059_v33 = vmax.f32 %v1027_v53, 0.0  ;;  %v895_v56 = vmul.f32 %v1432_v40, %v1796_v46  ;;  %v877_v59 = vmul.f32 %v1796_v46, %v680_v20  ;;  %v744_v34 = vpop.f32.mrb[13].mxu1  ;;  %v1417_v16 = vpop.f32.mrb[14].mxu0 }
 0x109   : > { %v1041_v38 = vmax.f32 %v1009_v31, 0.0  ;;  %1088 = vst [vmem:[%s1860_s10 + $0xc0] sm:$0xff] %v1056_v37  ;;  %1075 = vst [vmem:[%s1860_s10 + $0x58] sm:$0xff] %v1043_v54  ;;  %v918_v60 = vadd.f32 %v1816_v58, %v879_v55  ;;  %v893_v41 = vmul.f32 %v1796_v46, %v744_v34  ;;  %v880_v22 = vmul.f32 %v1417_v16, %v1796_v46  ;;  %v1433_v42 = vpop.f32.mrb[14].mxu1  ;;  %v683_v57 = vpop.f32.mrb[15].mxu0 }
 0x10a   : > { %v1057_v39 = vmax.f32 %v1025_v32, 0.0  ;;  %1091 = vst [vmem:[%s1860_s10 + $0xd8] sm:$0xff] %v1059_v33  ;;  %v934_v0 = vadd.f32 %v1816_v58, %v895_v56  ;;  %v916_v23 = vadd.f32 %v1816_v58, %v877_v59  ;;  %v896_v26 = vmul.f32 %v1433_v42, %v1796_v46  ;;  %v747_v47 = vpop.f32.mrb[15].mxu1 }
 0x10b   : > { %1073 = vst [vmem:[%s1860_s10 + $0x48] sm:$0xff] %v1041_v38  ;;  %v878_v43 = vmul.f32 %v1796_v46, %v683_v57  ;;  %v1014_v1 = vadd.f32 %v1331_v61, %v918_v60  ;;  %v932_v21 = vadd.f32 %v1816_v58, %v893_v41  ;;  %v919_v27 = vadd.f32 %v1816_v58, %v880_v22 }
 0x10c   : > { %1089 = vst [vmem:[%s1860_s10 + $0xc8] sm:$0xff] %v1057_v39  ;;  %v894_v48 = vmul.f32 %v1796_v46, %v747_v47  ;;  %v1030_v35 = vadd.f32 %v1363_v62, %v934_v0  ;;  %v1012_v63 = vadd.f32 %v1327_v2, %v916_v23  ;;  %v935_v7 = vadd.f32 %v1816_v58, %v896_v26 }
 0x10d   : > { %v917_v8 = vadd.f32 %v1816_v58, %v878_v43  ;;  %v1046_v61 = vmax.f32 %v1014_v1, 0.0  ;;  %v1028_v5 = vadd.f32 %v1359_v3, %v932_v21  ;;  %v1015_v6 = vadd.f32 %v1332_v4, %v919_v27 }
 0x10e   : > { %v933_v46 = vadd.f32 %v1816_v58, %v894_v48  ;;  %v1062_v62 = vmax.f32 %v1030_v35, 0.0  ;;  %v1044_v2 = vmax.f32 %v1012_v63, 0.0  ;;  %v2057_v14 = vunpack.c.h.bf16 %v1791_v45 }
 0x10f   : > { %v2058_v24 = vunpack.c.h.bf16 %v1803_v51  ;;  %1078 = vst [vmem:[%s1860_s10 + $0x70] sm:$0xff] %v1046_v61  ;;  %v1060_v44 = vmax.f32 %v1028_v5, 0.0  ;;  %v1047_v3 = vmax.f32 %v1015_v6, 0.0  ;;  %v2059_v58 = vunpack.c.h.bf16 %v1806_v52 }
 0x110   : > { %v1031_v15 = vadd.f32 %v2057_v14, %v935_v7  ;;  %1094 = vst [vmem:[%s1860_s10 + $0xf0] sm:$0xff] %v1062_v62  ;;  %1076 = vst [vmem:[%s1860_s10 + $0x60] sm:$0xff] %v1044_v2 }
 0x111   : > { %v1013_v11 = vadd.f32 %v2058_v24, %v917_v8  ;;  %v1029_v4 = vadd.f32 %v2059_v58, %v933_v46  ;;  %1092 = vst [vmem:[%s1860_s10 + $0xe0] sm:$0xff] %v1060_v44  ;;  %1079 = vst [vmem:[%s1860_s10 + $0x78] sm:$0xff] %v1047_v3 }
 0x112   : > { %v1063_v12 = vmax.f32 %v1031_v15, 0.0 }
 0x113   : > { %v1045_v10 = vmax.f32 %v1013_v11, 0.0  ;;  %v1061_v45 = vmax.f32 %v1029_v4, 0.0 }
 0x114   : > { %1095 = vst [vmem:[%s1860_s10 + $0xf8] sm:$0xff] %v1063_v12 }
 0x115   : > { %1077 = vst [vmem:[%s1860_s10 + $0x68] sm:$0xff] %v1045_v10  ;;  %1093 = vst [vmem:[%s1860_s10 + $0xe8] sm:$0xff] %v1061_v45 }
 0x116   : > { %1526 = shalt.err (!%p1523_p5)
}
 0x117   : > { %s1527_s27 = scalar_lea.hbm %s1992_s14, 4096  ;;  %s1531_s8 = scalar_lea.hbm %s2054_s5, 8192 }
 0x118   : > { %p1528_p6 = scmp.ne.s32.totalorder %s1992_s14, %s1527_s27  ;;  %p1532_p10 = scmp.lt.u32.totalorder %s1992_s14, %s2054_s5 }
 0x119   : > { %p1533_p11 = scmp.lt.u32.totalorder %s1531_s8, %s1527_s27  ;;  %p1535_p13 = scmp.lt.u32.totalorder %s1527_s27, %s1992_s14 }
 0x11a   : > { %p1529_p7 = pnand %p1528_p6, %p1666_p4 }
 0x11b   : > { %p1534_p12 = por %p1533_p11, %p1532_p10 }
 0x11c   : > { %p1530_p9 = pneg %p1529_p7 }
 0x11d   : > { %p1536_p0 = por %p1535_p13, %p1534_p12 }
 0x11f   : > { %p1537_p1 = pnand %p1536_p0, %p1530_p9 }
 0x121   : > { %1540 = shalt.err (!%p1537_p1)
}
 0x122   : > { %s1594_s11 = smov 128   ;;  %s1595_s21 = smov 8  }
 0x123   : > { %1438 = dma.vmem_to_hbm [thread:$0]  (%p1666_p4), %s1994_s12, 4096, %s1992_s14, %s2003_s15, %s1594_s11, %s1594_s11, %s1595_s21  }
 0x124 PF: > { %p1444_p2 = scmp.ge.s32.totalorder %s1591_s23, 2  ;;  %s1126_s13 = sand.u32 1, %s1571_s18  }
 0x125   : > { %s1127_s16 = scalar_lea.sflag [#allocation4], %s1126_s13 }
 0x126   : > { %p1441_p3 = pnand %p1444_p2, %p1673_p8 }
 0x128   : > { %1566 = dma.done.wait (!%p1441_p3), %s1127_s16, 4096  }
 0x129   : > { %1568 = vsyncadd (!%p1441_p3), %s1127_s16, 4294963200  ;;  %s18_s23 = sadd.s32 1, %s1591_s23   ;;  %s2060_s18 = smov %s1575_s19 }
 0x12a   : > { %p15_p5 = scmp.ge.s32.totalorder %s18_s23, 4   ;;  %s2061_s19 = smov %s1579_s20 }
 0x12b   : > { %s2062_s20 = smov %s1679_s6  ;;  %s2063_s21 = smov %s1587_s22 }
 0x12c   : > { %s2064_s22 = smov %s2066_s26  ;;  %17 = sbr.rel (!%p15_p5) target bundleno = 4 (0x4), region = 95 }
 0x133   :  { %1132 = vsyncpa [#allocation4], 1 }
 0x134   :  { %1134 = vsyncpa [#allocation4 + $0x1], 1 }

// kernel: bottleneck_forward.5
= control target key start
LH: loop header
LB: loop body
LE: loop exit
PB: predicated region body
PF: predicated region fallthrough
CT: control target
= control target key end

     0   :  { %s4276_s15 = smov 0   ;;  %s4278_s16 = smov 0   ;;  %s5339_s0 = inlined_call_operand.vmem [shape: bf16[2,18,18,32], index: 0, kind: input, shape index: {}]   ;;  %s5340_s1 = inlined_call_operand.vmem [shape: bf16[9,32,32], index: 1, kind: input, shape index: {}]   ;;  %s5341_s2 = inlined_call_operand.vmem [shape: f32[1,32], index: 2, kind: input, shape index: {}]   ;;  %s5342_s3 = inlined_call_operand.vmem [shape: f32[1,32], index: 3, kind: input, shape index: {}]   ;;  %s5343_s4 = inlined_call_operand.vmem [shape: bf16[2,256,32], index: 4, kind: output, shape index: {}]  }
   0x1   :  { %s4280_s17 = smov 0  }
   0x2 LB: > { %s26_s18 = sadd.s32 1, %s4245_s16  ;;  %p3117_p0 = scmp.ge.s32.totalorder %s4249_s17, 1  ;;  %s4249_s17 = sphi %s4280_s17, %s14_s17   ;;  %s4245_s16 = sphi %s4278_s16, %s5425_s16   ;;  %s4241_s15 = sphi %s4276_s15, %s5424_s15  }
   0x3   : > { %p28_p1 = scmp.ge.s32.totalorder %s26_s18, 2  ;;  %p201_p2 = scmp.lt.s32.totalorder %s4249_s17, 3 }
   0x5   : > { %s5427_s18 = smov (%p28_p1, %s26_s18), 0  ;;  %p202_p3 = pnand %p3117_p0, %p201_p2 }
   0x7   : > { %205 = sbr.rel (%p202_p3) target bundleno = 538 (0x21a), region = 36 }
   0xe   : > { %v4173_v0 = vld [vmem:[%s5340_s1 + $0x10] sm:$0xff]   ;;  %p240_p4 = scmp.lt.s32.totalorder %s4241_s15, 1  ;;  %v4300_v1 = vld [vmem:[%s5340_s1 + $0x40] sm:$0xff]   ;;  %v4175_v2 = vld [vmem:[%s5340_s1 + $0x18] sm:$0xff]   ;;  %vm440_vm0 = vcmask 1046528   ;;  %vm586_vm1 = vcmask 261120  }
   0xf   : > { %3564 = vmatprep.subr.bf16.mxu1 %v4173_v0  ;;  %3708 = vmatprep.subr.bf16.mxu0 %v4300_v1  ;;  %v4311_v3 = vld [vmem:[%s5340_s1 + $0x48] sm:$0xff]   ;;  %v4177_v4 = vld [vmem:[%s5340_s1] sm:$0xff]   ;;  %v4322_v5 = vld [vmem:[%s5340_s1 + $0x50] sm:$0xff]   ;;  %vm1017_vm2 = vcmask 1045504   ;;  %vm2960_vm3 = vcmask 257024  }
  0x10   : > { %s5429_s15 = smov (!%p240_p4, %s4241_s15), 1  ;;  %3565 = vmatpush3.bf16.msra.mxu1 %v4173_v0  ;;  %5383 = vst [vmem:[#allocation2_spill] sm:$0xff] %v4311_v3  ;;  %3709 = vmatpush3.bf16.msra.mxu0 %v4300_v1  ;;  %v4181_v40 = vld [vmem:[%s5340_s1 + $0x8] sm:$0xff]   ;;  %v4180_v58 = vld [vmem:[%s5340_s1 + $0x58] sm:$0xff]  }
  0x11   : > { %3566 = vmatprep.subr.bf16.mxu1 %v4175_v2  ;;  %s4148_s27 = smul.u32 216, %s5429_s15  ;;  %3710 = vmatprep.subr.bf16.mxu0 %v4311_v3  ;;  %s3369_s19 = sshll.u32 %s5429_s15, 7 }
  0x12   : > { %s5200_s22 = scalar_lea.vmem %s5343_s4, %s3369_s19 }
  0x13   : > { %s4327_s8 = scalar_lea.vmem %s5339_s0, %s4148_s27 }
  0x14   : > { %3567 = vmatpush3.bf16.msra.mxu1 %v4175_v2  ;;  %v4330_v6 = vld [vmem:[%s4327_s8] sm:$0xff]   ;;  %v4333_v7 = vld [vmem:[%s4327_s8 + $0x8] sm:$0x1]  ;;  %v4336_v8 = vld [vmem:[%s4327_s8 + $0xc] sm:$0xff]   ;;  %3711 = vmatpush3.bf16.msra.mxu0 %v4311_v3 }
  0x15   : > { %v5346_v9 = vunpack.c.l.bf16 %v4330_v6  ;;  %v5345_v10 = vunpack.c.h.bf16 %v4330_v6  ;;  %v5344_v11 = vunpack.c.l.bf16 %v4333_v7  ;;  %3600 = vmatprep.subr.bf16.mxu1 %v4177_v4  ;;  %v4343_v12 = vld [vmem:[%s4327_s8 + $0x14] sm:$0x1]  ;;  %v321_v13 = vunpack.c.l.bf16 %v4336_v8  ;;  %v4347_v14 = vld [vmem:[%s4327_s8 + $0x18] sm:$0xff]   ;;  %3744 = vmatprep.subr.bf16.mxu0 %v4322_v5  ;;  %v4364_v23 = vld [vmem:[%s4327_s8 + $0x20] sm:$0x1] }
  0x16   : > { %v322_v15 = vunpack.c.h.bf16 %v4336_v8  ;;  %v323_v16 = vunpack.c.l.bf16 %v4343_v12  ;;  %v324_v20 = vunpack.c.l.bf16 %v4347_v14  ;;  %v4371_v27 = vld [vmem:[%s4327_s8 + $0x24] sm:$0xff]   ;;  %v4375_v30 = vld [vmem:[%s4327_s8 + $0x2c] sm:$0x1]  ;;  %v325_v32 = vunpack.c.h.bf16 %v4347_v14  ;;  %v4383_v35 = vld [vmem:[%s4327_s8 + $0x30] sm:$0xff]  }
  0x17   : > { %v441_v17 = vrot.slane %v5346_v9, 1  ;;  %v442_v18 = vrot.slane %v5345_v10, 1  ;;  %v444_v19 = vrot.slane %v5344_v11, 1  ;;  %v446_v21 = vrot.slane %v321_v13, 1  ;;  %v4386_v36 = vld [vmem:[%s4327_s8 + $0x38] sm:$0x1] }
  0x18   : > { %v447_v22 = vrot.slane %v322_v15, 1  ;;  %v449_v26 = vrot.slane %v323_v16, 1  ;;  %v326_v33 = vunpack.c.l.bf16 %v4364_v23  ;;  %v451_v34 = vrot.slane %v324_v20, 1  ;;  %v4407_v47 = vld [vmem:[%s4327_s8 + $0x3c] sm:$0xff]   ;;  %v4414_v52 = vld [vmem:[%s4327_s8 + $0x44] sm:$0x1] }
  0x19   : > { %v443_v24 = vsel %vm440_vm0, %v441_v17, %v442_v18  ;;  %v445_v25 = vsel %vm440_vm0, %v442_v18, %v444_v19  ;;  %v327_v38 = vunpack.c.l.bf16 %v4371_v27  ;;  %v328_v39 = vunpack.c.h.bf16 %v4371_v27  ;;  %v4417_v53 = vld [vmem:[%s4327_s8 + $0x48] sm:$0xff]   ;;  %v4436_v63 = vld [vmem:[%s4327_s8 + $0x50] sm:$0x1]  ;;  %v4447_v18 = vld [vmem:[%s4327_s8 + $0x54] sm:$0xff]  }
  0x1a   : > { %v553_v28 = vpack.c.bf16 %v445_v25, %v443_v24  ;;  %v448_v29 = vsel %vm440_vm0, %v446_v21, %v447_v22  ;;  %v450_v31 = vsel %vm440_vm0, %v447_v22, %v449_v26  ;;  %v452_v41 = vrot.slane %v325_v32, 1  ;;  %v4450_v19 = vld [vmem:[%s4327_s8 + $0x5c] sm:$0x1]  ;;  %v4462_v26 = vld [vmem:[%s5340_s1 + $0x20] sm:$0xff]  }
  0x1b   : > { %v554_v37 = vpack.c.bf16 %v450_v31, %v448_v29  ;;  %v454_v42 = vrot.slane %v326_v33, 1  ;;  %v329_v43 = vunpack.c.l.bf16 %v4375_v30  ;;  %v456_v44 = vrot.slane %v327_v38, 1 }
  0x1c   : > { %3568 = vmatprep.mubr.msk.bf16.mxu1 %vm586_vm1, %v553_v28  ;;  %v457_v45 = vrot.slane %v328_v39, 1  ;;  %v330_v46 = vunpack.c.l.bf16 %v4383_v35  ;;  %v453_v48 = vsel %vm440_vm0, %v451_v34, %v452_v41  ;;  %v331_v50 = vunpack.c.h.bf16 %v4383_v35  ;;  %v4474_v34 = vld [vmem:[%s5340_s1 + $0x60] sm:$0xff]  }
  0x1d   : > { %3712 = vmatprep.mubr.msk.bf16.mxu0 %vm586_vm1, %v554_v37  ;;  %3569 = vmatmul.mubr.msk.bf16.vlgmr.msra.gmra.mrb[0].mxu1 %vm586_vm1, %v554_v37  ;;  %v455_v49 = vsel %vm440_vm0, %v452_v41, %v454_v42  ;;  %v332_v51 = vunpack.c.l.bf16 %v4386_v36  ;;  %v459_v56 = vrot.slane %v329_v43, 1  ;;  %v333_v61 = vunpack.c.l.bf16 %v4407_v47 }
  0x1e   : > { %3601 = vmatpush3.bf16.msra.mxu1 %v4177_v4  ;;  %v4419_v54 = vpack.c.bf16 %v455_v49, %v453_v48  ;;  %v458_v55 = vsel %vm440_vm0, %v456_v44, %v457_v45  ;;  %v461_v57 = vrot.slane %v330_v46, 1  ;;  %v462_v59 = vrot.slane %v331_v50, 1 }
  0x1f   : > { %3602 = vmatprep.subr.bf16.mxu1 %v4181_v40  ;;  %v464_v60 = vrot.slane %v332_v51, 1  ;;  %v334_v62 = vunpack.c.h.bf16 %v4407_v47  ;;  %v460_v0 = vsel %vm440_vm0, %v457_v45, %v459_v56  ;;  %v5362_v2 = vunpack.c.l.bf16 %v4414_v52 }
  0x20   : > { %3713 = vmatmul.mubr.msk.bf16.vlgmr.msra.gmra.mrb[0].mxu0 %vm586_vm1, %v4419_v54  ;;  %3572 = vmatprep.mubr.msk.bf16.mxu1 %vm586_vm1, %v4419_v54  ;;  %v5361_v4 = vunpack.c.l.bf16 %v4417_v53  ;;  %v5356_v17 = vunpack.c.h.bf16 %v4417_v53  ;;  %v4453_v21 = vpack.c.bf16 %v460_v0, %v458_v55  ;;  %v463_v22 = vsel %vm440_vm0, %v461_v57, %v462_v59  ;;  %v4493_v55 = vld [vmem:[%s4327_s8 + $0x60] sm:$0xff]  }
  0x21   : > { %3745 = vmatpush3.bf16.msra.mxu0 %v4322_v5  ;;  %v465_v24 = vsel %vm440_vm0, %v462_v59, %v464_v60  ;;  %v466_v25 = vrot.slane %v333_v61, 1  ;;  %v467_v5 = vrot.slane %v334_v62, 1  ;;  %v469_v29 = vrot.slane %v5362_v2, 1  ;;  %v4502_v59 = vld [vmem:[%s4327_s8 + $0x68] sm:$0x1] }
  0x22   : > { %3603 = vmatpush3.bf16.msra.mxu1 %v4181_v40  ;;  %v4464_v28 = vpack.c.bf16 %v465_v24, %v463_v22  ;;  %3746 = vmatprep.subr.bf16.mxu0 %v4180_v58  ;;  %v5353_v31 = vunpack.c.l.bf16 %v4436_v63  ;;  %v471_v37 = vrot.slane %v5361_v4, 1  ;;  %v472_v40 = vrot.slane %v5356_v17, 1 }
  0x23   : > { %3716 = vmatprep.mubr.msk.bf16.mxu0 %vm586_vm1, %v4453_v21  ;;  %v5352_v41 = vunpack.c.l.bf16 %v4447_v18  ;;  %v5351_v42 = vunpack.c.h.bf16 %v4447_v18  ;;  %3636 = vmatprep.subr.bf16.mxu1 %v4462_v26  ;;  %v468_v44 = vsel %vm440_vm0, %v466_v25, %v467_v5  ;;  %v470_v45 = vsel %vm440_vm0, %v467_v5, %v469_v29  ;;  %v4519_v29 = vld [vmem:[%s4327_s8 + $0x6c] sm:$0xff]  }
  0x24   : > { %v474_v48 = vrot.slane %v5353_v31, 1  ;;  %v5347_v49 = vunpack.c.l.bf16 %v4450_v19  ;;  %v4497_v56 = vpack.c.bf16 %v470_v45, %v468_v44  ;;  %v5350_v22 = vunpack.c.l.bf16 %v4493_v55 }
  0x25   : > { %3573 = vmatmul.mubr.msk.bf16.gmra.mrb[4].mxu1 %vm586_vm1, %v4453_v21  ;;  %3747 = vmatpush3.bf16.msra.mxu0 %v4180_v58  ;;  %v476_v57 = vrot.slane %v5352_v41, 1  ;;  %v477_v60 = vrot.slane %v5351_v42, 1  ;;  %v473_v58 = vsel %vm440_vm0, %v471_v37, %v472_v40  ;;  %v5349_v25 = vunpack.c.h.bf16 %v4493_v55  ;;  %v4526_v37 = vld [vmem:[%s4327_s8 + $0x74] sm:$0x1] }
  0x26   : > { %3576 = vmatprep.mubr.msk.bf16.mxu1 %vm586_vm1, %v4464_v28  ;;  %v479_v0 = vrot.slane %v5347_v49, 1  ;;  %3780 = vmatprep.subr.bf16.mxu0 %v4474_v34  ;;  %v475_v24 = vsel %vm440_vm0, %v472_v40, %v474_v48  ;;  %v5348_v5 = vunpack.c.l.bf16 %v4502_v59  ;;  %v1023_v44 = vrot.slane %v321_v13, 2  ;;  %v4537_v49 = vld [vmem:[%s4327_s8 + $0x78] sm:$0xff]   ;;  %v4540_v13 = vld [vmem:[%s4327_s8 + $0x80] sm:$0x1] }
  0x27   : > { %v478_v45 = vsel %vm440_vm0, %v476_v57, %v477_v60  ;;  %v1024_v40 = vrot.slane %v322_v15, 2  ;;  %v1026_v48 = vrot.slane %v323_v16, 2  ;;  %v4532_v10 = vpack.c.bf16 %v475_v24, %v473_v58 }
  0x28   : > { %3717 = vmatmul.mubr.msk.bf16.gmra.mrb[4].mxu0 %vm586_vm1, %v4464_v28  ;;  %v480_v11 = vsel %vm440_vm0, %v477_v60, %v479_v0  ;;  %v481_v9 = vrot.slane %v5350_v22, 1  ;;  %v482_v57 = vrot.slane %v5349_v25, 1  ;;  %v484_v15 = vrot.slane %v5348_v5, 1 }
  0x29   : > { %3720 = vmatprep.mubr.msk.bf16.mxu0 %vm586_vm1, %v4497_v56  ;;  %v5355_v12 = vunpack.c.l.bf16 %v4519_v29  ;;  %v5354_v16 = vunpack.c.h.bf16 %v4519_v29  ;;  %v4552_v60 = vpack.c.bf16 %v480_v11, %v478_v45  ;;  %v5360_v0 = vunpack.c.l.bf16 %v4526_v37 }
  0x2a   : > { %v1028_v58 = vrot.slane %v324_v20, 2  ;;  %v5358_v24 = vunpack.c.l.bf16 %v4537_v49  ;;  %v5357_v5 = vunpack.c.h.bf16 %v4537_v49  ;;  %v5359_v25 = vunpack.c.l.bf16 %v4540_v13 }
  0x2b   : > { %v1029_v22 = vrot.slane %v325_v32, 2  ;;  %v1031_v42 = vrot.slane %v326_v33, 2  ;;  %v1025_v11 = vsel %vm1017_vm2, %v1023_v44, %v1024_v40  ;;  %v1027_v45 = vsel %vm1017_vm2, %v1024_v40, %v1026_v48  ;;  %v4575_v32 = vld [vmem:[%s4327_s8 + $0x84] sm:$0xff]   ;;  %v4578_v33 = vld [vmem:[%s4327_s8 + $0x8c] sm:$0x1] }
  0x2c   : > { %v483_v20 = vsel %vm440_vm0, %v481_v9, %v482_v57  ;;  %v485_v41 = vsel %vm440_vm0, %v482_v57, %v484_v15  ;;  %v486_v31 = vrot.slane %v5355_v12, 1  ;;  %v487_v23 = vrot.slane %v5354_v16, 1  ;;  %v4593_v15 = vld [vmem:[%s4327_s8 + $0x90] sm:$0xff]  }
  0x2d   : > { %3577 = vmatmul.mubr.msk.bf16.gmra.mrb[8].mxu1 %vm586_vm1, %v4497_v56  ;;  %v489_v44 = vrot.slane %v5360_v0, 1  ;;  %v4584_v9 = vpack.c.bf16 %v1027_v45, %v1025_v11  ;;  %v491_v40 = vrot.slane %v5358_v24, 1  ;;  %v492_v48 = vrot.slane %v5357_v5, 1  ;;  %v4601_v45 = vld [vmem:[%s4327_s8 + $0x98] sm:$0x1] }
  0x2e   : > { %3580 = vmatprep.mubr.msk.bf16.mxu1 %vm586_vm1, %v4532_v10  ;;  %v494_v57 = vrot.slane %v5359_v25, 1  ;;  %v4595_v16 = vpack.c.bf16 %v485_v41, %v483_v20  ;;  %v5368_v12 = vunpack.c.l.bf16 %v4575_v32  ;;  %v5367_v17 = vunpack.c.h.bf16 %v4575_v32 }
  0x2f   : > { %v5363_v11 = vunpack.c.l.bf16 %v4578_v33  ;;  %v488_v5 = vsel %vm440_vm0, %v486_v31, %v487_v23  ;;  %v1030_v24 = vsel %vm1017_vm2, %v1028_v58, %v1029_v22  ;;  %v1032_v25 = vsel %vm1017_vm2, %v1029_v22, %v1031_v42 }
  0x30   : > { %3721 = vmatmul.mubr.msk.bf16.gmra.mrb[8].mxu0 %vm586_vm1, %v4532_v10  ;;  %v1033_v41 = vrot.slane %v327_v38, 2  ;;  %v490_v20 = vsel %vm440_vm0, %v487_v23, %v489_v44  ;;  %v1034_v0 = vrot.slane %v328_v39, 2  ;;  %v5366_v4 = vunpack.c.l.bf16 %v4593_v15 }
  0x31   : > { %3724 = vmatprep.mubr.msk.bf16.mxu0 %vm586_vm1, %v4552_v60  ;;  %v5364_v2 = vunpack.c.h.bf16 %v4593_v15  ;;  %v493_v31 = vsel %vm440_vm0, %v491_v40, %v492_v48  ;;  %v495_v42 = vsel %vm440_vm0, %v492_v48, %v494_v57  ;;  %v1036_v38 = vrot.slane %v329_v43, 2 }
  0x32   : > { %v5365_v22 = vunpack.c.l.bf16 %v4601_v45  ;;  %v496_v58 = vrot.slane %v5368_v12, 1  ;;  %v497_v39 = vrot.slane %v5367_v17, 1  ;;  %v499_v23 = vrot.slane %v5363_v11, 1  ;;  %v4644_v11 = vld [vmem:[%s4327_s8 + $0x9c] sm:$0xff]   ;;  %v4185_v17 = vld [vmem:[%s5340_s1 + $0x68] sm:$0xff]  }
  0x33   : > { %v4630_v44 = vpack.c.bf16 %v490_v20, %v488_v5  ;;  %v4632_v40 = vpack.c.bf16 %v1032_v25, %v1030_v24  ;;  %v4636_v30 = vpack.c.bf16 %v495_v42, %v493_v31  ;;  %v1035_v43 = vsel %vm1017_vm2, %v1033_v41, %v1034_v0  ;;  %v4654_v41 = vld [vmem:[%s4327_s8 + $0xa4] sm:$0x1] }
  0x34   : > { %v501_v48 = vrot.slane %v5366_v4, 1  ;;  %v502_v57 = vrot.slane %v5364_v2, 1  ;;  %v1037_v25 = vsel %vm1017_vm2, %v1034_v0, %v1036_v38  ;;  %v1038_v5 = vrot.slane %v330_v46, 2  ;;  %v4663_v38 = vld [vmem:[%s4327_s8 + $0xa8] sm:$0xff]   ;;  %v4666_v46 = vld [vmem:[%s4327_s8 + $0xb0] sm:$0x1] }
  0x35   : > { %3581 = vmatmul.mubr.msk.bf16.gmra.mrb[12].mxu1 %vm586_vm1, %v4552_v60  ;;  %5384 = vst [vmem:[#allocation3_spill] sm:$0xff] %v4636_v30  ;;  %v1039_v24 = vrot.slane %v331_v50, 2  ;;  %v504_v20 = vrot.slane %v5365_v22, 1  ;;  %v498_v31 = vsel %vm440_vm0, %v496_v58, %v497_v39  ;;  %v500_v42 = vsel %vm440_vm0, %v497_v39, %v499_v23 }
  0x36   : > { %3584 = vmatprep.mubr.msk.bf16.mxu1 %vm586_vm1, %v4595_v16  ;;  %v1041_v2 = vrot.slane %v332_v51, 2  ;;  %v1043_v0 = vrot.slane %v333_v61, 2  ;;  %v1044_v50 = vrot.slane %v334_v62, 2  ;;  %v5385_v58 = vunpack.c.l.bf16 %v4414_v52 }
  0x37   : > { %v5373_v39 = vunpack.c.l.bf16 %v4644_v11  ;;  %v5372_v36 = vunpack.c.h.bf16 %v4644_v11  ;;  %v4678_v51 = vpack.c.bf16 %v1037_v25, %v1035_v43  ;;  %v503_v61 = vsel %vm440_vm0, %v501_v48, %v502_v57 }
  0x38   : > { %3725 = vmatmul.mubr.msk.bf16.gmra.mrb[12].mxu0 %vm586_vm1, %v4595_v16  ;;  %v1046_v22 = vrot.slane %v5385_v58, 2  ;;  %v5370_v23 = vunpack.c.l.bf16 %v4654_v41  ;;  %v505_v4 = vsel %vm440_vm0, %v502_v57, %v504_v20  ;;  %v5369_v62 = vunpack.c.l.bf16 %v4663_v38 }
  0x39   : > { %3748 = vmatprep.mubr.msk.bf16.mxu0 %vm586_vm1, %v4584_v9  ;;  %v5371_v52 = vunpack.c.h.bf16 %v4663_v38  ;;  %v4689_v12 = vpack.c.bf16 %v500_v42, %v498_v31  ;;  %v1040_v43 = vsel %vm1017_vm2, %v1038_v5, %v1039_v24  ;;  %v1042_v48 = vsel %vm1017_vm2, %v1039_v24, %v1041_v2  ;;  %v4709_v24 = vld [vmem:[%s4327_s8 + $0xb4] sm:$0xff]  }
  0x3a   : > { %v1045_v57 = vsel %vm1017_vm2, %v1043_v0, %v1044_v50  ;;  %v1047_v25 = vsel %vm1017_vm2, %v1044_v50, %v1046_v22  ;;  %v506_v20 = vrot.slane %v5373_v39, 1  ;;  %v507_v58 = vrot.slane %v5372_v36, 1  ;;  %v4720_v50 = vld [vmem:[%s4327_s8 + $0xbc] sm:$0x1] }
  0x3b   : > { %5386 = vst [vmem:[#allocation4_spill] sm:$0xff] %v4689_v12  ;;  %v4704_v5 = vpack.c.bf16 %v505_v4, %v503_v61  ;;  %v509_v2 = vrot.slane %v5370_v23, 1  ;;  %v4711_v31 = vpack.c.bf16 %v1042_v48, %v1040_v43  ;;  %v511_v22 = vrot.slane %v5369_v62, 1  ;;  %v4725_v4 = vld [vmem:[%s5340_s1 + $0x70] sm:$0xff]  }
  0x3c   : > { %v512_v42 = vrot.slane %v5371_v52, 1  ;;  %v4727_v61 = vpack.c.bf16 %v1047_v25, %v1045_v57  ;;  %v5388_v43 = vunpack.c.l.bf16 %v4417_v53  ;;  %v5389_v62 = vunpack.c.h.bf16 %v4417_v53 }
  0x3d   : > { %3585 = vmatmul.mubr.msk.bf16.gmra.mrb[16].mxu1 %vm586_vm1, %v4630_v44  ;;  %v5390_v52 = vunpack.c.l.bf16 %v4436_v63  ;;  %v5391_v39 = vunpack.c.l.bf16 %v4447_v18  ;;  %v5392_v57 = vunpack.c.h.bf16 %v4447_v18  ;;  %v510_v63 = vsel %vm440_vm0, %v507_v58, %v509_v2 }
  0x3e   : > { %3588 = vmatprep.mubr.msk.bf16.mxu1 %vm586_vm1, %v4636_v30  ;;  %v1048_v48 = vrot.slane %v5388_v43, 2  ;;  %v1049_v23 = vrot.slane %v5389_v62, 2  ;;  %v5393_v30 = vunpack.c.l.bf16 %v4450_v19  ;;  %v5382_v62 = vunpack.c.l.bf16 %v4709_v24 }
  0x3f   : > { %v1051_v36 = vrot.slane %v5390_v52, 2  ;;  %v1053_v3 = vrot.slane %v5391_v39, 2  ;;  %v1054_v25 = vrot.slane %v5392_v57, 2  ;;  %v5381_v52 = vunpack.c.h.bf16 %v4709_v24 }
  0x40   : > { %3749 = vmatmul.mubr.msk.bf16.vlgmr.msra.gmra.mrb[0].mxu0 %vm586_vm1, %v4632_v40  ;;  %v1056_v43 = vrot.slane %v5393_v30, 2  ;;  %v513_v39 = vsel %vm440_vm0, %v511_v22, %v512_v42  ;;  %v1050_v19 = vsel %vm1017_vm2, %v1048_v48, %v1049_v23  ;;  %v516_v22 = vrot.slane %v5382_v62, 1 }
  0x41   : > { %3781 = vmatpush3.bf16.msra.mxu0 %v4474_v34  ;;  %3752 = vmatprep.mubr.msk.bf16.mxu0 %vm586_vm1, %v4678_v51  ;;  %v5387_v34 = vunpack.c.l.bf16 %v4666_v46  ;;  %v1055_v2 = vsel %vm1017_vm2, %v1053_v3, %v1054_v25 }
  0x42   : > { %3782 = vmatprep.subr.bf16.mxu0 %v4185_v17  ;;  %v1057_v57 = vsel %vm1017_vm2, %v1054_v25, %v1056_v43  ;;  %v5395_v25 = vunpack.c.h.bf16 %v4493_v55 }
  0x43   : > { %v514_v0 = vrot.slane %v5387_v34, 1  ;;  %v508_v34 = vsel %vm440_vm0, %v506_v20, %v507_v58  ;;  %v5380_v20 = vunpack.c.l.bf16 %v4720_v50  ;;  %v1052_v58 = vsel %vm1017_vm2, %v1049_v23, %v1051_v36 }
  0x44   : > { %v4756_v30 = vpack.c.bf16 %v510_v63, %v508_v34  ;;  %v4773_v3 = vpack.c.bf16 %v1052_v58, %v1050_v19  ;;  %v4775_v36 = vpack.c.bf16 %v1057_v57, %v1055_v2  ;;  %v5394_v23 = vunpack.c.l.bf16 %v4493_v55 }
  0x45   : > { %3589 = vmatmul.mubr.msk.bf16.gmra.mrb[20].mxu1 %vm586_vm1, %v4689_v12  ;;  %3783 = vmatpush3.bf16.msra.mxu0 %v4185_v17  ;;  %v515_v12 = vsel %vm440_vm0, %v512_v42, %v514_v0  ;;  %v517_v42 = vrot.slane %v5381_v52, 1  ;;  %v519_v0 = vrot.slane %v5380_v20, 1  ;;  %v1059_v43 = vrot.slane %v5395_v25, 2 }
  0x46   : > { %3592 = vmatprep.mubr.msk.bf16.mxu1 %vm586_vm1, %v4704_v5  ;;  %3816 = vmatprep.subr.bf16.mxu0 %v4725_v4  ;;  %v4763_v17 = vpack.c.bf16 %v515_v12, %v513_v39  ;;  %v1058_v12 = vrot.slane %v5394_v23, 2  ;;  %v5396_v63 = vunpack.c.l.bf16 %v4502_v59  ;;  %v5397_v19 = vunpack.c.l.bf16 %v4519_v29 }
  0x47   : > { %v518_v48 = vsel %vm440_vm0, %v516_v22, %v517_v42  ;;  %v520_v34 = vsel %vm440_vm0, %v517_v42, %v519_v0  ;;  %v5398_v2 = vunpack.c.h.bf16 %v4519_v29  ;;  %v5399_v23 = vunpack.c.l.bf16 %v4526_v37 }
  0x48   : > { %3753 = vmatmul.mubr.msk.bf16.gmra.mrb[4].mxu0 %vm586_vm1, %v4711_v31  ;;  %v1061_v39 = vrot.slane %v5396_v63, 2  ;;  %v1063_v58 = vrot.slane %v5397_v19, 2  ;;  %v5400_v52 = vunpack.c.l.bf16 %v4330_v6  ;;  %v5401_v42 = vunpack.c.h.bf16 %v4330_v6 }
  0x49   : > { %3756 = vmatprep.mubr.msk.bf16.mxu0 %vm586_vm1, %v4727_v61  ;;  %v1064_v57 = vrot.slane %v5398_v2, 2  ;;  %v1066_v20 = vrot.slane %v5399_v23, 2  ;;  %v5402_v25 = vunpack.c.l.bf16 %v4333_v7  ;;  %v4801_v59 = vpack.c.bf16 %v520_v34, %v518_v48 }
  0x4a   : > { %v1018_v22 = vrot.slane %v5400_v52, 2  ;;  %v1019_v0 = vrot.slane %v5401_v42, 2  ;;  %v1060_v37 = vsel %vm1017_vm2, %v1058_v12, %v1059_v43  ;;  %v1062_v63 = vsel %vm1017_vm2, %v1059_v43, %v1061_v39 }
  0x4b   : > { %v1021_v62 = vrot.slane %v5402_v25, 2  ;;  %v1065_v52 = vsel %vm1017_vm2, %v1063_v58, %v1064_v57  ;;  %v1067_v19 = vsel %vm1017_vm2, %v1064_v57, %v1066_v20  ;;  %v4814_v7 = vpack.c.bf16 %v1062_v63, %v1060_v37 }
  0x4c   : > { %v4810_v2 = vsel %vm1017_vm2, %v1018_v22, %v1019_v0  ;;  %v5403_v48 = vunpack.c.l.bf16 %v4537_v49  ;;  %v4823_v12 = vpack.c.bf16 %v1067_v19, %v1065_v52  ;;  %v5404_v20 = vunpack.c.h.bf16 %v4537_v49  ;;  %v4193_v19 = vld [vmem:[%s5340_s1 + $0x28] sm:$0xff]  }
  0x4d   : > { %3593 = vmatmul.mubr.msk.bf16.gmra.mrb[24].mxu1 %vm586_vm1, %v4756_v30  ;;  %v4819_v23 = vsel %vm1017_vm2, %v1019_v0, %v1021_v62  ;;  %v5405_v39 = vunpack.c.l.bf16 %v4540_v13  ;;  %v5406_v22 = vunpack.c.l.bf16 %v4575_v32  ;;  %v5407_v62 = vunpack.c.h.bf16 %v4575_v32 }
  0x4e   : > { %3596 = vmatprep.mubr.msk.bf16.mxu1 %vm586_vm1, %v4763_v17  ;;  %v1068_v34 = vrot.slane %v5403_v48, 2  ;;  %v1069_v43 = vrot.slane %v5404_v20, 2  ;;  %v1130_v57 = vpack.c.bf16 %v4819_v23, %v4810_v2  ;;  %v5408_v25 = vunpack.c.l.bf16 %v4578_v33 }
  0x4f   : > { %v1071_v58 = vrot.slane %v5405_v39, 2  ;;  %v1073_v42 = vrot.slane %v5406_v22, 2  ;;  %v1074_v0 = vrot.slane %v5407_v62, 2 }
  0x50   : > { %3757 = vmatmul.mubr.msk.bf16.gmra.mrb[8].mxu0 %vm586_vm1, %v4773_v3  ;;  %v1070_v13 = vsel %vm1017_vm2, %v1068_v34, %v1069_v43  ;;  %v5409_v34 = vunpack.c.l.bf16 %v4593_v15 }
  0x51   : > { %3760 = vmatprep.mubr.msk.bf16.mxu0 %vm586_vm1, %v4775_v36  ;;  %v1072_v37 = vsel %vm1017_vm2, %v1069_v43, %v1071_v58  ;;  %v1075_v63 = vsel %vm1017_vm2, %v1073_v42, %v1074_v0  ;;  %v5410_v43 = vunpack.c.h.bf16 %v4593_v15  ;;  %v5411_v58 = vunpack.c.l.bf16 %v4601_v45 }
  0x52   : > { %v4850_v33 = vpack.c.bf16 %v1072_v37, %v1070_v13  ;;  %v1078_v20 = vrot.slane %v5409_v34, 2  ;;  %v5412_v42 = vunpack.c.l.bf16 %v4644_v11  ;;  %v4872_v13 = vld [vmem:[%s5340_s1 + $0x30] sm:$0xff]   ;;  %v5415_v34 = vunpack.c.l.bf16 %v4663_v38 }
  0x53   : > { %v1079_v39 = vrot.slane %v5410_v43, 2  ;;  %v1081_v22 = vrot.slane %v5411_v58, 2 }
  0x54   : > { %v1083_v62 = vrot.slane %v5412_v42, 2  ;;  %v1088_v43 = vrot.slane %v5415_v34, 2  ;;  %v5418_v42 = vunpack.c.l.bf16 %v4709_v24 }
  0x55   : > { %3597 = vmatmul.mubr.msk.bf16.gmra.mrb[28].mxu1 %vm586_vm1, %v4801_v59  ;;  %v1080_v45 = vsel %vm1017_vm2, %v1078_v20, %v1079_v39  ;;  %v1082_v37 = vsel %vm1017_vm2, %v1079_v39, %v1081_v22  ;;  %v5416_v20 = vunpack.c.h.bf16 %v4663_v38  ;;  %v5417_v39 = vunpack.c.l.bf16 %v4666_v46 }
  0x56   : > { %3604 = vmatprep.mubr.msk.bf16.mxu1 %vm586_vm1, %v4330_v6  ;;  %v1076_v6 = vrot.slane %v5408_v25, 2  ;;  %v5414_v25 = vunpack.c.l.bf16 %v4654_v41 }
  0x57   : > { %v1089_v58 = vrot.slane %v5416_v20, 2  ;;  %v1091_v22 = vrot.slane %v5417_v39, 2 }
  0x58   : > { %3761 = vmatmul.mubr.msk.bf16.gmra.mrb[12].mxu0 %vm586_vm1, %v4814_v7  ;;  %v1077_v52 = vsel %vm1017_vm2, %v1074_v0, %v1076_v6  ;;  %v5413_v0 = vunpack.c.h.bf16 %v4644_v11  ;;  %v1086_v6 = vrot.slane %v5414_v25, 2  ;;  %v5420_v25 = vunpack.c.l.bf16 %v4720_v50 }
  0x59   : > { %3764 = vmatprep.mubr.msk.bf16.mxu0 %vm586_vm1, %v4823_v12  ;;  %v4855_v48 = vpack.c.bf16 %v1077_v52, %v1075_v63  ;;  %v4885_v52 = vpack.c.bf16 %v1082_v37, %v1080_v45  ;;  %v4904_v45 = vld [vmem:[%s4327_s8 + $0xc0] sm:$0xff]   ;;  %v314_v37 = vld [vmem:[%s4327_s8 + $0xc8] sm:$0x1]  ;;  %v1092_v46 = vsel %vm1017_vm2, %v1089_v58, %v1091_v22 }
  0x5a   : > { %v367_v34 = vunpack.c.h.bf16 %v4904_v45  ;;  %v368_v20 = vunpack.c.l.bf16 %v314_v37 }
  0x5c   : > { %v1843_v22 = vrot.slane %v367_v34, 2  ;;  %v1624_v37 = vrot.slane %v368_v20, 1 }
  0x5d   : > { %3605 = vmatmul.mubr.msk.bf16.vlgmr.msra.gmra.mrb[0].mxu1 %vm586_vm1, %v4336_v8 }
  0x5e   : > { %3637 = vmatpush3.bf16.msra.mxu1 %v4462_v26  ;;  %3608 = vmatprep.mubr.msk.bf16.mxu1 %vm586_vm1, %v4347_v14  ;;  %v1084_v26 = vrot.slane %v5413_v0, 2  ;;  %v5419_v0 = vunpack.c.h.bf16 %v4709_v24 }
  0x5f   : > { %3638 = vmatprep.subr.bf16.mxu1 %v4193_v19 }
  0x60   : > { %3765 = vmatmul.mubr.msk.bf16.gmra.mrb[16].mxu0 %vm586_vm1, %v4850_v33  ;;  %v1085_v41 = vsel %vm1017_vm2, %v1083_v62, %v1084_v26  ;;  %v1087_v63 = vsel %vm1017_vm2, %v1084_v26, %v1086_v6  ;;  %v1093_v62 = vrot.slane %v5418_v42, 2  ;;  %v1094_v26 = vrot.slane %v5419_v0, 2 }
  0x61   : > { %3768 = vmatprep.mubr.msk.bf16.mxu0 %vm586_vm1, %v4855_v48  ;;  %v1096_v6 = vrot.slane %v5420_v25, 2  ;;  %v1845_v0 = vrot.slane %v368_v20, 2 }
  0x62   : > { %3639 = vmatpush3.bf16.msra.mxu1 %v4193_v19  ;;  %v4893_v19 = vpack.c.bf16 %v1087_v63, %v1085_v41  ;;  %v1090_v41 = vsel %vm1017_vm2, %v1088_v43, %v1089_v58  ;;  %v366_v63 = vunpack.c.l.bf16 %v4904_v45  ;;  %v1095_v50 = vsel %vm1017_vm2, %v1093_v62, %v1094_v26 }
  0x63   : > { %3672 = vmatprep.subr.bf16.mxu1 %v4872_v13  ;;  %v1097_v39 = vsel %vm1017_vm2, %v1094_v26, %v1096_v6  ;;  %v4919_v42 = vpack.c.bf16 %v1092_v46, %v1090_v41  ;;  %v1622_v62 = vrot.slane %v367_v34, 1  ;;  %v1846_v6 = vsel %vm1017_vm2, %v1843_v22, %v1845_v0  ;;  %v4207_v34 = vld [vmem:[%s5340_s1 + $0x80] sm:$0xff]  }
  0x64   : > { %v4923_v43 = vpack.c.bf16 %v1097_v39, %v1095_v50  ;;  %v1842_v58 = vrot.slane %v366_v63, 2  ;;  %v1621_v25 = vrot.slane %v366_v63, 1  ;;  %v4203_v63 = vld [vmem:[%s5340_s1 + $0x78] sm:$0xff]  }
  0x65   : > { %3609 = vmatmul.mubr.msk.bf16.gmra.mrb[4].mxu1 %vm586_vm1, %v4371_v27  ;;  %v1625_v46 = vsel %vm440_vm0, %v1622_v62, %v1624_v37  ;;  %v4208_v37 = vld [vmem:[%s5340_s1 + $0x88] sm:$0xff]  }
  0x66   : > { %3612 = vmatprep.mubr.msk.bf16.mxu1 %vm586_vm1, %v4383_v35  ;;  %v1844_v26 = vsel %vm1017_vm2, %v1842_v58, %v1843_v22  ;;  %v1623_v41 = vsel %vm440_vm0, %v1621_v25, %v1622_v62 }
  0x67   : > { %v4933_v50 = vpack.c.bf16 %v1625_v46, %v1623_v41  ;;  %v4937_v39 = vpack.c.bf16 %v1846_v6, %v1844_v26 }
  0x68   : > { %3769 = vmatmul.mubr.msk.bf16.gmra.mrb[20].mxu0 %vm586_vm1, %v4885_v52 }
  0x69   : > { %3772 = vmatprep.mubr.msk.bf16.mxu0 %vm586_vm1, %v4893_v19 }
  0x6d   : > { %3613 = vmatmul.mubr.msk.bf16.gmra.mrb[8].mxu1 %vm586_vm1, %v4407_v47 }
  0x6e   : > { %3616 = vmatprep.mubr.msk.bf16.mxu1 %vm586_vm1, %v4417_v53 }
  0x70   : > { %3773 = vmatmul.mubr.msk.bf16.gmra.mrb[24].mxu0 %vm586_vm1, %v4919_v42 }
  0x71   : > { %3776 = vmatprep.mubr.msk.bf16.mxu0 %vm586_vm1, %v4923_v43 }
  0x75   : > { %3617 = vmatmul.mubr.msk.bf16.gmra.mrb[12].mxu1 %vm586_vm1, %v4447_v18 }
  0x76   : > { %3620 = vmatprep.mubr.msk.bf16.mxu1 %vm586_vm1, %v4493_v55 }
  0x78   : > { %3777 = vmatmul.mubr.msk.bf16.gmra.mrb[28].mxu0 %vm586_vm1, %v4937_v39 }
  0x79   : > { %3784 = vmatprep.mubr.msk.bf16.mxu0 %vm586_vm1, %v4347_v14 }
  0x7d   : > { %3621 = vmatmul.mubr.msk.bf16.gmra.mrb[16].mxu1 %vm586_vm1, %v4519_v29 }
  0x7e   : > { %3624 = vmatprep.mubr.msk.bf16.mxu1 %vm586_vm1, %v4537_v49 }
  0x80   : > { %3785 = vmatmul.mubr.msk.bf16.vlgmr.msra.gmra.mrb[0].mxu0 %vm586_vm1, %v4371_v27 }
  0x81   : > { %3817 = vmatpush3.bf16.msra.mxu0 %v4725_v4  ;;  %3788 = vmatprep.mubr.msk.bf16.mxu0 %vm586_vm1, %v4383_v35  ;;  %v4206_v4 = vld [vmem:[%s5340_s1 + $0x38] sm:$0xff]  }
  0x82   : > { %3818 = vmatprep.subr.bf16.mxu0 %v4203_v63 }
  0x85   : > { %3625 = vmatmul.mubr.msk.bf16.gmra.mrb[20].mxu1 %vm586_vm1, %v4575_v32  ;;  %3819 = vmatpush3.bf16.msra.mxu0 %v4203_v63 }
  0x86   : > { %3628 = vmatprep.mubr.msk.bf16.mxu1 %vm586_vm1, %v4593_v15  ;;  %3852 = vmatprep.subr.bf16.mxu0 %v4207_v34 }
  0x88   : > { %3789 = vmatmul.mubr.msk.bf16.gmra.mrb[4].mxu0 %vm586_vm1, %v4407_v47 }
  0x89   : > { %3792 = vmatprep.mubr.msk.bf16.mxu0 %vm586_vm1, %v4417_v53 }
  0x8d   : > { %3629 = vmatmul.mubr.msk.bf16.gmra.mrb[24].mxu1 %vm586_vm1, %v4644_v11 }
  0x8e   : > { %3632 = vmatprep.mubr.msk.bf16.mxu1 %vm586_vm1, %v4663_v38 }
  0x90   : > { %3793 = vmatmul.mubr.msk.bf16.gmra.mrb[8].mxu0 %vm586_vm1, %v4447_v18 }
  0x91   : > { %3796 = vmatprep.mubr.msk.bf16.mxu0 %vm586_vm1, %v4493_v55 }
  0x95   : > { %3633 = vmatmul.mubr.msk.bf16.gmra.mrb[28].mxu1 %vm586_vm1, %v4709_v24 }
  0x96   : > { %3640 = vmatprep.mubr.msk.bf16.mxu1 %vm586_vm1, %v1130_v57  ;;  %v317_v57 = vld [vmem:[%s4327_s8 + $0xd4] sm:$0x1] }
  0x97   : > { %v371_v58 = vunpack.c.l.bf16 %v317_v57 }
  0x98   : > { %3797 = vmatmul.mubr.msk.bf16.gmra.mrb[12].mxu0 %vm586_vm1, %v4519_v29 }
  0x99   : > { %3800 = vmatprep.mubr.msk.bf16.mxu0 %vm586_vm1, %v4537_v49  ;;  %v2504_v22 = vrot.slane %v371_v58, 2 }
  0x9d   : > { %3641 = vmatmul.mubr.msk.bf16.vlgmr.msra.gmra.mrb[0].mxu1 %vm586_vm1, %v4584_v9  ;;  %v315_v9 = vld [vmem:[%s4327_s8 + $0xcc] sm:$0xff]  }
  0x9e   : > { %3673 = vmatpush3.bf16.msra.mxu1 %v4872_v13  ;;  %3644 = vmatprep.mubr.msk.bf16.mxu1 %vm586_vm1, %v4632_v40  ;;  %v369_v2 = vunpack.c.l.bf16 %v315_v9  ;;  %v370_v23 = vunpack.c.h.bf16 %v315_v9 }
  0x9f   : > { %3674 = vmatprep.subr.bf16.mxu1 %v4206_v4 }
  0xa0   : > { %3801 = vmatmul.mubr.msk.bf16.gmra.mrb[16].mxu0 %vm586_vm1, %v4575_v32  ;;  %v2501_v13 = vrot.slane %v369_v2, 2  ;;  %v2502_v20 = vrot.slane %v370_v23, 2 }
  0xa1   : > { %3804 = vmatprep.mubr.msk.bf16.mxu0 %vm586_vm1, %v4593_v15 }
  0xa2   : > { %3675 = vmatpush3.bf16.msra.mxu1 %v4206_v4  ;;  %v5020_v0 = vsel %vm1017_vm2, %v2501_v13, %v2502_v20  ;;  %v5025_v25 = vsel %vm1017_vm2, %v2502_v20, %v2504_v22 }
  0xa3   : > { %3888 = vmatprep.subr.bf16.mxu1 %v4300_v1  ;;  %v2508_v62 = vpack.c.bf16 %v5025_v25, %v5020_v0 }
  0xa5   : > { %3645 = vmatmul.mubr.msk.bf16.gmra.mrb[4].mxu1 %vm586_vm1, %v4678_v51 }
  0xa6   : > { %3648 = vmatprep.mubr.msk.bf16.mxu1 %vm586_vm1, %v4711_v31 }
  0xa8   : > { %3805 = vmatmul.mubr.msk.bf16.gmra.mrb[20].mxu0 %vm586_vm1, %v4644_v11 }
  0xa9   : > { %3808 = vmatprep.mubr.msk.bf16.mxu0 %vm586_vm1, %v4663_v38 }
  0xad   : > { %3649 = vmatmul.mubr.msk.bf16.gmra.mrb[8].mxu1 %vm586_vm1, %v4727_v61 }
  0xae   : > { %3652 = vmatprep.mubr.msk.bf16.mxu1 %vm586_vm1, %v4773_v3 }
  0xb0   : > { %3809 = vmatmul.mubr.msk.bf16.gmra.mrb[24].mxu0 %vm586_vm1, %v4709_v24 }
  0xb1   : > { %3812 = vmatprep.mubr.msk.bf16.mxu0 %vm586_vm1, %v4904_v45 }
  0xb5   : > { %3653 = vmatmul.mubr.msk.bf16.gmra.mrb[12].mxu1 %vm586_vm1, %v4775_v36 }
  0xb6   : > { %3656 = vmatprep.mubr.msk.bf16.mxu1 %vm586_vm1, %v4814_v7 }
  0xb8   : > { %3813 = vmatmul.mubr.msk.bf16.gmra.mrb[28].mxu0 %vm586_vm1, %v315_v9 }
  0xb9   : > { %3820 = vmatprep.mubr.msk.bf16.mxu0 %vm586_vm1, %v4419_v54  ;;  %v5422_v54 = vld [vmem:[#allocation2_spill] sm:$0xff] }
  0xbd   : > { %3657 = vmatmul.mubr.msk.bf16.gmra.mrb[16].mxu1 %vm586_vm1, %v4823_v12 }
  0xbe   : > { %3660 = vmatprep.mubr.msk.bf16.mxu1 %vm586_vm1, %v4850_v33 }
  0xc0   : > { %3821 = vmatmul.mubr.msk.bf16.vlgmr.msra.gmra.mrb[0].mxu0 %vm586_vm1, %v4453_v21  ;;  %v5423_v21 = vld [vmem:[#allocation4_spill] sm:$0xff] }
  0xc1   : > { %3853 = vmatpush3.bf16.msra.mxu0 %v4207_v34  ;;  %3824 = vmatprep.mubr.msk.bf16.mxu0 %vm586_vm1, %v4464_v28 }
  0xc2   : > { %3854 = vmatprep.subr.bf16.mxu0 %v4208_v37 }
  0xc5   : > { %3661 = vmatmul.mubr.msk.bf16.gmra.mrb[20].mxu1 %vm586_vm1, %v4855_v48  ;;  %3855 = vmatpush3.bf16.msra.mxu0 %v4208_v37 }
  0xc6   : > { %3664 = vmatprep.mubr.msk.bf16.mxu1 %vm586_vm1, %v4885_v52 }
  0xc8   : > { %3825 = vmatmul.mubr.msk.bf16.gmra.mrb[4].mxu0 %vm586_vm1, %v4497_v56 }
  0xc9   : > { %3828 = vmatprep.mubr.msk.bf16.mxu0 %vm586_vm1, %v4532_v10  ;;  %v5421_v10 = vld [vmem:[#allocation3_spill] sm:$0xff] }
  0xcd   : > { %3665 = vmatmul.mubr.msk.bf16.gmra.mrb[24].mxu1 %vm586_vm1, %v4893_v19 }
  0xce   : > { %3668 = vmatprep.mubr.msk.bf16.mxu1 %vm586_vm1, %v4919_v42 }
  0xd0   : > { %3829 = vmatmul.mubr.msk.bf16.gmra.mrb[8].mxu0 %vm586_vm1, %v4552_v60 }
  0xd1   : > { %3832 = vmatprep.mubr.msk.bf16.mxu0 %vm586_vm1, %v4595_v16 }
  0xd5   : > { %3669 = vmatmul.mubr.msk.bf16.gmra.mrb[28].mxu1 %vm586_vm1, %v4923_v43 }
  0xd6   : > { %3676 = vmatprep.mubr.msk.bf16.mxu1 %vm586_vm1, %v4336_v8  ;;  %v2281_v8 = vrot.slane %v370_v23, 1 }
  0xd8   : > { %3833 = vmatmul.mubr.msk.bf16.gmra.mrb[12].mxu0 %vm586_vm1, %v4630_v44 }
  0xd9   : > { %3836 = vmatprep.mubr.msk.bf16.mxu0 %vm586_vm1, %v5421_v10 }
  0xdd   : > { %3677 = vmatmul.mubr.msk.bf16.vlgmr.msra.gmra.mrb[0].mxu1 %vm586_vm1, %v4347_v14  ;;  %v2283_v14 = vrot.slane %v371_v58, 1 }
  0xde   : > { %3890 = vmatpush3.bf16.msra.mxu1 %v4300_v1  ;;  %3680 = vmatprep.mubr.msk.bf16.mxu1 %vm586_vm1, %v4371_v27  ;;  %v2280_v1 = vrot.slane %v369_v2, 1 }
  0xdf   : > { %3889 = vmatprep.subr.bf16.mxu1 %v5422_v54 }
  0xe0   : > { %3837 = vmatmul.mubr.msk.bf16.gmra.mrb[16].mxu0 %vm586_vm1, %v5423_v21  ;;  %v2282_v27 = vsel %vm440_vm0, %v2280_v1, %v2281_v8 }
  0xe1   : > { %3840 = vmatprep.mubr.msk.bf16.mxu0 %vm586_vm1, %v4704_v5 }
  0xe2   : > { %3891 = vmatpush3.bf16.msra.mxu1 %v5422_v54 }
  0xe5   : > { %3681 = vmatmul.mubr.msk.bf16.gmra.mrb[4].mxu1 %vm586_vm1, %v4383_v35  ;;  %v2284_v35 = vsel %vm440_vm0, %v2281_v8, %v2283_v14 }
  0xe6   : > { %3684 = vmatprep.mubr.msk.bf16.mxu1 %vm586_vm1, %v4407_v47  ;;  %v2287_v47 = vpack.c.bf16 %v2284_v35, %v2282_v27 }
  0xe8   : > { %3841 = vmatmul.mubr.msk.bf16.gmra.mrb[20].mxu0 %vm586_vm1, %v4756_v30 }
  0xe9   : > { %3844 = vmatprep.mubr.msk.bf16.mxu0 %vm586_vm1, %v4763_v17 }
  0xed   : > { %3685 = vmatmul.mubr.msk.bf16.gmra.mrb[8].mxu1 %vm586_vm1, %v4417_v53 }
  0xee   : > { %3688 = vmatprep.mubr.msk.bf16.mxu1 %vm586_vm1, %v4447_v18 }
  0xf0   : > { %3845 = vmatmul.mubr.msk.bf16.gmra.mrb[24].mxu0 %vm586_vm1, %v4801_v59 }
  0xf1   : > { %3848 = vmatprep.mubr.msk.bf16.mxu0 %vm586_vm1, %v4933_v50 }
  0xf5   : > { %3689 = vmatmul.mubr.msk.bf16.gmra.mrb[12].mxu1 %vm586_vm1, %v4493_v55 }
  0xf6   : > { %3692 = vmatprep.mubr.msk.bf16.mxu1 %vm586_vm1, %v4519_v29 }
  0xf8   : > { %3849 = vmatmul.mubr.msk.bf16.gmra.mrb[28].mxu0 %vm586_vm1, %v2287_v47 }
  0xf9   : > { %3856 = vmatprep.mubr.msk.bf16.mxu0 %vm586_vm1, %v4632_v40 }
  0xfd   : > { %3693 = vmatmul.mubr.msk.bf16.gmra.mrb[16].mxu1 %vm586_vm1, %v4537_v49 }
  0xfe   : > { %3696 = vmatprep.mubr.msk.bf16.mxu1 %vm586_vm1, %v4575_v32 }
 0x100   : > { %3857 = vmatmul.mubr.msk.bf16.vlgmr.msra.gmra.mrb[0].mxu0 %vm586_vm1, %v4678_v51 }
 0x101   : > { %3860 = vmatprep.mubr.msk.bf16.mxu0 %vm586_vm1, %v4711_v31 }
 0x105   : > { %3697 = vmatmul.mubr.msk.bf16.gmra.mrb[20].mxu1 %vm586_vm1, %v4593_v15 }
 0x106   : > { %3700 = vmatprep.mubr.msk.bf16.mxu1 %vm586_vm1, %v4644_v11 }
 0x108   : > { %3861 = vmatmul.mubr.msk.bf16.gmra.mrb[4].mxu0 %vm586_vm1, %v4727_v61 }
 0x109   : > { %3864 = vmatprep.mubr.msk.bf16.mxu0 %vm586_vm1, %v4773_v3 }
 0x10d   : > { %3701 = vmatmul.mubr.msk.bf16.gmra.mrb[24].mxu1 %vm586_vm1, %v4663_v38 }
 0x10e   : > { %3704 = vmatprep.mubr.msk.bf16.mxu1 %vm586_vm1, %v4709_v24  ;;  %v5182_v24 = vld [vmem:[%s5341_s2] ss:$0 sm:$0xff] }
 0x110   : > { %3865 = vmatmul.mubr.msk.bf16.gmra.mrb[8].mxu0 %vm586_vm1, %v4775_v36 }
 0x111   : > { %3868 = vmatprep.mubr.msk.bf16.mxu0 %vm586_vm1, %v4814_v7 }
 0x115   : > { %3705 = vmatmul.mubr.msk.bf16.gmra.mrb[28].mxu1 %vm586_vm1, %v4904_v45 }
 0x116   : > { %3728 = vmatprep.mubr.msk.bf16.mxu1 %vm586_vm1, %v4630_v44 }
 0x118   : > { %3869 = vmatmul.mubr.msk.bf16.gmra.mrb[12].mxu0 %vm586_vm1, %v4823_v12 }
 0x119   : > { %3872 = vmatprep.mubr.msk.bf16.mxu0 %vm586_vm1, %v4850_v33 }
 0x11d   : > { %3729 = vmatmul.mubr.msk.bf16.vlgmr.msra.gmra.mrb[16].mxu1 %vm586_vm1, %v5421_v10 }
 0x11e   : > { %3732 = vmatprep.mubr.msk.bf16.mxu1 %vm586_vm1, %v5423_v21 }
 0x120   : > { %3873 = vmatmul.mubr.msk.bf16.gmra.mrb[16].mxu0 %vm586_vm1, %v4855_v48 }
 0x121   : > { %3876 = vmatprep.mubr.msk.bf16.mxu0 %vm586_vm1, %v4885_v52 }
 0x125   : > { %3733 = vmatmul.mubr.msk.bf16.gmra.mrb[20].mxu1 %vm586_vm1, %v4704_v5 }
 0x126   : > { %3736 = vmatprep.mubr.msk.bf16.mxu1 %vm586_vm1, %v4756_v30  ;;  %v5187_v30 = vld [vmem:[%s5342_s3] ss:$0 sm:$0xff] }
 0x128   : > { %3877 = vmatmul.mubr.msk.bf16.gmra.mrb[20].mxu0 %vm586_vm1, %v4893_v19 }
 0x129   : > { %3880 = vmatprep.mubr.msk.bf16.mxu0 %vm586_vm1, %v4919_v42 }
 0x12d   : > { %3737 = vmatmul.mubr.msk.bf16.gmra.mrb[24].mxu1 %vm586_vm1, %v4763_v17 }
 0x12e   : > { %3740 = vmatprep.mubr.msk.bf16.mxu1 %vm586_vm1, %v4801_v59 }
 0x130   : > { %3881 = vmatmul.mubr.msk.bf16.gmra.mrb[24].mxu0 %vm586_vm1, %v4923_v43 }
 0x131   : > { %3884 = vmatprep.mubr.msk.bf16.mxu0 %vm586_vm1, %v4937_v39 }
 0x135   : > { %3741 = vmatmul.mubr.msk.bf16.gmra.mrb[28].mxu1 %vm586_vm1, %v4933_v50 }
 0x138   : > { %3885 = vmatmul.mubr.msk.bf16.gmra.mrb[28].mxu0 %vm586_vm1, %v2508_v62 }
 0x1b0   : > { %v3678_v53 = vpop.f32.mrb[0].mxu1 }
 0x1b1   : > { %v1459_v18 = vpop.f32.mrb[1].mxu1 }
 0x1b2   : > { %v3679_v28 = vpop.f32.mrb[2].mxu1 }
 0x1b3   : > { %v1462_v49 = vpop.f32.mrb[3].mxu1 }
 0x1b8   : > { %v3682_v55 = vpop.f32.mrb[4].mxu1 }
 0x1b9   : > { %v1475_v56 = vpop.f32.mrb[5].mxu1 }
 0x1ba   : > { %v3683_v29 = vpop.f32.mrb[6].mxu1 }
 0x1bb   : > { %v1478_v16 = vpop.f32.mrb[7].mxu1 }
 0x1c0   : > { %v3686_v60 = vpop.f32.mrb[8].mxu1 }
 0x1c1   : > { %v5165_v32 = vpop.f32.mrb[9].mxu1 }
 0x1c2   : > { %v5167_v15 = vpop.f32.mrb[10].mxu1 }
 0x1c3   : > { %v5169_v11 = vpop.f32.mrb[11].mxu1 }
 0x1c8   : > { %v5171_v44 = vpop.f32.mrb[12].mxu1 }
 0x1c9   : > { %v5173_v40 = vpop.f32.mrb[13].mxu1 }
 0x1ca   : > { %v5175_v38 = vpop.f32.mrb[14].mxu1 }
 0x1cb   : > { %v5177_v51 = vpop.f32.mrb[15].mxu1 }
 0x1d3   : > { %v3858_v5 = vpop.f32.mrb[0].mxu0 }
 0x1d4   : > { %v3892_v31 = vadd.f32 %v3858_v5, %v3678_v53  ;;  %v2563_v61 = vpop.f32.mrb[1].mxu0 }
 0x1d5   : > { %v3893_v17 = vadd.f32 %v2563_v61, %v1459_v18  ;;  %v3859_v3 = vpop.f32.mrb[2].mxu0 }
 0x1d6   : > { %v2731_v36 = vmul.f32 %v3892_v31, %v5182_v24  ;;  %v3894_v59 = vadd.f32 %v3859_v3, %v3679_v28  ;;  %v2566_v7 = vpop.f32.mrb[3].mxu0 }
 0x1d7   : > { %v2729_v12 = vmul.f32 %v3893_v17, %v5182_v24  ;;  %v3895_v33 = vadd.f32 %v2566_v7, %v1462_v49 }
 0x1d8   : > { %v2770_v48 = vadd.f32 %v5187_v30, %v2731_v36  ;;  %v2732_v52 = vmul.f32 %v3894_v59, %v5182_v24 }
 0x1d9   : > { %v2768_v19 = vadd.f32 %v5187_v30, %v2729_v12  ;;  %v2730_v45 = vmul.f32 %v3895_v33, %v5182_v24 }
 0x1da   : > { %v2802_v42 = vmax.f32 %v2770_v48, 0.0  ;;  %v2771_v43 = vadd.f32 %v5187_v30, %v2732_v52 }
 0x1db   : > { %v2800_v26 = vmax.f32 %v2768_v19, 0.0  ;;  %v2769_v6 = vadd.f32 %v5187_v30, %v2730_v45  ;;  %v3862_v41 = vpop.f32.mrb[4].mxu0 }
 0x1dc   : > { %v3372_v46 = vpack.c.bf16 %v2802_v42, %v2802_v42  ;;  %v2803_v50 = vmax.f32 %v2771_v43, 0.0  ;;  %v3896_v39 = vadd.f32 %v3862_v41, %v3682_v55  ;;  %v2579_v63 = vpop.f32.mrb[5].mxu0 }
 0x1dd   : > { %v3370_v34 = vpack.c.bf16 %v2800_v26, %v2800_v26  ;;  %v2801_v4 = vmax.f32 %v2769_v6, 0.0  ;;  %v3897_v9 = vadd.f32 %v2579_v63, %v1475_v56  ;;  %v3863_v2 = vpop.f32.mrb[6].mxu0 }
 0x1de   : > { %2963 = vst.msk [vmem:[%s5200_s22 + $0x8] sm:$0xf] %vm2960_vm3, %v3372_v46  ;;  %v3373_v23 = vpack.c.bf16 %v2803_v50, %v2803_v50  ;;  %v2735_v57 = vmul.f32 %v3896_v39, %v5182_v24  ;;  %v3898_v13 = vadd.f32 %v3863_v2, %v3683_v29  ;;  %v2582_v20 = vpop.f32.mrb[7].mxu0 }
 0x1df   : > { %2961 = vst.msk [vmem:[%s5200_s22] sm:$0xf] %vm2960_vm3, %v3370_v34  ;;  %v3371_v58 = vpack.c.bf16 %v2801_v4, %v2801_v4  ;;  %v2733_v22 = vmul.f32 %v3897_v9, %v5182_v24  ;;  %v3899_v0 = vadd.f32 %v2582_v20, %v1478_v16 }
 0x1e0   : > { %2964 = vst.msk [vmem:[%s5200_s22 + $0xc] sm:$0xf] %vm2960_vm3, %v3373_v23  ;;  %v2774_v25 = vadd.f32 %v5187_v30, %v2735_v57  ;;  %v2736_v62 = vmul.f32 %v3898_v13, %v5182_v24 }
 0x1e1   : > { %2962 = vst.msk [vmem:[%s5200_s22 + $0x4] sm:$0xf] %vm2960_vm3, %v3371_v58  ;;  %v2772_v37 = vadd.f32 %v5187_v30, %v2733_v22  ;;  %v2734_v10 = vmul.f32 %v3899_v0, %v5182_v24 }
 0x1e2   : > { %v2806_v54 = vmax.f32 %v2774_v25, 0.0  ;;  %v2775_v21 = vadd.f32 %v5187_v30, %v2736_v62 }
 0x1e3   : > { %v2804_v1 = vmax.f32 %v2772_v37, 0.0  ;;  %v2773_v8 = vadd.f32 %v5187_v30, %v2734_v10  ;;  %v3866_v14 = vpop.f32.mrb[8].mxu0 }
 0x1e4   : > { %v3376_v27 = vpack.c.bf16 %v2806_v54, %v2806_v54  ;;  %v2807_v35 = vmax.f32 %v2775_v21, 0.0  ;;  %v3900_v47 = vadd.f32 %v3866_v14, %v3686_v60  ;;  %v2595_v53 = vpop.f32.mrb[9].mxu0 }
 0x1e5   : > { %v3374_v18 = vpack.c.bf16 %v2804_v1, %v2804_v1  ;;  %v2805_v28 = vmax.f32 %v2773_v8, 0.0  ;;  %v3901_v49 = vadd.f32 %v2595_v53, %v5165_v32  ;;  %v3867_v55 = vpop.f32.mrb[10].mxu0 }
 0x1e6   : > { %2967 = vst.msk [vmem:[%s5200_s22 + $0x18] sm:$0xf] %vm2960_vm3, %v3376_v27  ;;  %v3377_v56 = vpack.c.bf16 %v2807_v35, %v2807_v35  ;;  %v2739_v29 = vmul.f32 %v3900_v47, %v5182_v24  ;;  %v3902_v16 = vadd.f32 %v3867_v55, %v5167_v15  ;;  %v2598_v5 = vpop.f32.mrb[11].mxu0 }
 0x1e7   : > { %2965 = vst.msk [vmem:[%s5200_s22 + $0x10] sm:$0xf] %vm2960_vm3, %v3374_v18  ;;  %v3375_v31 = vpack.c.bf16 %v2805_v28, %v2805_v28  ;;  %v2737_v60 = vmul.f32 %v3901_v49, %v5182_v24  ;;  %v3903_v61 = vadd.f32 %v2598_v5, %v5169_v11 }
 0x1e8   : > { %2968 = vst.msk [vmem:[%s5200_s22 + $0x1c] sm:$0xf] %vm2960_vm3, %v3377_v56  ;;  %v2778_v32 = vadd.f32 %v5187_v30, %v2739_v29  ;;  %v2740_v17 = vmul.f32 %v3902_v16, %v5182_v24 }
 0x1e9   : > { %2966 = vst.msk [vmem:[%s5200_s22 + $0x14] sm:$0xf] %vm2960_vm3, %v3375_v31  ;;  %v2776_v3 = vadd.f32 %v5187_v30, %v2737_v60  ;;  %v2738_v15 = vmul.f32 %v3903_v61, %v5182_v24 }
 0x1ea   : > { %v2810_v36 = vmax.f32 %v2778_v32, 0.0  ;;  %v2779_v59 = vadd.f32 %v5187_v30, %v2740_v17 }
 0x1eb   : > { %v2808_v7 = vmax.f32 %v2776_v3, 0.0  ;;  %v2777_v11 = vadd.f32 %v5187_v30, %v2738_v15  ;;  %v3870_v12 = vpop.f32.mrb[12].mxu0 }
 0x1ec   : > { %v3380_v33 = vpack.c.bf16 %v2810_v36, %v2810_v36  ;;  %v2811_v48 = vmax.f32 %v2779_v59, 0.0  ;;  %v3904_v52 = vadd.f32 %v3870_v12, %v5171_v44  ;;  %v2611_v19 = vpop.f32.mrb[13].mxu0 }
 0x1ed   : > { %v3378_v45 = vpack.c.bf16 %v2808_v7, %v2808_v7  ;;  %v2809_v42 = vmax.f32 %v2777_v11, 0.0  ;;  %v3905_v43 = vadd.f32 %v2611_v19, %v5173_v40  ;;  %v3871_v26 = vpop.f32.mrb[14].mxu0 }
 0x1ee   : > { %2971 = vst.msk [vmem:[%s5200_s22 + $0x28] sm:$0xf] %vm2960_vm3, %v3380_v33  ;;  %v3381_v6 = vpack.c.bf16 %v2811_v48, %v2811_v48  ;;  %v2743_v41 = vmul.f32 %v3904_v52, %v5182_v24  ;;  %v3906_v46 = vadd.f32 %v3871_v26, %v5175_v38  ;;  %v2614_v50 = vpop.f32.mrb[15].mxu0 }
 0x1ef   : > { %2969 = vst.msk [vmem:[%s5200_s22 + $0x20] sm:$0xf] %vm2960_vm3, %v3378_v45  ;;  %v3379_v39 = vpack.c.bf16 %v2809_v42, %v2809_v42  ;;  %v2741_v44 = vmul.f32 %v3905_v43, %v5182_v24  ;;  %v3907_v63 = vadd.f32 %v2614_v50, %v5177_v51 }
 0x1f0   : > { %v3730_v34 = vpop.f32.mrb[16].mxu1  ;;  %2972 = vst.msk [vmem:[%s5200_s22 + $0x2c] sm:$0xf] %vm2960_vm3, %v3381_v6  ;;  %v2782_v40 = vadd.f32 %v5187_v30, %v2743_v41  ;;  %v2744_v4 = vmul.f32 %v3906_v46, %v5182_v24 }
 0x1f1   : > { %v1747_v9 = vpop.f32.mrb[17].mxu1  ;;  %2970 = vst.msk [vmem:[%s5200_s22 + $0x24] sm:$0xf] %vm2960_vm3, %v3379_v39  ;;  %v2780_v38 = vadd.f32 %v5187_v30, %v2741_v44  ;;  %v2742_v2 = vmul.f32 %v3907_v63, %v5182_v24 }
 0x1f2   : > { %v3731_v23 = vpop.f32.mrb[18].mxu1  ;;  %v2814_v57 = vmax.f32 %v2782_v40, 0.0  ;;  %v2783_v13 = vadd.f32 %v5187_v30, %v2744_v4 }
 0x1f3   : > { %v1750_v51 = vpop.f32.mrb[19].mxu1  ;;  %v2812_v20 = vmax.f32 %v2780_v38, 0.0  ;;  %v2781_v58 = vadd.f32 %v5187_v30, %v2742_v2  ;;  %v3874_v22 = vpop.f32.mrb[16].mxu0 }
 0x1f4   : > { %v3384_v0 = vpack.c.bf16 %v2814_v57, %v2814_v57  ;;  %v2815_v25 = vmax.f32 %v2783_v13, 0.0  ;;  %v3908_v62 = vadd.f32 %v3874_v22, %v3730_v34  ;;  %v2627_v37 = vpop.f32.mrb[17].mxu0 }
 0x1f5   : > { %v3382_v10 = vpack.c.bf16 %v2812_v20, %v2812_v20  ;;  %v2813_v54 = vmax.f32 %v2781_v58, 0.0  ;;  %v3909_v21 = vadd.f32 %v2627_v37, %v1747_v9  ;;  %v3875_v1 = vpop.f32.mrb[18].mxu0 }
 0x1f6   : > { %2975 = vst.msk [vmem:[%s5200_s22 + $0x38] sm:$0xf] %vm2960_vm3, %v3384_v0  ;;  %v3385_v8 = vpack.c.bf16 %v2815_v25, %v2815_v25  ;;  %v2747_v14 = vmul.f32 %v3908_v62, %v5182_v24  ;;  %v3910_v27 = vadd.f32 %v3875_v1, %v3731_v23  ;;  %v2630_v35 = vpop.f32.mrb[19].mxu0 }
 0x1f7   : > { %2973 = vst.msk [vmem:[%s5200_s22 + $0x30] sm:$0xf] %vm2960_vm3, %v3382_v10  ;;  %v3383_v47 = vpack.c.bf16 %v2813_v54, %v2813_v54  ;;  %v2745_v53 = vmul.f32 %v3909_v21, %v5182_v24  ;;  %v3911_v18 = vadd.f32 %v2630_v35, %v1750_v51 }
 0x1f8   : > { %v3734_v28 = vpop.f32.mrb[20].mxu1  ;;  %2976 = vst.msk [vmem:[%s5200_s22 + $0x3c] sm:$0xf] %vm2960_vm3, %v3385_v8  ;;  %v2786_v49 = vadd.f32 %v5187_v30, %v2747_v14  ;;  %v2748_v55 = vmul.f32 %v3910_v27, %v5182_v24 }
 0x1f9   : > { %v1763_v56 = vpop.f32.mrb[21].mxu1  ;;  %2974 = vst.msk [vmem:[%s5200_s22 + $0x34] sm:$0xf] %vm2960_vm3, %v3383_v47  ;;  %v2784_v29 = vadd.f32 %v5187_v30, %v2745_v53  ;;  %v2746_v16 = vmul.f32 %v3911_v18, %v5182_v24 }
 0x1fa   : > { %v3735_v5 = vpop.f32.mrb[22].mxu1  ;;  %v2818_v31 = vmax.f32 %v2786_v49, 0.0  ;;  %v2787_v60 = vadd.f32 %v5187_v30, %v2748_v55 }
 0x1fb   : > { %v1766_v61 = vpop.f32.mrb[23].mxu1  ;;  %v2816_v32 = vmax.f32 %v2784_v29, 0.0  ;;  %v2785_v17 = vadd.f32 %v5187_v30, %v2746_v16  ;;  %v3878_v3 = vpop.f32.mrb[20].mxu0 }
 0x1fc   : > { %v3388_v15 = vpack.c.bf16 %v2818_v31, %v2818_v31  ;;  %v2819_v36 = vmax.f32 %v2787_v60, 0.0  ;;  %v3912_v59 = vadd.f32 %v3878_v3, %v3734_v28  ;;  %v2643_v7 = vpop.f32.mrb[21].mxu0 }
 0x1fd   : > { %v3386_v11 = vpack.c.bf16 %v2816_v32, %v2816_v32  ;;  %v2817_v12 = vmax.f32 %v2785_v17, 0.0  ;;  %v3913_v33 = vadd.f32 %v2643_v7, %v1763_v56  ;;  %v3879_v48 = vpop.f32.mrb[22].mxu0 }
 0x1fe   : > { %2979 = vst.msk [vmem:[%s5200_s22 + $0x48] sm:$0xf] %vm2960_vm3, %v3388_v15  ;;  %v3389_v52 = vpack.c.bf16 %v2819_v36, %v2819_v36  ;;  %v2751_v19 = vmul.f32 %v3912_v59, %v5182_v24  ;;  %v3914_v45 = vadd.f32 %v3879_v48, %v3735_v5  ;;  %v2646_v42 = vpop.f32.mrb[23].mxu0 }
 0x1ff   : > { %2977 = vst.msk [vmem:[%s5200_s22 + $0x40] sm:$0xf] %vm2960_vm3, %v3386_v11  ;;  %v3387_v43 = vpack.c.bf16 %v2817_v12, %v2817_v12  ;;  %v2749_v26 = vmul.f32 %v3913_v33, %v5182_v24  ;;  %v3915_v6 = vadd.f32 %v2646_v42, %v1766_v61 }
 0x200   : > { %v3738_v41 = vpop.f32.mrb[24].mxu1  ;;  %2980 = vst.msk [vmem:[%s5200_s22 + $0x4c] sm:$0xf] %vm2960_vm3, %v3389_v52  ;;  %v2790_v46 = vadd.f32 %v5187_v30, %v2751_v19  ;;  %v2752_v50 = vmul.f32 %v3914_v45, %v5182_v24 }
 0x201   : > { %v1779_v39 = vpop.f32.mrb[25].mxu1  ;;  %2978 = vst.msk [vmem:[%s5200_s22 + $0x44] sm:$0xf] %vm2960_vm3, %v3387_v43  ;;  %v2788_v44 = vadd.f32 %v5187_v30, %v2749_v26  ;;  %v2750_v63 = vmul.f32 %v3915_v6, %v5182_v24 }
 0x202   : > { %v3739_v34 = vpop.f32.mrb[26].mxu1  ;;  %v2822_v40 = vmax.f32 %v2790_v46, 0.0  ;;  %v2791_v4 = vadd.f32 %v5187_v30, %v2752_v50 }
 0x203   : > { %v1782_v9 = vpop.f32.mrb[27].mxu1  ;;  %v2820_v38 = vmax.f32 %v2788_v44, 0.0  ;;  %v2789_v2 = vadd.f32 %v5187_v30, %v2750_v63  ;;  %v3882_v23 = vpop.f32.mrb[24].mxu0 }
 0x204   : > { %v3392_v57 = vpack.c.bf16 %v2822_v40, %v2822_v40  ;;  %v2823_v13 = vmax.f32 %v2791_v4, 0.0  ;;  %v3916_v51 = vadd.f32 %v3882_v23, %v3738_v41  ;;  %v2659_v20 = vpop.f32.mrb[25].mxu0 }
 0x205   : > { %v3390_v58 = vpack.c.bf16 %v2820_v38, %v2820_v38  ;;  %v2821_v22 = vmax.f32 %v2789_v2, 0.0  ;;  %v3917_v0 = vadd.f32 %v2659_v20, %v1779_v39  ;;  %v3883_v25 = vpop.f32.mrb[26].mxu0 }
 0x206   : > { %2983 = vst.msk [vmem:[%s5200_s22 + $0x58] sm:$0xf] %vm2960_vm3, %v3392_v57  ;;  %v3393_v62 = vpack.c.bf16 %v2823_v13, %v2823_v13  ;;  %v2755_v37 = vmul.f32 %v3916_v51, %v5182_v24  ;;  %v3918_v10 = vadd.f32 %v3883_v25, %v3739_v34  ;;  %v2662_v54 = vpop.f32.mrb[27].mxu0 }
 0x207   : > { %2981 = vst.msk [vmem:[%s5200_s22 + $0x50] sm:$0xf] %vm2960_vm3, %v3390_v58  ;;  %v3391_v21 = vpack.c.bf16 %v2821_v22, %v2821_v22  ;;  %v2753_v1 = vmul.f32 %v3917_v0, %v5182_v24  ;;  %v3919_v8 = vadd.f32 %v2662_v54, %v1782_v9 }
 0x208   : > { %v3742_v14 = vpop.f32.mrb[28].mxu1  ;;  %2984 = vst.msk [vmem:[%s5200_s22 + $0x5c] sm:$0xf] %vm2960_vm3, %v3393_v62  ;;  %v2794_v27 = vadd.f32 %v5187_v30, %v2755_v37  ;;  %v2756_v35 = vmul.f32 %v3918_v10, %v5182_v24 }
 0x209   : > { %v1795_v47 = vpop.f32.mrb[29].mxu1  ;;  %2982 = vst.msk [vmem:[%s5200_s22 + $0x54] sm:$0xf] %vm2960_vm3, %v3391_v21  ;;  %v2792_v53 = vadd.f32 %v5187_v30, %v2753_v1  ;;  %v2754_v18 = vmul.f32 %v3919_v8, %v5182_v24 }
 0x20a   : > { %v3743_v28 = vpop.f32.mrb[30].mxu1  ;;  %v2826_v49 = vmax.f32 %v2794_v27, 0.0  ;;  %v2795_v55 = vadd.f32 %v5187_v30, %v2756_v35 }
 0x20b   : > { %v1798_v56 = vpop.f32.mrb[31].mxu1  ;;  %v2824_v29 = vmax.f32 %v2792_v53, 0.0  ;;  %v2793_v16 = vadd.f32 %v5187_v30, %v2754_v18  ;;  %v3886_v5 = vpop.f32.mrb[28].mxu0 }
 0x20c   : > { %v3396_v31 = vpack.c.bf16 %v2826_v49, %v2826_v49  ;;  %v2827_v60 = vmax.f32 %v2795_v55, 0.0  ;;  %v3920_v61 = vadd.f32 %v3886_v5, %v3742_v14  ;;  %v2675_v32 = vpop.f32.mrb[29].mxu0 }
 0x20d   : > { %v3394_v17 = vpack.c.bf16 %v2824_v29, %v2824_v29  ;;  %v2825_v3 = vmax.f32 %v2793_v16, 0.0  ;;  %v3921_v15 = vadd.f32 %v2675_v32, %v1795_v47  ;;  %v3887_v36 = vpop.f32.mrb[30].mxu0 }
 0x20e   : > { %2987 = vst.msk [vmem:[%s5200_s22 + $0x68] sm:$0xf] %vm2960_vm3, %v3396_v31  ;;  %v3397_v59 = vpack.c.bf16 %v2827_v60, %v2827_v60  ;;  %v2759_v7 = vmul.f32 %v3920_v61, %v5182_v24  ;;  %v3922_v11 = vadd.f32 %v3887_v36, %v3743_v28  ;;  %v2678_v12 = vpop.f32.mrb[31].mxu0 }
 0x20f   : > { %2985 = vst.msk [vmem:[%s5200_s22 + $0x60] sm:$0xf] %vm2960_vm3, %v3394_v17  ;;  %v3395_v33 = vpack.c.bf16 %v2825_v3, %v2825_v3  ;;  %v2757_v48 = vmul.f32 %v3921_v15, %v5182_v24  ;;  %v3923_v52 = vadd.f32 %v2678_v12, %v1798_v56 }
 0x210   : > { %2988 = vst.msk [vmem:[%s5200_s22 + $0x6c] sm:$0xf] %vm2960_vm3, %v3397_v59  ;;  %v2798_v19 = vadd.f32 %v5187_v30, %v2759_v7  ;;  %v2760_v45 = vmul.f32 %v3922_v11, %v5182_v24 }
 0x211   : > { %2986 = vst.msk [vmem:[%s5200_s22 + $0x64] sm:$0xf] %vm2960_vm3, %v3395_v33  ;;  %v2796_v42 = vadd.f32 %v5187_v30, %v2757_v48  ;;  %v2758_v43 = vmul.f32 %v3923_v52, %v5182_v24 }
 0x212   : > { %v2830_v26 = vmax.f32 %v2798_v19, 0.0  ;;  %v2799_v6 = vadd.f32 %v5187_v30, %v2760_v45 }
 0x213   : > { %v2828_v41 = vmax.f32 %v2796_v42, 0.0  ;;  %v2797_v46 = vadd.f32 %v5187_v30, %v2758_v43 }
 0x214   : > { %v3400_v50 = vpack.c.bf16 %v2830_v26, %v2830_v26  ;;  %v2831_v39 = vmax.f32 %v2799_v6, 0.0 }
 0x215   : > { %v3398_v44 = vpack.c.bf16 %v2828_v41, %v2828_v41  ;;  %v2829_v63 = vmax.f32 %v2797_v46, 0.0 }
 0x216   : > { %2991 = vst.msk [vmem:[%s5200_s22 + $0x78] sm:$0xf] %vm2960_vm3, %v3400_v50  ;;  %v3401_v34 = vpack.c.bf16 %v2831_v39, %v2831_v39 }
 0x217   : > { %2989 = vst.msk [vmem:[%s5200_s22 + $0x70] sm:$0xf] %vm2960_vm3, %v3398_v44  ;;  %v3399_v40 = vpack.c.bf16 %v2829_v63, %v2829_v63 }
 0x218   : > { %2992 = vst.msk [vmem:[%s5200_s22 + $0x7c] sm:$0xf] %vm2960_vm3, %v3401_v34 }
 0x219   : > { %2990 = vst.msk [vmem:[%s5200_s22 + $0x74] sm:$0xf] %vm2960_vm3, %v3399_v40 }
 0x21a PF: > { %s14_s17 = sadd.s32 1, %s4249_s17   ;;  %s5424_s15 = smov %s4245_s16 }
 0x21b   : > { %p11_p5 = scmp.ge.s32.totalorder %s14_s17, 4   ;;  %s5425_s16 = smov %s5427_s18 }
 0x21d   :  { %13 = sbr.rel (!%p11_p5) target bundleno = 2 (0x2), region = 83 }

</bundles_post_ra>
